<compile_context>
chip_gen: v7x
topology: tpu7x:2x2x1
jax: 0.10.0
libtpu: 0.0.40
codegen_flags: <defaults>
</compile_context>

<pallas_src>
import jax
import jax.numpy as jnp
from jax.experimental import pallas as pl
from jax.experimental.pallas import tpu as pltpu

D_FEAT = 1024          # CLIPAdapter hardcodes Adapter(1024, 4)
D_HID = D_FEAT // 4    # 256
RATIO = 0.2
NORM_EPS = 1e-30       # guards 0/0 on padded (all-zero) rows only


def clip_adapter_kernel(img_ref, w1_ref, w2_ref, txt_ref, out_ref, feat_ref):
    """Grid = (batch tiles, class tiles); class axis innermost ("arbitrary").

    img_ref : (TB, 1024) bf16   image features (block index depends on i only)
    w1_ref  : (1024, 256) bf16  adapter W1 (resident, single-buffered)
    w2_ref  : (256, 1024) bf16  adapter W2 * 0.25 (residual folded in)
    txt_ref : (1024, TC) bf16   normalized, logit-scaled text, transposed
    out_ref : (TB, TC)          logits tile
    feat_ref: (TB, 1024) bf16   VMEM scratch caching normalized image feats
    """
    j = pl.program_id(1)

    # Adapter MLP + residual + L2 norm: once per batch tile, cached in scratch.
    @pl.when(j == 0)
    def _():
        img_bf = img_ref[...]                                 # (TB, 1024) bf16
        img = img_bf.astype(jnp.float32)

        # Adapter MLP: Linear -> ReLU -> Linear -> ReLU (no biases).
        # bf16 MXU inputs, f32 accumulation.
        h = jnp.dot(img_bf, w1_ref[...], preferred_element_type=jnp.float32)
        h = jnp.maximum(h, 0.0)
        x = jnp.dot(h.astype(jnp.bfloat16), w2_ref[...],
                    preferred_element_type=jnp.float32)
        x = jnp.maximum(x, 0.0)

        # Residual mix: 0.2*x0 + 0.8*img == 0.8*(0.25*x0 + img); the 0.25 is
        # folded into W2 in the wrapper and the 0.8 cancels in the L2 norm.
        feat = x + img                                        # (TB, 1024) f32

        # L2-normalize along the feature dim via rsqrt (EUP slot).
        sumsq = jnp.sum(feat * feat, axis=-1, keepdims=True)
        feat = feat * jax.lax.rsqrt(jnp.maximum(sumsq, NORM_EPS))
        feat_ref[...] = feat.astype(jnp.bfloat16)

    # logits tile = feat @ (exp(logit_scale) * text_norm).T for this class tile.
    out_ref[...] = jnp.dot(feat_ref[...], txt_ref[...],
                           preferred_element_type=jnp.float32
                           ).astype(out_ref.dtype)


def clip_adapter_logits(image_features, adapter_w1, adapter_w2,
                        text_features, logit_scale, *,
                        out_dtype=jnp.float32):
    """image_features: (B, 1024) f32, adapter_w1: (1024, 256),
    adapter_w2: (256, 1024), text_features: (C, 1024), logit_scale: scalar
    (pre-exp). Returns (B, C) logits in out_dtype (use bf16 for large C)."""
    B, D = image_features.shape
    C = text_features.shape[0]
    assert D == D_FEAT

    # ---- hoisted text prep (tiny (C,1024) work, done once) ----------------
    t = text_features / jnp.linalg.norm(text_features, axis=-1, keepdims=True)
    t = jnp.exp(logit_scale).astype(jnp.float32) * t       # fold logit scale in
    # Class tile: multiple of 256 (fills the 256-wide v6e/v7x MXU), capped at
    # 1024 so VMEM use is independent of the total class count.
    tc = min(1024, pl.cdiv(C, 256) * 256)
    c_pad = pl.cdiv(C, tc) * tc
    txt_t = jnp.pad(t.T, ((0, 0), (0, c_pad - C))).astype(jnp.bfloat16)

    # ---- batch tile: grow up to 512 but keep >=2 grid steps when possible --
    tb = 512
    while tb > 128 and pl.cdiv(B, tb) < 2:
        tb //= 2
    b_pad = pl.cdiv(B, tb) * tb
    # Stream image features as bf16 (dominant HBM stream).
    img = jnp.pad(image_features.astype(jnp.bfloat16), ((0, b_pad - B), (0, 0)))

    w1 = adapter_w1.astype(jnp.bfloat16)
    # Fold the residual ratio into W2 (ReLU is positively homogeneous and the
    # leftover (1-ratio) factor cancels in the L2 norm). 0.25 = exact in bf16.
    w2 = (adapter_w2 * (RATIO / (1.0 - RATIO))).astype(jnp.bfloat16)

    nb, ncls = b_pad // tb, c_pad // tc
    out_bytes = jnp.dtype(out_dtype).itemsize

    # ---- VMEM budget (per-generation safe; re-derived from tile sizes) ----
    vmem_bytes = (2 * tb * D * 2              # img, double-buffered bf16
                  + D * D_HID * 2             # W1, single-buffered
                  + D_HID * D * 2             # W2, single-buffered
                  + 2 * D * tc * 2            # text tile, double-buffered
                  + 2 * tb * tc * out_bytes   # out tile, double-buffered
                  + tb * D * 2                # feat scratch (bf16)
                  + 4 * tb * D * 4)           # headroom for f32 intermediates
    vmem_limit = int(min(64 * 1024 * 1024,
                         max(32 * 1024 * 1024, (vmem_bytes * 3) // 2)))

    cost = pl.CostEstimate(
        flops=2 * b_pad * (D * D_HID + D_HID * D) + 2 * b_pad * D * c_pad,
        transcendentals=b_pad,
        bytes_accessed=(img.size * 2 + w1.size * 2 + w2.size * 2
                        + nb * txt_t.size * 2 + b_pad * c_pad * out_bytes),
    )

    out = pl.pallas_call(
        clip_adapter_kernel,
        out_shape=jax.ShapeDtypeStruct((b_pad, c_pad), out_dtype),
        grid_spec=pltpu.PrefetchScalarGridSpec(
            num_scalar_prefetch=0,
            grid=(nb, ncls),
            in_specs=[
                # image features: depend only on the batch tile index.
                pl.BlockSpec((tb, D), lambda i, j: (i, 0)),
                # adapter weights: constant blocks -> single-buffered.
                pl.BlockSpec((D, D_HID), lambda i, j: (0, 0),
                             pipeline_mode=pl.Buffered(1)),
                pl.BlockSpec((D_HID, D), lambda i, j: (0, 0),
                             pipeline_mode=pl.Buffered(1)),
                # text: tiled over the class axis.
                pl.BlockSpec((D, tc), lambda i, j: (0, j)),
            ],
            out_specs=pl.BlockSpec((tb, tc), lambda i, j: (i, j)),
            scratch_shapes=[pltpu.VMEM((tb, D), jnp.bfloat16)],
        ),
        compiler_params=pltpu.CompilerParams(
            # batch axis sharded across TensorCores (v7x megacore); class axis
            # kept "arbitrary" so the pl.when(j==0) feature cache is valid.
            dimension_semantics=("parallel", "arbitrary"),
            vmem_limit_bytes=vmem_limit,
        ),
        cost_estimate=cost,
    )(img, w1, w2, txt_t)

    return out[:B, :C]


if __name__ == "__main__":
    key = jax.random.PRNGKey(0)
    k_img, k_vis, k_w1, k_w2, k_txt = jax.random.split(key, 5)

    # Small synthetic problem sizes.
    B, Cin, H, W = 2, 3, 16, 16     # NCHW image input, like PyTorch
    NUM_CLASSES = 8

    image = jax.random.normal(k_img, (B, Cin, H, W), dtype=jnp.float32)

    # --- Glue (plain JAX): synthetic stand-in for clip_model.visual -------
    # TODO(synk): real CLIP visual encoder omitted; deterministic projection.
    vis_proj = jax.random.normal(k_vis, (Cin * H * W, D_FEAT),
                                 dtype=jnp.float32) * 0.02
    image_features = image.reshape(B, -1) @ vis_proj            # (B, 1024)

    # --- Deterministic adapter parameters (nn.Linear, bias=False) ---------
    # Stored as (in_dim, out_dim) so the kernel does row-major x @ W.
    adapter_w1 = jax.random.normal(k_w1, (D_FEAT, D_HID),
                                   dtype=jnp.float32) * (1.0 / D_FEAT ** 0.5)
    adapter_w2 = jax.random.normal(k_w2, (D_HID, D_FEAT),
                                   dtype=jnp.float32) * (1.0 / D_HID ** 0.5)

    # --- Synthetic text-encoder output (TextEncoder.forward) --------------
    # TODO(synk): real CLIP text encoder omitted; deterministic features.
    text_features = jax.random.normal(k_txt, (NUM_CLASSES, D_FEAT),
                                      dtype=jnp.float32)

    # CLIP's logit_scale parameter init: ln(1/0.07).
    logit_scale = jnp.array(jnp.log(1.0 / 0.07), dtype=jnp.float32)

    logits = clip_adapter_logits(image_features, adapter_w1, adapter_w2,
                                 text_features, logit_scale)
    jax.block_until_ready(logits)

    # Reference in plain JAX mirroring the module's math with the kernel's
    # precision policy (bf16 MXU inputs, f32 accumulation; f32 elementwise).
    w1b = adapter_w1.astype(jnp.bfloat16)
    w2b = adapter_w2.astype(jnp.bfloat16)
    imb = image_features.astype(jnp.bfloat16)
    h = jnp.maximum(jnp.dot(imb, w1b, preferred_element_type=jnp.float32), 0.0)
    x = jnp.maximum(jnp.dot(h.astype(jnp.bfloat16), w2b,
                            preferred_element_type=jnp.float32), 0.0)
    f = RATIO * x + (1.0 - RATIO) * image_features
    f = f * jax.lax.rsqrt(jnp.sum(f * f, axis=-1, keepdims=True))
    t = text_features / jnp.linalg.norm(text_features, axis=-1, keepdims=True)
    t = jnp.exp(logit_scale) * t
    ref = jnp.dot(f.astype(jnp.bfloat16), t.T.astype(jnp.bfloat16),
                  preferred_element_type=jnp.float32)

    assert logits.shape == (B, NUM_CLASSES)
    assert bool(jnp.all(jnp.isfinite(logits)))
    assert jnp.allclose(logits, ref, rtol=2e-2, atol=2e-2)

    print("KERNEL_OK")
</pallas_src>

<mosaic_0001>
module attributes {stable_mosaic.version = 11 : i64} {
  func.func @clip_adapter_kernel(%arg0: i32, %arg1: i32, %arg2: memref<128x1024xbf16, #tpu.memory_space<vmem>>, %arg3: memref<1024x256xbf16, #tpu.memory_space<vmem>>, %arg4: memref<256x1024xbf16, #tpu.memory_space<vmem>>, %arg5: memref<1024x256xbf16, #tpu.memory_space<vmem>>, %arg6: memref<128x256xf32, #tpu.memory_space<vmem>>, %arg7: memref<128x1024xbf16, #tpu.memory_space<vmem>>) attributes {dimension_semantics = [#tpu.dimension_semantics<parallel>, #tpu.dimension_semantics<arbitrary>], iteration_bounds = array<i64: 1, 1>, scalar_prefetch = 0 : i64, scratch_operands = 1 : i64, tpu.core_type = #tpu.core_type<tc>, window_params = [{transform_indices = @transform_0, window_bounds = array<i64: 128, 1024>}, {pipeline_mode = #tpu.pipeline_mode<synchronous>, transform_indices = @transform_1, window_bounds = array<i64: 1024, 256>}, {pipeline_mode = #tpu.pipeline_mode<synchronous>, transform_indices = @transform_2, window_bounds = array<i64: 256, 1024>}, {transform_indices = @transform_3, window_bounds = array<i64: 1024, 256>}, {transform_indices = @transform_4, window_bounds = array<i64: 128, 256>}]} {
    %c0_i32 = arith.constant 0 : i32
    %0 = arith.cmpi eq, %arg1, %c0_i32 : i32
    %1 = arith.extui %0 : i1 to i32
    %c0_i32_0 = arith.constant 0 : i32
    %2 = arith.cmpi ne, %1, %c0_i32_0 : i32
    scf.if %2 {
      %c0_6 = arith.constant 0 : index
      %c0_7 = arith.constant 0 : index
      %7 = vector.load %arg2[%c0_6, %c0_7] : memref<128x1024xbf16, #tpu.memory_space<vmem>>, vector<128x1024xbf16>
      %8 = arith.extf %7 : vector<128x1024xbf16> to vector<128x1024xf32>
      %c0_8 = arith.constant 0 : index
      %c0_9 = arith.constant 0 : index
      %9 = vector.load %arg3[%c0_8, %c0_9] : memref<1024x256xbf16, #tpu.memory_space<vmem>>, vector<1024x256xbf16>
      %cst_10 = arith.constant dense<0.000000e+00> : vector<128x256xf32>
      %10 = tpu.matmul %7, %9, %cst_10 {dimension_numbers = #tpu.dot_dimension_numbers<[1], [0], [0], [1], [0, 0, 1, 1], [], []>} : vector<128x1024xbf16>, vector<1024x256xbf16>, vector<128x256xf32> -> vector<128x256xf32>
      %cst_11 = arith.constant 0.000000e+00 : f32
      %11 = vector.broadcast %cst_11 : f32 to vector<128x256xf32>
      %12 = arith.maximumf %10, %11 : vector<128x256xf32>
      %13 = arith.truncf %12 : vector<128x256xf32> to vector<128x256xbf16>
      %c0_12 = arith.constant 0 : index
      %c0_13 = arith.constant 0 : index
      %14 = vector.load %arg4[%c0_12, %c0_13] : memref<256x1024xbf16, #tpu.memory_space<vmem>>, vector<256x1024xbf16>
      %cst_14 = arith.constant dense<0.000000e+00> : vector<128x1024xf32>
      %15 = tpu.matmul %13, %14, %cst_14 {dimension_numbers = #tpu.dot_dimension_numbers<[1], [0], [0], [1], [0, 0, 1, 1], [], []>} : vector<128x256xbf16>, vector<256x1024xbf16>, vector<128x1024xf32> -> vector<128x1024xf32>
      %cst_15 = arith.constant 0.000000e+00 : f32
      %16 = vector.broadcast %cst_15 : f32 to vector<128x1024xf32>
      %17 = arith.maximumf %15, %16 : vector<128x1024xf32>
      %18 = arith.addf %17, %8 : vector<128x1024xf32>
      %19 = arith.mulf %18, %18 : vector<128x1024xf32>
      %cst_16 = arith.constant dense<0.000000e+00> : vector<128xf32>
      %20 = vector.multi_reduction <add>, %19, %cst_16 [1] : vector<128x1024xf32> to vector<128xf32>
      %21 = vector.shape_cast %20 : vector<128xf32> to vector<128x1xf32>
      %cst_17 = arith.constant 1.000000e-30 : f32
      %22 = vector.broadcast %cst_17 : f32 to vector<128x1xf32>
      %23 = arith.maximumf %21, %22 : vector<128x1xf32>
      %24 = math.rsqrt %23 : vector<128x1xf32>
      %25 = vector.broadcast %24 : vector<128x1xf32> to vector<128x1024xf32>
      %26 = arith.mulf %18, %25 : vector<128x1024xf32>
      %27 = arith.truncf %26 : vector<128x1024xf32> to vector<128x1024xbf16>
      %c0_18 = arith.constant 0 : index
      %c0_19 = arith.constant 0 : index
      %28 = vector.load %arg7[%c0_18, %c0_19] : memref<128x1024xbf16, #tpu.memory_space<vmem>>, vector<128x1024xbf16>
      tpu.vector_store %arg7[%c0_18, %c0_19], %27 {strides = array<i32>} : memref<128x1024xbf16, #tpu.memory_space<vmem>>, vector<128x1024xbf16>,
    } else {
    }
    %c0 = arith.constant 0 : index
    %c0_1 = arith.constant 0 : index
    %3 = vector.load %arg7[%c0, %c0_1] : memref<128x1024xbf16, #tpu.memory_space<vmem>>, vector<128x1024xbf16>
    %c0_2 = arith.constant 0 : index
    %c0_3 = arith.constant 0 : index
    %4 = vector.load %arg5[%c0_2, %c0_3] : memref<1024x256xbf16, #tpu.memory_space<vmem>>, vector<1024x256xbf16>
    %cst = arith.constant dense<0.000000e+00> : vector<128x256xf32>
    %5 = tpu.matmul %3, %4, %cst {dimension_numbers = #tpu.dot_dimension_numbers<[1], [0], [0], [1], [0, 0, 1, 1], [], []>} : vector<128x1024xbf16>, vector<1024x256xbf16>, vector<128x256xf32> -> vector<128x256xf32>
    %c0_4 = arith.constant 0 : index
    %c0_5 = arith.constant 0 : index
    %6 = vector.load %arg6[%c0_4, %c0_5] : memref<128x256xf32, #tpu.memory_space<vmem>>, vector<128x256xf32>
    tpu.vector_store %arg6[%c0_4, %c0_5], %5 {strides = array<i32>} : memref<128x256xf32, #tpu.memory_space<vmem>>, vector<128x256xf32>,
    return
  }
  func.func @transform_0(%arg0: i32, %arg1: i32) -> (i32, i32) {
    %c0_i32 = arith.constant 0 : i32
    %c0_i32_0 = arith.constant 0 : i32
    return %arg0, %c0_i32 : i32, i32
  }
  func.func @transform_1(%arg0: i32, %arg1: i32) -> (i32, i32) {
    %c0_i32 = arith.constant 0 : i32
    %c0_i32_0 = arith.constant 0 : i32
    %c0_i32_1 = arith.constant 0 : i32
    return %c0_i32, %c0_i32_0 : i32, i32
  }
  func.func @transform_2(%arg0: i32, %arg1: i32) -> (i32, i32) {
    %c0_i32 = arith.constant 0 : i32
    %c0_i32_0 = arith.constant 0 : i32
    %c0_i32_1 = arith.constant 0 : i32
    return %c0_i32, %c0_i32_0 : i32, i32
  }
  func.func @transform_3(%arg0: i32, %arg1: i32) -> (i32, i32) {
    %c0_i32 = arith.constant 0 : i32
    %c0_i32_0 = arith.constant 0 : i32
    return %c0_i32, %arg1 : i32, i32
  }
  func.func @transform_4(%arg0: i32, %arg1: i32) -> (i32, i32) {
    %c0_i32 = arith.constant 0 : i32
    return %arg0, %arg1 : i32, i32
  }
}

</mosaic_0001>

<bundles_post_ra>
// kernel: tpu_custom_call.1
= control target key start
LH: loop header
LB: loop body
LE: loop exit
PB: predicated region body
PF: predicated region fallthrough
CT: control target
= control target key end

     0   :  { %9 = vsyncpa [#allocation4], 0  ;;  %s8648_s0 = inlined_call_operand.hbm [shape: bf16[128,1024], index: 0, kind: input, shape index: {}]   ;;  %s8649_s1 = inlined_call_operand.hbm [shape: bf16[1024,256], index: 1, kind: input, shape index: {}]   ;;  %s8650_s2 = inlined_call_operand.hbm [shape: bf16[256,1024], index: 2, kind: input, shape index: {}]   ;;  %s8651_s3 = inlined_call_operand.hbm [shape: bf16[1024,256], index: 3, kind: input, shape index: {}]   ;;  %s8652_s4 = inlined_call_operand.hbm [shape: f32[128,256], index: 4, kind: output, shape index: {}]  }
   0x1   :  { %10 = vsyncpa [#allocation7], 0 }
   0x2   :  { %11 = vsyncpa [#allocation10], 0 }
   0x3   :  { %12 = vsyncpa [#allocation5], 0  ;;  %s6477_s15 = smov [#allocation6]   ;;  %s6359_s19 = scalar_lea.hbm %s8649_s1, 16384 }
   0x4   :  { %s30_s16 = sshll.u32 %s6477_s15, 4  ;;  %p6360_p0 = scmp.ne.s32.totalorder %s8649_s1, %s6359_s19  ;;  %s31_s16 = int_to_ptr.vmem [resolvable:$true] %s30_s16 }
   0x5   :  { %p6363_p1 = scmp.lt.u32.totalorder %s6359_s19, %s8649_s1 }
   0x7   :  { %p6365_p2 = pnand %p6363_p1, %p6360_p0 }
   0x9   :  { %6368 = shalt.err (!%p6365_p2)
}
   0xa   :  { %s6369_s24 = scalar_lea.vmem %s31_s16, 16384  ;;  %p6374_p4 = scmp.lt.s32.totalorder %s31_s16, %s31_s16 }
   0xb   :  { %p6370_p3 = scmp.ne.s32.totalorder %s31_s16, %s6369_s24  ;;  %p6375_p5 = scmp.lt.s32.totalorder %s6369_s24, %s6369_s24 }
   0xd   :  { %p6376_p6 = por %p6375_p5, %p6374_p4 }
   0xf   :  { %p6377_p7 = pnand %p6376_p6, %p6370_p3 }
  0x11   :  { %6380 = shalt.err (!%p6377_p7)
}
  0x12   :  { %s6478_s25 = smov 128   ;;  %s6479_s26 = smov 8  }
  0x13   :  { %36 = dma.hbm_to_vmem [thread:$0]  %s8649_s1, 16384, %s31_s16, [#allocation7], %s6478_s25, %s6478_s25, %s6479_s26  }
  0x14   :  { %s6480_s29 = smov [#allocation3]   ;;  %s6381_s7 = scalar_lea.hbm %s8648_s0, 8192 }
  0x15   :  { %s18_s30 = sshll.u32 %s6480_s29, 4  ;;  %p6382_p8 = scmp.ne.s32.totalorder %s8648_s0, %s6381_s7  ;;  %s19_s30 = int_to_ptr.vmem [resolvable:$true] %s18_s30 }
  0x16   :  { %p6385_p9 = scmp.lt.u32.totalorder %s6381_s7, %s8648_s0 }
  0x18   :  { %p6387_p10 = pnand %p6385_p9, %p6382_p8 }
  0x1a   :  { %6390 = shalt.err (!%p6387_p10)
}
  0x1b   :  { %s6391_s12 = scalar_lea.vmem %s19_s30, 8192  ;;  %p6396_p12 = scmp.lt.s32.totalorder %s19_s30, %s19_s30 }
  0x1c   :  { %p6392_p11 = scmp.ne.s32.totalorder %s19_s30, %s6391_s12  ;;  %p6397_p13 = scmp.lt.s32.totalorder %s6391_s12, %s6391_s12 }
  0x1e   :  { %p6398_p0 = por %p6397_p13, %p6396_p12 }
  0x20   :  { %p6399_p1 = pnand %p6398_p0, %p6392_p11 }
  0x22   :  { %6402 = shalt.err (!%p6399_p1)
}
  0x23   :  { %s6481_s1 = smov 512   ;;  %s6482_s13 = smov 32  }
  0x24   :  { %24 = dma.hbm_to_vmem [thread:$0]  %s8648_s0, 8192, %s19_s30, [#allocation4], %s6481_s1, %s6481_s1, %s6482_s13  }
  0x25   :  { %s6483_s16 = smov [#allocation8]   ;;  %s6484_s18 = smov [#allocation9]  }
  0x26   :  { %s42_s17 = sshll.u32 %s6483_s16, 4  ;;  %s54_s19 = sshll.u32 %s6484_s18, 4  ;;  %s43_s17 = int_to_ptr.vmem [resolvable:$true] %s42_s17  ;;  %s6540_s19 = int_to_ptr.vmem [resolvable:$true] %s54_s19 }
  0x27   :  { %s6403_s22 = scalar_lea.hbm %s8650_s2, 16384 }
  0x28   :  { %p6404_p2 = scmp.ne.s32.totalorder %s8650_s2, %s6403_s22  ;;  %p6407_p3 = scmp.lt.u32.totalorder %s6403_s22, %s8650_s2 }
  0x2a   :  { %p6409_p4 = pnand %p6407_p3, %p6404_p2 }
  0x2c   :  { %6412 = shalt.err (!%p6409_p4)
}
  0x2d   :  { %s6413_s0 = scalar_lea.vmem %s43_s17, 16384  ;;  %p6418_p6 = scmp.lt.s32.totalorder %s43_s17, %s43_s17 }
  0x2e   :  { %p6414_p5 = scmp.ne.s32.totalorder %s43_s17, %s6413_s0  ;;  %p6419_p7 = scmp.lt.s32.totalorder %s6413_s0, %s6413_s0 }
  0x30   :  { %p6420_p8 = por %p6419_p7, %p6418_p6 }
  0x32   :  { %p6421_p9 = pnand %p6420_p8, %p6414_p5 }
  0x34   :  { %6424 = shalt.err (!%p6421_p9)
}
  0x35   :  { %48 = dma.hbm_to_vmem [thread:$0]  %s8650_s2, 16384, %s43_s17, [#allocation7], %s6481_s1, %s6481_s1, %s6482_s13  }
  0x36   :  { %s6425_s7 = scalar_lea.hbm %s8651_s3, 16384 }
  0x37   :  { %p6426_p10 = scmp.ne.s32.totalorder %s8651_s3, %s6425_s7  ;;  %p6429_p11 = scmp.lt.u32.totalorder %s6425_s7, %s8651_s3 }
  0x39   :  { %p6431_p12 = pnand %p6429_p11, %p6426_p10 }
  0x3b   :  { %6434 = shalt.err (!%p6431_p12)
}
  0x3c   :  { %s6435_s12 = scalar_lea.vmem %s6540_s19, 16384  ;;  %p6440_p0 = scmp.lt.s32.totalorder %s6540_s19, %s6540_s19 }
  0x3d   :  { %p6436_p13 = scmp.ne.s32.totalorder %s6540_s19, %s6435_s12  ;;  %p6441_p1 = scmp.lt.s32.totalorder %s6435_s12, %s6435_s12 }
  0x3f   :  { %p6442_p2 = por %p6441_p1, %p6440_p0 }
  0x41   :  { %p6443_p3 = pnand %p6442_p2, %p6436_p13 }
  0x43   :  { %6446 = shalt.err (!%p6443_p3)
}
  0x44   :  { %60 = dma.hbm_to_vmem [thread:$0]  %s8651_s3, 16384, %s6540_s19, [#allocation10], %s6478_s25, %s6478_s25, %s6479_s26  }
  0x45   :  { %6469 = dma.done.wait [#allocation4], 8192  }
  0x46   :  { %6470 = vsyncadd [#allocation4], 4294959104 }
  0x47   :  { %6471 = dma.done.wait [#allocation7], 32768  }
  0x48   :  { %6472 = vsyncadd [#allocation7], 4294934528 }
  0x49   :  { %6473 = dma.done.wait [#allocation10], 16384  }
  0x4a   :  { %6474 = vsyncadd [#allocation10], 4294950912  ;;  %v5879_v0 = vld [vmem:[#allocation6 + $0x4] ss:$8 sps:$4 sm:$0xff]   ;;  %v5883_v2 = vld [vmem:[#allocation6] ss:$8 sps:$4 sm:$0xff]  }
  0x4b   :  { %v5881_v1 = vld [vmem:[#allocation6 + $0x204] ss:$8 sps:$4 sm:$0xff]   ;;  %1357 = vmatprep.subr.bf16.mxu1 %v5879_v0  ;;  %v5884_v3 = vld [vmem:[#allocation6 + $0x200] ss:$8 sps:$4 sm:$0xff]   ;;  %v5885_v4 = vld [vmem:[#allocation6 + $0x14] ss:$8 sps:$4 sm:$0xff]  }
  0x4c   :  { %1583 = vmatprep.subr.bf16.mxu0 %v5881_v1  ;;  %1358 = vmatpush1.bf16.msra.mxu1 %v5883_v2  ;;  %v5887_v5 = vld [vmem:[#allocation6 + $0x214] ss:$8 sps:$4 sm:$0xff]   ;;  %v5889_v6 = vld [vmem:[#allocation6 + $0x10] ss:$8 sps:$4 sm:$0xff]   ;;  %v5891_v8 = vld [vmem:[#allocation6 + $0x24] ss:$8 sps:$4 sm:$0xff]  }
  0x4d   :  { %1584 = vmatpush1.bf16.msra.mxu0 %v5884_v3  ;;  %1359 = vmatprep.subr.bf16.mxu1 %v5885_v4  ;;  %v5890_v7 = vld [vmem:[#allocation6 + $0x210] ss:$8 sps:$4 sm:$0xff]   ;;  %v5893_v9 = vld [vmem:[#allocation6 + $0x224] ss:$8 sps:$4 sm:$0xff]   ;;  %v5895_v10 = vld [vmem:[#allocation6 + $0x20] ss:$8 sps:$4 sm:$0xff]  }
  0x4e   :  { %1585 = vmatprep.subr.bf16.mxu0 %v5887_v5  ;;  %v5896_v11 = vld [vmem:[#allocation6 + $0x220] ss:$8 sps:$4 sm:$0xff]   ;;  %v5897_v12 = vld [vmem:[#allocation6 + $0x34] ss:$8 sps:$4 sm:$0xff]   ;;  %v5901_v14 = vld [vmem:[#allocation6 + $0x30] ss:$8 sps:$4 sm:$0xff]  }
  0x4f   :  { %v5899_v13 = vld [vmem:[#allocation6 + $0x234] ss:$8 sps:$4 sm:$0xff]   ;;  %v5902_v15 = vld [vmem:[#allocation6 + $0x230] ss:$8 sps:$4 sm:$0xff]   ;;  %v5903_v16 = vld [vmem:[#allocation6 + $0x44] ss:$8 sps:$4 sm:$0xff]  }
  0x50   :  { %1360 = vmatpush1.bf16.msra.mxu1 %v5889_v6  ;;  %v5905_v17 = vld [vmem:[#allocation6 + $0x244] ss:$8 sps:$4 sm:$0xff]   ;;  %v5907_v18 = vld [vmem:[#allocation6 + $0x40] ss:$8 sps:$4 sm:$0xff]   ;;  %v5909_v20 = vld [vmem:[#allocation6 + $0x54] ss:$8 sps:$4 sm:$0xff]  }
  0x51   :  { %1586 = vmatpush1.bf16.msra.mxu0 %v5890_v7  ;;  %1361 = vmatprep.subr.bf16.mxu1 %v5891_v8  ;;  %v5908_v19 = vld [vmem:[#allocation6 + $0x240] ss:$8 sps:$4 sm:$0xff]   ;;  %v5911_v21 = vld [vmem:[#allocation6 + $0x254] ss:$8 sps:$4 sm:$0xff]   ;;  %v5913_v22 = vld [vmem:[#allocation6 + $0x50] ss:$8 sps:$4 sm:$0xff]  }
  0x52   :  { %1587 = vmatprep.subr.bf16.mxu0 %v5893_v9  ;;  %v5914_v23 = vld [vmem:[#allocation6 + $0x250] ss:$8 sps:$4 sm:$0xff]   ;;  %v5915_v24 = vld [vmem:[#allocation6 + $0x64] ss:$8 sps:$4 sm:$0xff]   ;;  %v5919_v26 = vld [vmem:[#allocation6 + $0x60] ss:$8 sps:$4 sm:$0xff]  }
  0x53   :  { %v5917_v25 = vld [vmem:[#allocation6 + $0x264] ss:$8 sps:$4 sm:$0xff]   ;;  %v5920_v27 = vld [vmem:[#allocation6 + $0x260] ss:$8 sps:$4 sm:$0xff]   ;;  %v5921_v28 = vld [vmem:[#allocation6 + $0x74] ss:$8 sps:$4 sm:$0xff]  }
  0x54   :  { %1362 = vmatpush1.bf16.msra.mxu1 %v5895_v10  ;;  %v5923_v29 = vld [vmem:[#allocation6 + $0x274] ss:$8 sps:$4 sm:$0xff]   ;;  %v5925_v30 = vld [vmem:[#allocation6 + $0x70] ss:$8 sps:$4 sm:$0xff]   ;;  %v5927_v32 = vld [vmem:[#allocation6 + $0x84] ss:$8 sps:$4 sm:$0xff]  }
  0x55   :  { %1588 = vmatpush1.bf16.msra.mxu0 %v5896_v11  ;;  %1363 = vmatprep.subr.bf16.mxu1 %v5897_v12  ;;  %v5926_v31 = vld [vmem:[#allocation6 + $0x270] ss:$8 sps:$4 sm:$0xff]   ;;  %v5929_v33 = vld [vmem:[#allocation6 + $0x284] ss:$8 sps:$4 sm:$0xff]   ;;  %v5931_v34 = vld [vmem:[#allocation6 + $0x80] ss:$8 sps:$4 sm:$0xff]  }
  0x56   :  { %1589 = vmatprep.subr.bf16.mxu0 %v5899_v13  ;;  %v5932_v35 = vld [vmem:[#allocation6 + $0x280] ss:$8 sps:$4 sm:$0xff]   ;;  %v5933_v36 = vld [vmem:[#allocation6 + $0x94] ss:$8 sps:$4 sm:$0xff]   ;;  %v5937_v38 = vld [vmem:[#allocation6 + $0x90] ss:$8 sps:$4 sm:$0xff]  }
  0x57   :  { %v5935_v37 = vld [vmem:[#allocation6 + $0x294] ss:$8 sps:$4 sm:$0xff]   ;;  %v5938_v39 = vld [vmem:[#allocation6 + $0x290] ss:$8 sps:$4 sm:$0xff]   ;;  %v5939_v40 = vld [vmem:[#allocation6 + $0xa4] ss:$8 sps:$4 sm:$0xff]  }
  0x58   :  { %1364 = vmatpush1.bf16.msra.mxu1 %v5901_v14  ;;  %v5941_v41 = vld [vmem:[#allocation6 + $0x2a4] ss:$8 sps:$4 sm:$0xff]   ;;  %v5943_v42 = vld [vmem:[#allocation6 + $0xa0] ss:$8 sps:$4 sm:$0xff]   ;;  %v5945_v44 = vld [vmem:[#allocation6 + $0xb4] ss:$8 sps:$4 sm:$0xff]  }
  0x59   :  { %1590 = vmatpush1.bf16.msra.mxu0 %v5902_v15  ;;  %1365 = vmatprep.subr.bf16.mxu1 %v5903_v16  ;;  %v5944_v43 = vld [vmem:[#allocation6 + $0x2a0] ss:$8 sps:$4 sm:$0xff]   ;;  %v5947_v45 = vld [vmem:[#allocation6 + $0x2b4] ss:$8 sps:$4 sm:$0xff]   ;;  %v5949_v46 = vld [vmem:[#allocation6 + $0xb0] ss:$8 sps:$4 sm:$0xff]  }
  0x5a   :  { %1591 = vmatprep.subr.bf16.mxu0 %v5905_v17  ;;  %v5950_v47 = vld [vmem:[#allocation6 + $0x2b0] ss:$8 sps:$4 sm:$0xff]   ;;  %v77_v48 = vld [vmem:[#allocation3] sm:$0xff]  ;;  %v5957_v58 = vld [vmem:[#allocation6 + $0xd4] ss:$8 sps:$4 sm:$0xff]   ;;  %s6485_s3 = smov [#allocation11]  }
  0x5b   :  { %v81_v49 = vld [vmem:[#allocation3 + $0x20] sm:$0xff]  ;;  %v79_v50 = vld [vmem:[#allocation3 + $0x10] sm:$0xff]  ;;  %s5214_s25 = sshll.u32 %s6485_s3, 4  ;;  %s5215_s25 = int_to_ptr.vmem [resolvable:$true] %s5214_s25 }
  0x5c   :  { %1366 = vmatpush1.bf16.msra.mxu1 %v5907_v18  ;;  %v83_v51 = vld [vmem:[#allocation3 + $0x30] sm:$0xff]  ;;  %v5951_v52 = vld [vmem:[#allocation6 + $0xc4] ss:$8 sps:$4 sm:$0xff]   ;;  %v5229_v53 = vcombine.high %v77_v48, %v81_v49  ;;  %v5955_v56 = vld [vmem:[#allocation6 + $0xc0] ss:$8 sps:$4 sm:$0xff]   ;;  %v5228_v11 = vcombine.low %v77_v48, %v81_v49  ;;  %s6447_s26 = scalar_lea.vmem %s5215_s25, 4096  ;;  %p6452_p5 = scmp.lt.s32.totalorder %s5215_s25, %s5215_s25 }
  0x5d   :  { %1592 = vmatpush1.bf16.msra.mxu0 %v5908_v19  ;;  %1367 = vmatprep.subr.bf16.mxu1 %v5909_v20  ;;  %v5233_v54 = vcombine.high %v79_v50, %v83_v51  ;;  %v5953_v55 = vld [vmem:[#allocation6 + $0x2c4] ss:$8 sps:$4 sm:$0xff]   ;;  %v5956_v57 = vld [vmem:[#allocation6 + $0x2c0] ss:$8 sps:$4 sm:$0xff]   ;;  %v5959_v59 = vld [vmem:[#allocation6 + $0x2d4] ss:$8 sps:$4 sm:$0xff]   ;;  %v5232_v12 = vcombine.low %v79_v50, %v83_v51  ;;  %p6448_p4 = scmp.ne.s32.totalorder %s5215_s25, %s6447_s26  ;;  %p6453_p6 = scmp.lt.s32.totalorder %s6447_s26, %s6447_s26 }
  0x5e   :  { %1593 = vmatprep.subr.bf16.mxu0 %v5911_v21  ;;  %1389 = vmatprep.mubr.bf16.mxu1 %v5229_v53  ;;  %v5961_v60 = vld [vmem:[#allocation6 + $0xd0] ss:$8 sps:$4 sm:$0xff]   ;;  %v5963_v62 = vld [vmem:[#allocation6 + $0xe4] ss:$8 sps:$4 sm:$0xff]   ;;  %v5967_v0 = vld [vmem:[#allocation6 + $0xe0] ss:$8 sps:$4 sm:$0xff]  }
  0x5f   :  { %1615 = vmatprep.mubr.bf16.mxu0 %v5233_v54  ;;  %v5962_v61 = vld [vmem:[#allocation6 + $0x2d0] ss:$8 sps:$4 sm:$0xff]   ;;  %v5965_v63 = vld [vmem:[#allocation6 + $0x2e4] ss:$8 sps:$4 sm:$0xff]   ;;  %v5968_v1 = vld [vmem:[#allocation6 + $0x2e0] ss:$8 sps:$4 sm:$0xff]   ;;  %p6454_p7 = por %p6453_p6, %p6452_p5 }
  0x60   :  { %1368 = vmatpush1.bf16.msra.mxu1 %v5913_v22  ;;  %v5969_v2 = vld [vmem:[#allocation6 + $0xf4] ss:$8 sps:$4 sm:$0xff]   ;;  %v5973_v4 = vld [vmem:[#allocation6 + $0xf0] ss:$8 sps:$4 sm:$0xff]   ;;  %v5977_v6 = vld [vmem:[#allocation6 + $0x104] ss:$8 sps:$4 sm:$0xff]  }
  0x61   :  { %1594 = vmatpush1.bf16.msra.mxu0 %v5914_v23  ;;  %1369 = vmatprep.subr.bf16.mxu1 %v5915_v24  ;;  %v5971_v3 = vld [vmem:[#allocation6 + $0x2f4] ss:$8 sps:$4 sm:$0xff]   ;;  %v5974_v5 = vld [vmem:[#allocation6 + $0x2f0] ss:$8 sps:$4 sm:$0xff]   ;;  %v5980_v7 = vld [vmem:[#allocation6 + $0x304] ss:$8 sps:$4 sm:$0xff]   ;;  %p6455_p8 = pnand %p6454_p7, %p6448_p4 }
  0x62   :  { %1595 = vmatprep.subr.bf16.mxu0 %v5917_v25  ;;  %v5975_v8 = vld [vmem:[#allocation6 + $0x100] ss:$8 sps:$4 sm:$0xff]   ;;  %v87_v14 = vld [vmem:[#allocation3 + $0x50] sm:$0xff]  ;;  %v5989_v22 = vld [vmem:[#allocation6 + $0x124] ss:$8 sps:$4 sm:$0xff]  }
  0x63   :  { %v5978_v9 = vld [vmem:[#allocation6 + $0x300] ss:$8 sps:$4 sm:$0xff]   ;;  %v91_v15 = vld [vmem:[#allocation3 + $0x70] sm:$0xff]  ;;  %v5992_v23 = vld [vmem:[#allocation6 + $0x324] ss:$8 sps:$4 sm:$0xff]  }
  0x64   :  { %1370 = vmatpush1.bf16.msra.mxu1 %v5919_v26  ;;  %v85_v10 = vld [vmem:[#allocation3 + $0x40] sm:$0xff]  ;;  %v5983_v16 = vld [vmem:[#allocation6 + $0x114] ss:$8 sps:$4 sm:$0xff]   ;;  %v5241_v19 = vcombine.high %v87_v14, %v91_v15  ;;  %v5981_v20 = vld [vmem:[#allocation6 + $0x110] ss:$8 sps:$4 sm:$0xff]  }
  0x65   :  { %1596 = vmatpush1.bf16.msra.mxu0 %v5920_v27  ;;  %1371 = vmatprep.subr.bf16.mxu1 %v5921_v28  ;;  %v89_v13 = vld [vmem:[#allocation3 + $0x60] sm:$0xff]  ;;  %v5986_v17 = vld [vmem:[#allocation6 + $0x314] ss:$8 sps:$4 sm:$0xff]   ;;  %v5984_v21 = vld [vmem:[#allocation6 + $0x310] ss:$8 sps:$4 sm:$0xff]  }
  0x66   :  { %1597 = vmatprep.subr.bf16.mxu0 %v5923_v29  ;;  %v5237_v18 = vcombine.high %v85_v10, %v89_v13  ;;  %v5987_v24 = vld [vmem:[#allocation6 + $0x120] ss:$8 sps:$4 sm:$0xff]   ;;  %v5236_v28 = vcombine.low %v85_v10, %v89_v13  ;;  %v5240_v29 = vcombine.low %v87_v14, %v91_v15  ;;  %v6007_v48 = vld [vmem:[#allocation6 + $0x154] ss:$8 sps:$4 sm:$0xff]   ;;  %v6008_v53 = vld [vmem:[#allocation6 + $0x350] ss:$8 sps:$4 sm:$0xff]  }
  0x67   :  { %v5990_v25 = vld [vmem:[#allocation6 + $0x320] ss:$8 sps:$4 sm:$0xff]   ;;  %v6010_v49 = vld [vmem:[#allocation6 + $0x354] ss:$8 sps:$4 sm:$0xff]   ;;  %v6013_v54 = vld [vmem:[#allocation6 + $0x164] ss:$8 sps:$4 sm:$0xff]  }
  0x68   :  { %1372 = vmatpush1.bf16.msra.mxu1 %v5925_v30  ;;  %v93_v26 = vld [vmem:[#allocation3 + $0x80] sm:$0xff]  ;;  %v95_v30 = vld [vmem:[#allocation3 + $0x90] sm:$0xff] }
  0x69   :  { %1598 = vmatpush1.bf16.msra.mxu0 %v5926_v31  ;;  %1373 = vmatprep.subr.bf16.mxu1 %v5927_v32  ;;  %v97_v27 = vld [vmem:[#allocation3 + $0xa0] sm:$0xff]  ;;  %v99_v31 = vld [vmem:[#allocation3 + $0xb0] sm:$0xff] }
  0x6a   :  { %1599 = vmatprep.subr.bf16.mxu0 %v5929_v33  ;;  %v5995_v32 = vld [vmem:[#allocation6 + $0x134] ss:$8 sps:$4 sm:$0xff]   ;;  %v6023_v14 = vld [vmem:[#allocation6 + $0x180] ss:$8 sps:$4 sm:$0xff]  }
  0x6b   :  { %v5998_v33 = vld [vmem:[#allocation6 + $0x334] ss:$8 sps:$4 sm:$0xff]   ;;  %v6026_v15 = vld [vmem:[#allocation6 + $0x380] ss:$8 sps:$4 sm:$0xff]  }
  0x6c   :  { %1374 = vmatpush1.bf16.msra.mxu1 %v5931_v34  ;;  %v5245_v34 = vcombine.high %v93_v26, %v97_v27  ;;  %v123_v13 = vld [vmem:[#allocation3 + $0x170] sm:$0xff] }
  0x6d   :  { %1600 = vmatpush1.bf16.msra.mxu0 %v5932_v35  ;;  %1375 = vmatprep.subr.bf16.mxu1 %v5933_v36  ;;  %v5249_v35 = vcombine.high %v95_v30, %v99_v31  ;;  %v5993_v36 = vld [vmem:[#allocation6 + $0x130] ss:$8 sps:$4 sm:$0xff]  }
  0x6e   :  { %1601 = vmatprep.subr.bf16.mxu0 %v5935_v37  ;;  %v5996_v37 = vld [vmem:[#allocation6 + $0x330] ss:$8 sps:$4 sm:$0xff]  }
  0x70   :  { %1376 = vmatpush1.bf16.msra.mxu1 %v5937_v38  ;;  %v6001_v38 = vld [vmem:[#allocation6 + $0x144] ss:$8 sps:$4 sm:$0xff]  }
  0x71   :  { %1602 = vmatpush1.bf16.msra.mxu0 %v5938_v39  ;;  %1377 = vmatprep.subr.bf16.mxu1 %v5939_v40  ;;  %v6004_v39 = vld [vmem:[#allocation6 + $0x344] ss:$8 sps:$4 sm:$0xff]   ;;  %v5999_v40 = vld [vmem:[#allocation6 + $0x140] ss:$8 sps:$4 sm:$0xff]  }
  0x72   :  { %1603 = vmatprep.subr.bf16.mxu0 %v5941_v41  ;;  %v6002_v41 = vld [vmem:[#allocation6 + $0x340] ss:$8 sps:$4 sm:$0xff]  }
  0x74   :  { %1378 = vmatpush1.bf16.msra.mxu1 %v5943_v42  ;;  %v101_v42 = vld [vmem:[#allocation3 + $0xc0] sm:$0xff] }
  0x75   :  { %1604 = vmatpush1.bf16.msra.mxu0 %v5944_v43  ;;  %1379 = vmatprep.subr.bf16.mxu1 %v5945_v44  ;;  %v105_v43 = vld [vmem:[#allocation3 + $0xe0] sm:$0xff]  ;;  %v5244_v44 = vcombine.low %v93_v26, %v97_v27 }
  0x76   :  { %1605 = vmatprep.subr.bf16.mxu0 %v5947_v45  ;;  %v5248_v45 = vcombine.low %v95_v30, %v99_v31  ;;  %v5253_v50 = vcombine.high %v101_v42, %v105_v43  ;;  %v129_v27 = vld [vmem:[#allocation3 + $0x1a0] sm:$0xff] }
  0x77   :  { %v6035_v30 = vld [vmem:[#allocation6 + $0x1a0] ss:$8 sps:$4 sm:$0xff]  }
  0x78   :  { %1380 = vmatpush1.bf16.msra.mxu1 %v5949_v46  ;;  %v103_v46 = vld [vmem:[#allocation3 + $0xd0] sm:$0xff]  ;;  %v6038_v31 = vld [vmem:[#allocation6 + $0x3a0] ss:$8 sps:$4 sm:$0xff]  }
  0x79   :  { %1606 = vmatpush1.bf16.msra.mxu0 %v5950_v47  ;;  %1381 = vmatprep.subr.bf16.mxu1 %v5951_v52  ;;  %v107_v47 = vld [vmem:[#allocation3 + $0xf0] sm:$0xff] }
  0x7a   :  { %1607 = vmatprep.subr.bf16.mxu0 %v5953_v55  ;;  %v5257_v51 = vcombine.high %v103_v46, %v107_v47  ;;  %v6005_v52 = vld [vmem:[#allocation6 + $0x150] ss:$8 sps:$4 sm:$0xff]   ;;  %v6016_v55 = vld [vmem:[#allocation6 + $0x364] ss:$8 sps:$4 sm:$0xff]  }
  0x7c   :  { %1382 = vmatpush1.bf16.msra.mxu1 %v5955_v56  ;;  %v6011_v56 = vld [vmem:[#allocation6 + $0x160] ss:$8 sps:$4 sm:$0xff]  }
  0x7d   :  { %1608 = vmatpush1.bf16.msra.mxu0 %v5956_v57  ;;  %1383 = vmatprep.subr.bf16.mxu1 %v5957_v58  ;;  %v109_v57 = vld [vmem:[#allocation3 + $0x100] sm:$0xff] }
  0x7e   :  { %1609 = vmatprep.subr.bf16.mxu0 %v5959_v59  ;;  %v113_v58 = vld [vmem:[#allocation3 + $0x120] sm:$0xff]  ;;  %v5252_v59 = vcombine.low %v101_v42, %v105_v43 }
  0x7f   :  { %v5260_v10 = vcombine.low %v109_v57, %v113_v58  ;;  %v137_v43 = vld [vmem:[#allocation3 + $0x1e0] sm:$0xff] }
  0x80   :  { %1384 = vmatpush1.bf16.msra.mxu1 %v5961_v60  ;;  %v5256_v60 = vcombine.low %v103_v46, %v107_v47  ;;  %v6047_v46 = vld [vmem:[#allocation6 + $0x1c0] ss:$8 sps:$4 sm:$0xff]  }
  0x81   :  { %1610 = vmatpush1.bf16.msra.mxu0 %v5962_v61  ;;  %1385 = vmatprep.subr.bf16.mxu1 %v5963_v62  ;;  %v111_v61 = vld [vmem:[#allocation3 + $0x110] sm:$0xff]  ;;  %v6050_v47 = vld [vmem:[#allocation6 + $0x3c0] ss:$8 sps:$4 sm:$0xff]  }
  0x82   :  { %1611 = vmatprep.subr.bf16.mxu0 %v5965_v63  ;;  %v115_v62 = vld [vmem:[#allocation3 + $0x130] sm:$0xff]  ;;  %v6014_v63 = vld [vmem:[#allocation6 + $0x360] ss:$8 sps:$4 sm:$0xff]  }
  0x84   :  { %1386 = vmatpush1.bf16.msra.mxu1 %v5967_v0  ;;  %v6019_v0 = vld [vmem:[#allocation6 + $0x174] ss:$8 sps:$4 sm:$0xff]  }
  0x85   :  { %1612 = vmatpush1.bf16.msra.mxu0 %v5968_v1  ;;  %1387 = vmatprep.subr.bf16.mxu1 %v5969_v2  ;;  %v6022_v1 = vld [vmem:[#allocation6 + $0x374] ss:$8 sps:$4 sm:$0xff]   ;;  %v5261_v2 = vcombine.high %v109_v57, %v113_v58  ;;  %v82_v57 = vld [vmem:[#allocation3 + $0x28] sm:$0xff] }
  0x86   :  { %1613 = vmatprep.subr.bf16.mxu0 %v5971_v3  ;;  %v5265_v3 = vcombine.high %v111_v61, %v115_v62  ;;  %v80_v58 = vld [vmem:[#allocation3 + $0x18] sm:$0xff] }
  0x88   :  { %1388 = vmatpush1.bf16.msra.mxu1 %v5973_v4  ;;  %v6017_v4 = vld [vmem:[#allocation6 + $0x170] ss:$8 sps:$4 sm:$0xff]  }
  0x89   :  { %1614 = vmatpush1.bf16.msra.mxu0 %v5974_v5  ;;  %1470 = vmatprep.subr.bf16.mxu1 %v5977_v6  ;;  %v6020_v5 = vld [vmem:[#allocation6 + $0x370] ss:$8 sps:$4 sm:$0xff]   ;;  %v6025_v6 = vld [vmem:[#allocation6 + $0x184] ss:$8 sps:$4 sm:$0xff]  }
  0x8a   :  { %1696 = vmatprep.subr.bf16.mxu0 %v5980_v7  ;;  %v6028_v7 = vld [vmem:[#allocation6 + $0x384] ss:$8 sps:$4 sm:$0xff]  }
  0x8b   :  { %1390 = vmatmul.mubr.bf16.vlgmr.msra.gmra.mrb[0].mxu1 %v5228_v11  ;;  %v5264_v11 = vcombine.low %v111_v61, %v115_v62  ;;  %v6062_v61 = vld [vmem:[#allocation6 + $0x3e0] ss:$8 sps:$4 sm:$0xff]  }
  0x8c   :  { %1616 = vmatmul.mubr.bf16.vlgmr.msra.gmra.mrb[0].mxu0 %v5232_v12  ;;  %1471 = vmatpush1.bf16.msra.mxu1 %v5975_v8  ;;  %v117_v8 = vld [vmem:[#allocation3 + $0x140] sm:$0xff]  ;;  %v119_v12 = vld [vmem:[#allocation3 + $0x150] sm:$0xff] }
  0x8d   :  { %1697 = vmatpush1.bf16.msra.mxu0 %v5978_v9  ;;  %1472 = vmatprep.subr.bf16.mxu1 %v5983_v16  ;;  %v121_v9 = vld [vmem:[#allocation3 + $0x160] sm:$0xff]  ;;  %v6031_v16 = vld [vmem:[#allocation6 + $0x194] ss:$8 sps:$4 sm:$0xff]   ;;  %v5272_v26 = vcombine.low %v119_v12, %v123_v13 }
  0x8e   :  { %1698 = vmatprep.subr.bf16.mxu0 %v5986_v17  ;;  %1399 = vmatprep.mubr.bf16.mxu1 %v5237_v18  ;;  %v6034_v17 = vld [vmem:[#allocation6 + $0x394] ss:$8 sps:$4 sm:$0xff]   ;;  %v5269_v18 = vcombine.high %v117_v8, %v121_v9 }
  0x8f   :  { %1625 = vmatprep.mubr.bf16.mxu0 %v5241_v19  ;;  %v5273_v19 = vcombine.high %v119_v12, %v123_v13  ;;  %v1865_v13 = vld [vmem:[#allocation8 + $0x40] sm:$0xff] }
  0x90   :  { %1473 = vmatpush1.bf16.msra.mxu1 %v5981_v20  ;;  %v6029_v20 = vld [vmem:[#allocation6 + $0x190] ss:$8 sps:$4 sm:$0xff]  }
  0x91   :  { %1699 = vmatpush1.bf16.msra.mxu0 %v5984_v21  ;;  %1474 = vmatprep.subr.bf16.mxu1 %v5989_v22  ;;  %v6032_v21 = vld [vmem:[#allocation6 + $0x390] ss:$8 sps:$4 sm:$0xff]   ;;  %v6037_v22 = vld [vmem:[#allocation6 + $0x1a4] ss:$8 sps:$4 sm:$0xff]  }
  0x92   :  { %1700 = vmatprep.subr.bf16.mxu0 %v5992_v23  ;;  %v6040_v23 = vld [vmem:[#allocation6 + $0x3a4] ss:$8 sps:$4 sm:$0xff]  }
  0x93   :  { %1400 = vmatmul.mubr.bf16.gmra.mrb[4].mxu1 %v5236_v28  ;;  %v127_v28 = vld [vmem:[#allocation3 + $0x190] sm:$0xff] }
  0x94   :  { %1626 = vmatmul.mubr.bf16.gmra.mrb[4].mxu0 %v5240_v29  ;;  %1475 = vmatpush1.bf16.msra.mxu1 %v5987_v24  ;;  %v125_v24 = vld [vmem:[#allocation3 + $0x180] sm:$0xff]  ;;  %v131_v29 = vld [vmem:[#allocation3 + $0x1b0] sm:$0xff] }
  0x95   :  { %1701 = vmatpush1.bf16.msra.mxu0 %v5990_v25  ;;  %1476 = vmatprep.subr.bf16.mxu1 %v5995_v32  ;;  %v5268_v25 = vcombine.low %v117_v8, %v121_v9  ;;  %v6043_v32 = vld [vmem:[#allocation6 + $0x1b4] ss:$8 sps:$4 sm:$0xff]   ;;  %v5280_v42 = vcombine.low %v127_v28, %v131_v29  ;;  %v86_v8 = vld [vmem:[#allocation3 + $0x48] sm:$0xff] }
  0x96   :  { %1702 = vmatprep.subr.bf16.mxu0 %v5998_v33  ;;  %1409 = vmatprep.mubr.bf16.mxu1 %v5245_v34  ;;  %v6046_v33 = vld [vmem:[#allocation6 + $0x3b4] ss:$8 sps:$4 sm:$0xff]   ;;  %v5277_v34 = vcombine.high %v125_v24, %v129_v27  ;;  %v90_v9 = vld [vmem:[#allocation3 + $0x68] sm:$0xff] }
  0x97   :  { %1635 = vmatprep.mubr.bf16.mxu0 %v5249_v35  ;;  %v5281_v35 = vcombine.high %v127_v28, %v131_v29  ;;  %v1881_v28 = vld [vmem:[#allocation8 + $0xc0] sm:$0xff] }
  0x98   :  { %1477 = vmatpush1.bf16.msra.mxu1 %v5993_v36  ;;  %v6041_v36 = vld [vmem:[#allocation6 + $0x1b0] ss:$8 sps:$4 sm:$0xff]   ;;  %v1885_v29 = vld [vmem:[#allocation8 + $0xe0] sm:$0xff] }
  0x99   :  { %1703 = vmatpush1.bf16.msra.mxu0 %v5996_v37  ;;  %1478 = vmatprep.subr.bf16.mxu1 %v6001_v38  ;;  %v6044_v37 = vld [vmem:[#allocation6 + $0x3b0] ss:$8 sps:$4 sm:$0xff]   ;;  %v6049_v38 = vld [vmem:[#allocation6 + $0x1c4] ss:$8 sps:$4 sm:$0xff]  }
  0x9a   :  { %1704 = vmatprep.subr.bf16.mxu0 %v6004_v39  ;;  %v6052_v39 = vld [vmem:[#allocation6 + $0x3c4] ss:$8 sps:$4 sm:$0xff]  }
  0x9b   :  { %1410 = vmatmul.mubr.bf16.gmra.mrb[8].mxu1 %v5244_v44  ;;  %v135_v44 = vld [vmem:[#allocation3 + $0x1d0] sm:$0xff] }
  0x9c   :  { %1636 = vmatmul.mubr.bf16.gmra.mrb[8].mxu0 %v5248_v45  ;;  %1479 = vmatpush1.bf16.msra.mxu1 %v5999_v40  ;;  %v133_v40 = vld [vmem:[#allocation3 + $0x1c0] sm:$0xff]  ;;  %v139_v45 = vld [vmem:[#allocation3 + $0x1f0] sm:$0xff] }
  0x9d   :  { %1705 = vmatpush1.bf16.msra.mxu0 %v6002_v41  ;;  %1480 = vmatprep.subr.bf16.mxu1 %v6007_v48  ;;  %v5276_v41 = vcombine.low %v125_v24, %v129_v27  ;;  %v6055_v48 = vld [vmem:[#allocation6 + $0x1d4] ss:$8 sps:$4 sm:$0xff]   ;;  %v5284_v62 = vcombine.low %v133_v40, %v137_v43  ;;  %v98_v24 = vld [vmem:[#allocation3 + $0xa8] sm:$0xff] }
  0x9e   :  { %1706 = vmatprep.subr.bf16.mxu0 %v6010_v49  ;;  %1419 = vmatprep.mubr.bf16.mxu1 %v5253_v50  ;;  %v6058_v49 = vld [vmem:[#allocation6 + $0x3d4] ss:$8 sps:$4 sm:$0xff]   ;;  %v6053_v50 = vld [vmem:[#allocation6 + $0x1d0] ss:$8 sps:$4 sm:$0xff]  }
  0x9f   :  { %1645 = vmatprep.mubr.bf16.mxu0 %v5257_v51  ;;  %v5285_v51 = vcombine.high %v133_v40, %v137_v43  ;;  %v106_v40 = vld [vmem:[#allocation3 + $0xe8] sm:$0xff]  ;;  %v5444_v43 = vcombine.low %v1881_v28, %v1885_v29 }
  0xa0   :  { %1481 = vmatpush1.bf16.msra.mxu1 %v6005_v52  ;;  %v5289_v52 = vcombine.high %v135_v44, %v139_v45 }
  0xa1   :  { %1707 = vmatpush1.bf16.msra.mxu0 %v6008_v53  ;;  %1482 = vmatprep.subr.bf16.mxu1 %v6013_v54  ;;  %v6056_v53 = vld [vmem:[#allocation6 + $0x3d0] ss:$8 sps:$4 sm:$0xff]   ;;  %v6061_v54 = vld [vmem:[#allocation6 + $0x1e4] ss:$8 sps:$4 sm:$0xff]  }
  0xa2   :  { %1708 = vmatprep.subr.bf16.mxu0 %v6016_v55  ;;  %v6064_v55 = vld [vmem:[#allocation6 + $0x3e4] ss:$8 sps:$4 sm:$0xff]  }
  0xa3   :  { %1420 = vmatmul.mubr.bf16.gmra.mrb[12].mxu1 %v5252_v59  ;;  %v84_v59 = vld [vmem:[#allocation3 + $0x38] sm:$0xff] }
  0xa4   :  { %1646 = vmatmul.mubr.bf16.gmra.mrb[12].mxu0 %v5256_v60  ;;  %1483 = vmatpush1.bf16.msra.mxu1 %v6011_v56  ;;  %v78_v56 = vld [vmem:[#allocation3 + $0x8] sm:$0xff] }
  0xa5   :  { %1709 = vmatpush1.bf16.msra.mxu0 %v6014_v63  ;;  %1484 = vmatprep.subr.bf16.mxu1 %v6019_v0  ;;  %v6059_v60 = vld [vmem:[#allocation6 + $0x1e0] ss:$8 sps:$4 sm:$0xff]   ;;  %v5288_v63 = vcombine.low %v135_v44, %v139_v45  ;;  %v6067_v0 = vld [vmem:[#allocation6 + $0x1f4] ss:$8 sps:$4 sm:$0xff]  }
  0xa6   :  { %1710 = vmatprep.subr.bf16.mxu0 %v6022_v1  ;;  %1429 = vmatprep.mubr.bf16.mxu1 %v5261_v2  ;;  %v6070_v1 = vld [vmem:[#allocation6 + $0x3f4] ss:$8 sps:$4 sm:$0xff]   ;;  %v1857_v2 = vld [vmem:[#allocation8] sm:$0xff] }
  0xa7   :  { %1655 = vmatprep.mubr.bf16.mxu0 %v5265_v3  ;;  %v1861_v3 = vld [vmem:[#allocation8 + $0x20] sm:$0xff] }
  0xa8   :  { %1485 = vmatpush1.bf16.msra.mxu1 %v6017_v4  ;;  %v6065_v4 = vld [vmem:[#allocation6 + $0x1f0] ss:$8 sps:$4 sm:$0xff]   ;;  %v5421_v12 = vcombine.high %v1857_v2, %v1861_v3  ;;  %v1897_v44 = vld [vmem:[#allocation8 + $0x140] sm:$0xff] }
  0xa9   :  { %1711 = vmatpush1.bf16.msra.mxu0 %v6020_v5  ;;  %1486 = vmatprep.subr.bf16.mxu1 %v6025_v6  ;;  %v6068_v5 = vld [vmem:[#allocation6 + $0x3f0] ss:$8 sps:$4 sm:$0xff]   ;;  %v5231_v6 = vcombine.high %v78_v56, %v82_v57  ;;  %v1901_v45 = vld [vmem:[#allocation8 + $0x160] sm:$0xff] }
  0xaa   :  { %1712 = vmatprep.subr.bf16.mxu0 %v6028_v7  ;;  %v5235_v7 = vcombine.high %v80_v58, %v84_v59 }
  0xab   :  { %1430 = vmatmul.mubr.bf16.gmra.mrb[16].mxu1 %v5260_v10  ;;  %v88_v10 = vld [vmem:[#allocation3 + $0x58] sm:$0xff] }
  0xac   :  { %1656 = vmatmul.mubr.bf16.gmra.mrb[16].mxu0 %v5264_v11  ;;  %1487 = vmatpush1.bf16.msra.mxu1 %v6023_v14  ;;  %v92_v11 = vld [vmem:[#allocation3 + $0x78] sm:$0xff]  ;;  %v1869_v14 = vld [vmem:[#allocation8 + $0x60] sm:$0xff] }
  0xad   :  { %1713 = vmatpush1.bf16.msra.mxu0 %v6026_v15  ;;  %1488 = vmatprep.subr.bf16.mxu1 %v6031_v16  ;;  %v5230_v15 = vcombine.low %v78_v56, %v82_v57  ;;  %v5234_v16 = vcombine.low %v80_v58, %v84_v59  ;;  %v5428_v27 = vcombine.low %v1865_v13, %v1869_v14  ;;  %v114_v56 = vld [vmem:[#allocation3 + $0x128] sm:$0xff]  ;;  %v112_v57 = vld [vmem:[#allocation3 + $0x118] sm:$0xff] }
  0xae   :  { %1714 = vmatprep.subr.bf16.mxu0 %v6034_v17  ;;  %1439 = vmatprep.mubr.bf16.mxu1 %v5269_v18  ;;  %v5239_v17 = vcombine.high %v86_v8, %v90_v9  ;;  %v5243_v18 = vcombine.high %v88_v10, %v92_v11  ;;  %v116_v58 = vld [vmem:[#allocation3 + $0x138] sm:$0xff]  ;;  %v5460_v59 = vcombine.low %v1897_v44, %v1901_v45 }
  0xaf   :  { %1665 = vmatprep.mubr.bf16.mxu0 %v5273_v19  ;;  %v5420_v19 = vcombine.low %v1857_v2, %v1861_v3  ;;  %v5267_v2 = vcombine.high %v112_v57, %v116_v58 }
  0xb0   :  { %1489 = vmatpush1.bf16.msra.mxu1 %v6029_v20  ;;  %v1873_v20 = vld [vmem:[#allocation8 + $0x80] sm:$0xff] }
  0xb1   :  { %1715 = vmatpush1.bf16.msra.mxu0 %v6032_v21  ;;  %1490 = vmatprep.subr.bf16.mxu1 %v6037_v22  ;;  %v1877_v21 = vld [vmem:[#allocation8 + $0xa0] sm:$0xff]  ;;  %v5429_v22 = vcombine.high %v1865_v13, %v1869_v14  ;;  %v5266_v14 = vcombine.low %v112_v57, %v116_v58 }
  0xb2   :  { %1716 = vmatprep.subr.bf16.mxu0 %v6040_v23  ;;  %v94_v23 = vld [vmem:[#allocation3 + $0x88] sm:$0xff]  ;;  %v1973_v57 = vld [vmem:[#allocation8 + $0x3a0] sm:$0xff] }
  0xb3   :  { %1440 = vmatmul.mubr.bf16.gmra.mrb[20].mxu1 %v5268_v25  ;;  %v96_v25 = vld [vmem:[#allocation3 + $0x98] sm:$0xff] }
  0xb4   :  { %1666 = vmatmul.mubr.bf16.gmra.mrb[20].mxu0 %v5272_v26  ;;  %1491 = vmatpush1.bf16.msra.mxu1 %v6035_v30  ;;  %v100_v26 = vld [vmem:[#allocation3 + $0xb8] sm:$0xff]  ;;  %v5437_v30 = vcombine.high %v1873_v20, %v1877_v21 }
  0xb5   :  { %1717 = vmatpush1.bf16.msra.mxu0 %v6038_v31  ;;  %1492 = vmatprep.subr.bf16.mxu1 %v6043_v32  ;;  %v5238_v31 = vcombine.low %v86_v8, %v90_v9  ;;  %v5242_v32 = vcombine.low %v88_v10, %v92_v11  ;;  %v122_v8 = vld [vmem:[#allocation3 + $0x168] sm:$0xff]  ;;  %v120_v9 = vld [vmem:[#allocation3 + $0x158] sm:$0xff] }
  0xb6   :  { %1718 = vmatprep.subr.bf16.mxu0 %v6046_v33  ;;  %1449 = vmatprep.mubr.bf16.mxu1 %v5277_v34  ;;  %v5247_v33 = vcombine.high %v94_v23, %v98_v24  ;;  %v5251_v34 = vcombine.high %v96_v25, %v100_v26  ;;  %v124_v10 = vld [vmem:[#allocation3 + $0x178] sm:$0xff] }
  0xb7   :  { %1675 = vmatprep.mubr.bf16.mxu0 %v5281_v35  ;;  %v5436_v35 = vcombine.low %v1873_v20, %v1877_v21  ;;  %v1937_v21 = vld [vmem:[#allocation8 + $0x280] sm:$0xff] }
  0xb8   :  { %1493 = vmatpush1.bf16.msra.mxu1 %v6041_v36  ;;  %v1889_v36 = vld [vmem:[#allocation8 + $0x100] sm:$0xff] }
  0xb9   :  { %1719 = vmatpush1.bf16.msra.mxu0 %v6044_v37  ;;  %1494 = vmatprep.subr.bf16.mxu1 %v6049_v38  ;;  %v1893_v37 = vld [vmem:[#allocation8 + $0x120] sm:$0xff]  ;;  %v5445_v38 = vcombine.high %v1881_v28, %v1885_v29 }
  0xba   :  { %1720 = vmatprep.subr.bf16.mxu0 %v6052_v39  ;;  %v102_v39 = vld [vmem:[#allocation3 + $0xc8] sm:$0xff] }
  0xbb   :  { %1450 = vmatmul.mubr.bf16.gmra.mrb[24].mxu1 %v5276_v41  ;;  %v104_v41 = vld [vmem:[#allocation3 + $0xd8] sm:$0xff] }
  0xbc   :  { %1676 = vmatmul.mubr.bf16.gmra.mrb[24].mxu0 %v5280_v42  ;;  %1495 = vmatpush1.bf16.msra.mxu1 %v6047_v46  ;;  %v108_v42 = vld [vmem:[#allocation3 + $0xf8] sm:$0xff]  ;;  %v5453_v46 = vcombine.high %v1889_v36, %v1893_v37 }
  0xbd   :  { %1721 = vmatpush1.bf16.msra.mxu0 %v6050_v47  ;;  %1496 = vmatprep.subr.bf16.mxu1 %v6055_v48  ;;  %v5246_v47 = vcombine.low %v94_v23, %v98_v24  ;;  %v5250_v48 = vcombine.low %v96_v25, %v100_v26  ;;  %v126_v23 = vld [vmem:[#allocation3 + $0x188] sm:$0xff]  ;;  %v128_v25 = vld [vmem:[#allocation3 + $0x198] sm:$0xff] }
  0xbe   :  { %1722 = vmatprep.subr.bf16.mxu0 %v6058_v49  ;;  %1459 = vmatprep.mubr.bf16.mxu1 %v5285_v51  ;;  %v5255_v49 = vcombine.high %v102_v39, %v106_v40  ;;  %v5452_v51 = vcombine.low %v1889_v36, %v1893_v37  ;;  %v130_v24 = vld [vmem:[#allocation3 + $0x1a8] sm:$0xff]  ;;  %v132_v26 = vld [vmem:[#allocation3 + $0x1b8] sm:$0xff]  ;;  %v1953_v37 = vld [vmem:[#allocation8 + $0x300] sm:$0xff] }
  0xbf   :  { %1685 = vmatprep.mubr.bf16.mxu0 %v5289_v52  ;;  %v1905_v52 = vld [vmem:[#allocation8 + $0x180] sm:$0xff] }
  0xc0   :  { %1497 = vmatpush1.bf16.msra.mxu1 %v6053_v50  ;;  %v5259_v50 = vcombine.high %v104_v41, %v108_v42 }
  0xc1   :  { %1723 = vmatpush1.bf16.msra.mxu0 %v6056_v53  ;;  %1498 = vmatprep.subr.bf16.mxu1 %v6061_v54  ;;  %v1909_v53 = vld [vmem:[#allocation8 + $0x1a0] sm:$0xff]  ;;  %v5461_v54 = vcombine.high %v1897_v44, %v1901_v45  ;;  %v5278_v45 = vcombine.low %v126_v23, %v130_v24 }
  0xc2   :  { %1724 = vmatprep.subr.bf16.mxu0 %v6064_v55  ;;  %v110_v55 = vld [vmem:[#allocation3 + $0x108] sm:$0xff]  ;;  %v5468_v3 = vcombine.low %v1905_v52, %v1909_v53 }
  0xc3   :  { %1460 = vmatmul.mubr.bf16.gmra.mrb[28].mxu1 %v5284_v62  ;;  %v5469_v62 = vcombine.high %v1905_v52, %v1909_v53  ;;  %v5262_v13 = vcombine.low %v110_v55, %v114_v56 }
  0xc4   :  { %1686 = vmatmul.mubr.bf16.gmra.mrb[28].mxu0 %v5288_v63  ;;  %1499 = vmatpush1.bf16.msra.mxu1 %v6059_v60  ;;  %v1913_v60 = vld [vmem:[#allocation8 + $0x1c0] sm:$0xff]  ;;  %v5254_v63 = vcombine.low %v102_v39, %v106_v40  ;;  %v134_v39 = vld [vmem:[#allocation3 + $0x1c8] sm:$0xff] }
  0xc5   :  { %1725 = vmatpush1.bf16.msra.mxu0 %v6062_v61  ;;  %1500 = vmatprep.subr.bf16.mxu1 %v6067_v0  ;;  %v1917_v61 = vld [vmem:[#allocation8 + $0x1e0] sm:$0xff]  ;;  %v5258_v0 = vcombine.low %v104_v41, %v108_v42  ;;  %v138_v40 = vld [vmem:[#allocation3 + $0x1e8] sm:$0xff]  ;;  %v136_v41 = vld [vmem:[#allocation3 + $0x1d8] sm:$0xff] }
  0xc6   :  { %1726 = vmatprep.subr.bf16.mxu0 %v6070_v1  ;;  %1502 = vmatprep.mubr.bf16.mxu1 %v5231_v6  ;;  %v5263_v1 = vcombine.high %v110_v55, %v114_v56  ;;  %v5477_v6 = vcombine.high %v1913_v60, %v1917_v61  ;;  %v5476_v11 = vcombine.low %v1913_v60, %v1917_v61  ;;  %v140_v42 = vld [vmem:[#allocation3 + $0x1f8] sm:$0xff]  ;;  %v1969_v56 = vld [vmem:[#allocation8 + $0x380] sm:$0xff] }
  0xc7   :  { %1728 = vmatprep.mubr.bf16.mxu0 %v5235_v7  ;;  %v118_v7 = vld [vmem:[#allocation3 + $0x148] sm:$0xff]  ;;  %v5290_v55 = vcombine.low %v136_v41, %v140_v42  ;;  %v5533_v58 = vcombine.high %v1969_v56, %v1973_v57  ;;  %v1977_v60 = vld [vmem:[#allocation8 + $0x3c0] sm:$0xff] }
  0xc8   :  { %1501 = vmatpush1.bf16.msra.mxu1 %v6065_v4  ;;  %v1921_v4 = vld [vmem:[#allocation8 + $0x200] sm:$0xff]  ;;  %v5270_v29 = vcombine.low %v118_v7, %v122_v8 }
  0xc9   :  { %1727 = vmatpush1.bf16.msra.mxu0 %v6068_v5  ;;  %2625 = vmatprep.subr.bf16.mxu1 %v5421_v12  ;;  %v1925_v5 = vld [vmem:[#allocation8 + $0x220] sm:$0xff] }
  0xca   :  { %v5485_v12 = vcombine.high %v1921_v4, %v1925_v5  ;;  %v1981_v61 = vld [vmem:[#allocation8 + $0x3e0] sm:$0xff] }
  0xcb   :  { %1503 = vmatmul.mubr.bf16.vlgmr.msra.gmra.mrb[0].mxu1 %v5230_v15  ;;  %v1929_v15 = vld [vmem:[#allocation8 + $0x240] sm:$0xff] }
  0xcc   :  { %1729 = vmatmul.mubr.bf16.vlgmr.msra.gmra.mrb[0].mxu0 %v5234_v16  ;;  %1512 = vmatprep.mubr.bf16.mxu1 %v5239_v17  ;;  %v1933_v16 = vld [vmem:[#allocation8 + $0x260] sm:$0xff]  ;;  %v5271_v17 = vcombine.high %v118_v7, %v122_v8 }
  0xcd   :  { %1738 = vmatprep.mubr.bf16.mxu0 %v5243_v18  ;;  %2626 = vmatpush1.bf16.msra.mxu1 %v5420_v19  ;;  %v5275_v18 = vcombine.high %v120_v9, %v124_v10  ;;  %v5484_v19 = vcombine.low %v1921_v4, %v1925_v5  ;;  %v5493_v20 = vcombine.high %v1929_v15, %v1933_v16 }
  0xce   :  { %2627 = vmatprep.subr.bf16.mxu1 %v5429_v22  ;;  %v1941_v22 = vld [vmem:[#allocation8 + $0x2a0] sm:$0xff] }
  0xcf   :  { %v5501_v28 = vcombine.high %v1937_v21, %v1941_v22 }
  0xd1   :  { %2628 = vmatpush1.bf16.msra.mxu1 %v5428_v27  ;;  %v5492_v27 = vcombine.low %v1929_v15, %v1933_v16 }
  0xd2   :  { %2629 = vmatprep.subr.bf16.mxu1 %v5437_v30  ;;  %v5274_v30 = vcombine.low %v120_v9, %v124_v10 }
  0xd3   :  { %1513 = vmatmul.mubr.bf16.gmra.mrb[4].mxu1 %v5238_v31  ;;  %v1945_v31 = vld [vmem:[#allocation8 + $0x2c0] sm:$0xff] }
  0xd4   :  { %1739 = vmatmul.mubr.bf16.gmra.mrb[4].mxu0 %v5242_v32  ;;  %1522 = vmatprep.mubr.bf16.mxu1 %v5247_v33  ;;  %v1949_v32 = vld [vmem:[#allocation8 + $0x2e0] sm:$0xff]  ;;  %v5279_v33 = vcombine.high %v126_v23, %v130_v24 }
  0xd5   :  { %1748 = vmatprep.mubr.bf16.mxu0 %v5251_v34  ;;  %2630 = vmatpush1.bf16.msra.mxu1 %v5436_v35  ;;  %v5283_v34 = vcombine.high %v128_v25, %v132_v26  ;;  %v5500_v35 = vcombine.low %v1937_v21, %v1941_v22  ;;  %v5509_v36 = vcombine.high %v1945_v31, %v1949_v32  ;;  %v1870_v21 = vld [vmem:[#allocation8 + $0x68] sm:$0xff] }
  0xd6   :  { %2631 = vmatprep.subr.bf16.mxu1 %v5445_v38  ;;  %v1957_v38 = vld [vmem:[#allocation8 + $0x320] sm:$0xff] }
  0xd7   :  { %v5517_v44 = vcombine.high %v1953_v37, %v1957_v38 }
  0xd9   :  { %2632 = vmatpush1.bf16.msra.mxu1 %v5444_v43  ;;  %v5508_v43 = vcombine.low %v1945_v31, %v1949_v32 }
  0xda   :  { %2633 = vmatprep.subr.bf16.mxu1 %v5453_v46  ;;  %v5282_v46 = vcombine.low %v128_v25, %v132_v26 }
  0xdb   :  { %1523 = vmatmul.mubr.bf16.gmra.mrb[8].mxu1 %v5246_v47  ;;  %v1961_v47 = vld [vmem:[#allocation8 + $0x340] sm:$0xff] }
  0xdc   :  { %1749 = vmatmul.mubr.bf16.gmra.mrb[8].mxu0 %v5250_v48  ;;  %1532 = vmatprep.mubr.bf16.mxu1 %v5255_v49  ;;  %v1965_v48 = vld [vmem:[#allocation8 + $0x360] sm:$0xff]  ;;  %v5287_v49 = vcombine.high %v134_v39, %v138_v40 }
  0xdd   :  { %1758 = vmatprep.mubr.bf16.mxu0 %v5259_v50  ;;  %2634 = vmatpush1.bf16.msra.mxu1 %v5452_v51  ;;  %v5291_v50 = vcombine.high %v136_v41, %v140_v42  ;;  %v5516_v51 = vcombine.low %v1953_v37, %v1957_v38  ;;  %v5525_v52 = vcombine.high %v1961_v47, %v1965_v48 }
  0xde   :  { %2635 = vmatprep.subr.bf16.mxu1 %v5461_v54  ;;  %v5524_v53 = vcombine.low %v1961_v47, %v1965_v48  ;;  %v5286_v54 = vcombine.low %v134_v39, %v138_v40 }
  0xe1   :  { %2636 = vmatpush1.bf16.msra.mxu1 %v5460_v59  ;;  %v5532_v59 = vcombine.low %v1969_v56, %v1973_v57 }
  0xe2   :  { %2637 = vmatprep.subr.bf16.mxu1 %v5469_v62  ;;  %v5541_v62 = vcombine.high %v1977_v60, %v1981_v61 }
  0xe3   :  { %1533 = vmatmul.mubr.bf16.gmra.mrb[12].mxu1 %v5254_v63  ;;  %v5540_v63 = vcombine.low %v1977_v60, %v1981_v61  ;;  %v1894_v60 = vld [vmem:[#allocation8 + $0x128] sm:$0xff] }
  0xe4   :  { %1759 = vmatmul.mubr.bf16.gmra.mrb[12].mxu0 %v5258_v0  ;;  %1542 = vmatprep.mubr.bf16.mxu1 %v5263_v1  ;;  %v1858_v0 = vld [vmem:[#allocation8 + $0x8] sm:$0xff] }
  0xe5   :  { %1768 = vmatprep.mubr.bf16.mxu0 %v5267_v2  ;;  %2638 = vmatpush1.bf16.msra.mxu1 %v5468_v3  ;;  %v1862_v1 = vld [vmem:[#allocation8 + $0x28] sm:$0xff] }
  0xe6   :  { %2639 = vmatprep.subr.bf16.mxu1 %v5477_v6  ;;  %v5423_v2 = vcombine.high %v1858_v0, %v1862_v1  ;;  %v5422_v3 = vcombine.low %v1858_v0, %v1862_v1 }
  0xe9   :  { %2640 = vmatpush1.bf16.msra.mxu1 %v5476_v11 }
  0xea   :  { %2641 = vmatprep.subr.bf16.mxu1 %v5485_v12 }
  0xeb   :  { %1543 = vmatmul.mubr.bf16.gmra.mrb[16].mxu1 %v5262_v13 }
  0xec   :  { %1769 = vmatmul.mubr.bf16.gmra.mrb[16].mxu0 %v5266_v14  ;;  %1552 = vmatprep.mubr.bf16.mxu1 %v5271_v17 }
  0xed   :  { %1778 = vmatprep.mubr.bf16.mxu0 %v5275_v18  ;;  %2642 = vmatpush1.bf16.msra.mxu1 %v5484_v19 }
  0xee   :  { %2643 = vmatprep.subr.bf16.mxu1 %v5493_v20  ;;  %v1866_v20 = vld [vmem:[#allocation8 + $0x48] sm:$0xff] }
  0xef   :  { %v5430_v39 = vcombine.low %v1866_v20, %v1870_v21 }
  0xf1   :  { %2644 = vmatpush1.bf16.msra.mxu1 %v5492_v27 }
  0xf2   :  { %2645 = vmatprep.subr.bf16.mxu1 %v5501_v28 }
  0xf3   :  { %1553 = vmatmul.mubr.bf16.gmra.mrb[20].mxu1 %v5270_v29  ;;  %v5431_v29 = vcombine.high %v1866_v20, %v1870_v21  ;;  %v1906_v21 = vld [vmem:[#allocation8 + $0x188] sm:$0xff] }
  0xf4   :  { %1779 = vmatmul.mubr.bf16.gmra.mrb[20].mxu0 %v5274_v30  ;;  %1562 = vmatprep.mubr.bf16.mxu1 %v5279_v33  ;;  %v1874_v33 = vld [vmem:[#allocation8 + $0x88] sm:$0xff] }
  0xf5   :  { %1788 = vmatprep.mubr.bf16.mxu0 %v5283_v34  ;;  %2646 = vmatpush1.bf16.msra.mxu1 %v5500_v35  ;;  %v1878_v34 = vld [vmem:[#allocation8 + $0xa8] sm:$0xff] }
  0xf6   :  { %2647 = vmatprep.subr.bf16.mxu1 %v5509_v36  ;;  %v5439_v42 = vcombine.high %v1874_v33, %v1878_v34 }
  0xf9   :  { %2648 = vmatpush1.bf16.msra.mxu1 %v5508_v43 }
  0xfa   :  { %2649 = vmatprep.subr.bf16.mxu1 %v5517_v44 }
  0xfb   :  { %1563 = vmatmul.mubr.bf16.gmra.mrb[24].mxu1 %v5278_v45  ;;  %v1882_v45 = vld [vmem:[#allocation8 + $0xc8] sm:$0xff] }
  0xfc   :  { %1789 = vmatmul.mubr.bf16.gmra.mrb[24].mxu0 %v5282_v46  ;;  %1572 = vmatprep.mubr.bf16.mxu1 %v5287_v49  ;;  %v1886_v46 = vld [vmem:[#allocation8 + $0xe8] sm:$0xff] }
  0xfd   :  { %1798 = vmatprep.mubr.bf16.mxu0 %v5291_v50  ;;  %2650 = vmatpush1.bf16.msra.mxu1 %v5516_v51  ;;  %v5438_v51 = vcombine.low %v1874_v33, %v1878_v34  ;;  %v5446_v1 = vcombine.low %v1882_v45, %v1886_v46 }
  0xfe   :  { %2651 = vmatprep.subr.bf16.mxu1 %v5525_v52 }
 0x101   :  { %2652 = vmatpush1.bf16.msra.mxu1 %v5524_v53 }
 0x102   :  { %2653 = vmatprep.subr.bf16.mxu1 %v5533_v58 }
 0x103   :  { %1573 = vmatmul.mubr.bf16.gmra.mrb[28].mxu1 %v5286_v54 }
 0x104   :  { %1799 = vmatmul.mubr.bf16.gmra.mrb[28].mxu0 %v5290_v55  ;;  %v5447_v55 = vcombine.high %v1882_v45, %v1886_v46 }
 0x105   :  { %2654 = vmatpush1.bf16.msra.mxu1 %v5532_v59  ;;  %v1890_v59 = vld [vmem:[#allocation8 + $0x108] sm:$0xff] }
 0x106   :  { %2655 = vmatprep.subr.bf16.mxu1 %v5541_v62 }
 0x109   :  { %2656 = vmatpush1.bf16.msra.mxu1 %v5540_v63 }
 0x10a   :  { %2738 = vmatprep.subr.bf16.mxu1 %v5423_v2 }
 0x19e   :  { %v1504_v4 = vpop.f32.mrb[0].mxu1 }
 0x19f   :  { %v1730_v5 = vpop.f32.mrb[0].mxu0  ;;  %v1506_v7 = vpop.f32.mrb[1].mxu1 }
 0x1a0   :  { %v5676_v6 = vadd.f32 %v1730_v5, %v1504_v4  ;;  %v1732_v8 = vpop.f32.mrb[1].mxu0  ;;  %v1508_v10 = vpop.f32.mrb[2].mxu1  ;;  %v5455_v4 = vcombine.high %v1890_v59, %v1894_v60 }
 0x1a1   :  { %v5677_v9 = vadd.f32 %v1732_v8, %v1506_v7  ;;  %v1734_v11 = vpop.f32.mrb[2].mxu0  ;;  %v1510_v13 = vpop.f32.mrb[3].mxu1  ;;  %v1898_v7 = vld [vmem:[#allocation8 + $0x148] sm:$0xff] }
 0x1a2   :  { %v5678_v12 = vadd.f32 %v1734_v11, %v1508_v10  ;;  %v1736_v14 = vpop.f32.mrb[3].mxu0  ;;  %v1809_v16 = vmax.f32 %v5676_v6, 0.0  ;;  %v1902_v8 = vld [vmem:[#allocation8 + $0x168] sm:$0xff] }
 0x1a3   :  { %v5679_v15 = vadd.f32 %v1736_v14, %v1510_v13  ;;  %v1810_v18 = vmax.f32 %v5677_v9, 0.0  ;;  %v5454_v13 = vcombine.low %v1890_v59, %v1894_v60 }
 0x1a4   :  { %v1811_v17 = vmax.f32 %v5678_v12, 0.0 }
 0x1a5   :  { %v1812_v19 = vmax.f32 %v5679_v15, 0.0 }
 0x1a6   :  { %v6574_v22 = vpack.c.bf16 %v1811_v17, %v1809_v16  ;;  %v1514_v24 = vpop.f32.mrb[4].mxu1  ;;  %v5463_v17 = vcombine.high %v1898_v7, %v1902_v8 }
 0x1a7   :  { %v6576_v23 = vpack.c.bf16 %v1812_v19, %v1810_v18  ;;  %v1740_v25 = vpop.f32.mrb[4].mxu0  ;;  %v1516_v27 = vpop.f32.mrb[5].mxu1 }
 0x1a8   :  { %v5680_v26 = vadd.f32 %v1740_v25, %v1514_v24  ;;  %v1742_v28 = vpop.f32.mrb[5].mxu0  ;;  %v1518_v31 = vpop.f32.mrb[6].mxu1  ;;  %v1910_v24 = vld [vmem:[#allocation8 + $0x1a8] sm:$0xff] }
 0x1a9   :  { %v5681_v30 = vadd.f32 %v1742_v28, %v1516_v27  ;;  %v1744_v32 = vpop.f32.mrb[6].mxu0  ;;  %2657 = vmatprep.mubr.bf16.mxu1 %v6576_v23  ;;  %v1520_v36 = vpop.f32.mrb[7].mxu1 }
 0x1aa   :  { %v5682_v35 = vadd.f32 %v1744_v32, %v1518_v31  ;;  %v1746_v37 = vpop.f32.mrb[7].mxu0  ;;  %2658 = vmatmul.mubr.bf16.vlgmr.msra.gmra.mrb[32].mxu1 %v6574_v22  ;;  %v1813_v40 = vmax.f32 %v5680_v26, 0.0  ;;  %v5471_v32 = vcombine.high %v1906_v21, %v1910_v24 }
 0x1ab   :  { %v5683_v38 = vadd.f32 %v1746_v37, %v1520_v36  ;;  %2739 = vmatpush1.bf16.msra.mxu1 %v5422_v3  ;;  %v1814_v43 = vmax.f32 %v5681_v30, 0.0  ;;  %v1918_v36 = vld [vmem:[#allocation8 + $0x1e8] sm:$0xff] }
 0x1ac   :  { %v1815_v41 = vmax.f32 %v5682_v35, 0.0  ;;  %2740 = vmatprep.subr.bf16.mxu1 %v5431_v29  ;;  %v5462_v29 = vcombine.low %v1898_v7, %v1902_v8  ;;  %v1914_v35 = vld [vmem:[#allocation8 + $0x1c8] sm:$0xff] }
 0x1ad   :  { %v1816_v44 = vmax.f32 %v5683_v38, 0.0  ;;  %v5479_v45 = vcombine.high %v1914_v35, %v1918_v36 }
 0x1ae   :  { %v6580_v47 = vpack.c.bf16 %v1815_v41, %v1813_v40  ;;  %v1524_v49 = vpop.f32.mrb[8].mxu1  ;;  %v5470_v41 = vcombine.low %v1906_v21, %v1910_v24 }
 0x1af   :  { %v6582_v48 = vpack.c.bf16 %v1816_v44, %v1814_v43  ;;  %v1750_v50 = vpop.f32.mrb[8].mxu0  ;;  %2741 = vmatpush1.bf16.msra.mxu1 %v5430_v39  ;;  %v1526_v53 = vpop.f32.mrb[9].mxu1 }
 0x1b0   :  { %v5684_v52 = vadd.f32 %v1750_v50, %v1524_v49  ;;  %v1752_v54 = vpop.f32.mrb[9].mxu0  ;;  %2742 = vmatprep.subr.bf16.mxu1 %v5439_v42  ;;  %v1528_v57 = vpop.f32.mrb[10].mxu1 }
 0x1b1   :  { %v5685_v56 = vadd.f32 %v1752_v54, %v1526_v53  ;;  %v1754_v58 = vpop.f32.mrb[10].mxu0  ;;  %2667 = vmatprep.mubr.bf16.mxu1 %v6582_v48  ;;  %v1530_v62 = vpop.f32.mrb[11].mxu1 }
 0x1b2   :  { %v5686_v61 = vadd.f32 %v1754_v58, %v1528_v57  ;;  %v1756_v63 = vpop.f32.mrb[11].mxu0  ;;  %2668 = vmatmul.mubr.bf16.gmra.mrb[36].mxu1 %v6580_v47  ;;  %v1817_v2 = vmax.f32 %v5684_v52, 0.0  ;;  %v1926_v52 = vld [vmem:[#allocation8 + $0x228] sm:$0xff]  ;;  %v5478_v57 = vcombine.low %v1914_v35, %v1918_v36 }
 0x1b3   :  { %v5687_v0 = vadd.f32 %v1756_v63, %v1530_v62  ;;  %2743 = vmatpush1.bf16.msra.mxu1 %v5438_v51  ;;  %v1818_v5 = vmax.f32 %v5685_v56, 0.0  ;;  %v1922_v51 = vld [vmem:[#allocation8 + $0x208] sm:$0xff] }
 0x1b4   :  { %v1819_v3 = vmax.f32 %v5686_v61, 0.0  ;;  %2744 = vmatprep.subr.bf16.mxu1 %v5447_v55  ;;  %v5487_v60 = vcombine.high %v1922_v51, %v1926_v52  ;;  %v1930_v63 = vld [vmem:[#allocation8 + $0x248] sm:$0xff] }
 0x1b5   :  { %v1820_v6 = vmax.f32 %v5687_v0, 0.0  ;;  %v1934_v0 = vld [vmem:[#allocation8 + $0x268] sm:$0xff] }
 0x1b6   :  { %v6586_v9 = vpack.c.bf16 %v1819_v3, %v1817_v2  ;;  %v1534_v11 = vpop.f32.mrb[12].mxu1  ;;  %v5494_v21 = vcombine.low %v1930_v63, %v1934_v0 }
 0x1b7   :  { %v6588_v10 = vpack.c.bf16 %v1820_v6, %v1818_v5  ;;  %v1760_v12 = vpop.f32.mrb[12].mxu0  ;;  %2745 = vmatpush1.bf16.msra.mxu1 %v5446_v1  ;;  %v1536_v15 = vpop.f32.mrb[13].mxu1  ;;  %v5486_v5 = vcombine.low %v1922_v51, %v1926_v52 }
 0x1b8   :  { %v5688_v14 = vadd.f32 %v1760_v12, %v1534_v11  ;;  %v1762_v16 = vpop.f32.mrb[13].mxu0  ;;  %2746 = vmatprep.subr.bf16.mxu1 %v5455_v4  ;;  %v1538_v19 = vpop.f32.mrb[14].mxu1  ;;  %v5495_v11 = vcombine.high %v1930_v63, %v1934_v0 }
 0x1b9   :  { %v5689_v18 = vadd.f32 %v1762_v16, %v1536_v15  ;;  %v1764_v20 = vpop.f32.mrb[14].mxu0  ;;  %2677 = vmatprep.mubr.bf16.mxu1 %v6588_v10  ;;  %v1540_v26 = vpop.f32.mrb[15].mxu1  ;;  %v1938_v15 = vld [vmem:[#allocation8 + $0x288] sm:$0xff] }
 0x1ba   :  { %v5690_v25 = vadd.f32 %v1764_v20, %v1538_v19  ;;  %v1766_v27 = vpop.f32.mrb[15].mxu0  ;;  %2678 = vmatmul.mubr.bf16.gmra.mrb[40].mxu1 %v6586_v9  ;;  %v1821_v30 = vmax.f32 %v5688_v14, 0.0  ;;  %v1942_v16 = vld [vmem:[#allocation8 + $0x2a8] sm:$0xff] }
 0x1bb   :  { %v5691_v28 = vadd.f32 %v1766_v27, %v1540_v26  ;;  %2747 = vmatpush1.bf16.msra.mxu1 %v5454_v13  ;;  %v1822_v33 = vmax.f32 %v5689_v18, 0.0  ;;  %v5503_v26 = vcombine.high %v1938_v15, %v1942_v16  ;;  %v5502_v35 = vcombine.low %v1938_v15, %v1942_v16 }
 0x1bc   :  { %v1823_v31 = vmax.f32 %v5690_v25, 0.0  ;;  %2748 = vmatprep.subr.bf16.mxu1 %v5463_v17 }
 0x1bd   :  { %v1824_v34 = vmax.f32 %v5691_v28, 0.0 }
 0x1be   :  { %v6592_v37 = vpack.c.bf16 %v1823_v31, %v1821_v30  ;;  %v1544_v39 = vpop.f32.mrb[16].mxu1  ;;  %v1950_v30 = vld [vmem:[#allocation8 + $0x2e8] sm:$0xff] }
 0x1bf   :  { %v6594_v38 = vpack.c.bf16 %v1824_v34, %v1822_v33  ;;  %v1770_v40 = vpop.f32.mrb[16].mxu0  ;;  %2749 = vmatpush1.bf16.msra.mxu1 %v5462_v29  ;;  %v1546_v43 = vpop.f32.mrb[17].mxu1  ;;  %v1946_v29 = vld [vmem:[#allocation8 + $0x2c8] sm:$0xff] }
 0x1c0   :  { %v5692_v42 = vadd.f32 %v1770_v40, %v1544_v39  ;;  %v1772_v44 = vpop.f32.mrb[17].mxu0  ;;  %2750 = vmatprep.subr.bf16.mxu1 %v5471_v32  ;;  %v1548_v49 = vpop.f32.mrb[18].mxu1 }
 0x1c1   :  { %v5693_v46 = vadd.f32 %v1772_v44, %v1546_v43  ;;  %v1774_v50 = vpop.f32.mrb[18].mxu0  ;;  %2687 = vmatprep.mubr.bf16.mxu1 %v6594_v38  ;;  %v1550_v54 = vpop.f32.mrb[19].mxu1 }
 0x1c2   :  { %v5694_v53 = vadd.f32 %v1774_v50, %v1548_v49  ;;  %v1776_v55 = vpop.f32.mrb[19].mxu0  ;;  %2688 = vmatmul.mubr.bf16.gmra.mrb[44].mxu1 %v6592_v37  ;;  %v1825_v58 = vmax.f32 %v5692_v42, 0.0 }
 0x1c3   :  { %v5695_v56 = vadd.f32 %v1776_v55, %v1550_v54  ;;  %2751 = vmatpush1.bf16.msra.mxu1 %v5470_v41  ;;  %v1826_v61 = vmax.f32 %v5693_v46, 0.0  ;;  %v5511_v41 = vcombine.high %v1946_v29, %v1950_v30  ;;  %v1958_v46 = vld [vmem:[#allocation8 + $0x328] sm:$0xff] }
 0x1c4   :  { %v1827_v59 = vmax.f32 %v5694_v53, 0.0  ;;  %2752 = vmatprep.subr.bf16.mxu1 %v5479_v45  ;;  %v1954_v45 = vld [vmem:[#allocation8 + $0x308] sm:$0xff]  ;;  %v5510_v53 = vcombine.low %v1946_v29, %v1950_v30 }
 0x1c5   :  { %v1828_v62 = vmax.f32 %v5695_v56, 0.0  ;;  %v5519_v56 = vcombine.high %v1954_v45, %v1958_v46 }
 0x1c6   :  { %v6598_v1 = vpack.c.bf16 %v1827_v59, %v1825_v58  ;;  %v1554_v3 = vpop.f32.mrb[20].mxu1  ;;  %v1962_v59 = vld [vmem:[#allocation8 + $0x348] sm:$0xff] }
 0x1c7   :  { %v6600_v2 = vpack.c.bf16 %v1828_v62, %v1826_v61  ;;  %v1780_v4 = vpop.f32.mrb[20].mxu0  ;;  %2753 = vmatpush1.bf16.msra.mxu1 %v5478_v57  ;;  %v1556_v7 = vpop.f32.mrb[21].mxu1 }
 0x1c8   :  { %v5696_v6 = vadd.f32 %v1780_v4, %v1554_v3  ;;  %v1782_v8 = vpop.f32.mrb[21].mxu0  ;;  %2754 = vmatprep.subr.bf16.mxu1 %v5487_v60  ;;  %v1558_v13 = vpop.f32.mrb[22].mxu1  ;;  %v1966_v60 = vld [vmem:[#allocation8 + $0x368] sm:$0xff]  ;;  %v5518_v3 = vcombine.low %v1954_v45, %v1958_v46  ;;  %v1875_v45 = vld [vmem:[#allocation8 + $0x90] sm:$0xff] }
 0x1c9   :  { %v5697_v12 = vadd.f32 %v1782_v8, %v1556_v7  ;;  %v1784_v14 = vpop.f32.mrb[22].mxu0  ;;  %2697 = vmatprep.mubr.bf16.mxu1 %v6600_v2  ;;  %v1560_v18 = vpop.f32.mrb[23].mxu1  ;;  %v5527_v7 = vcombine.high %v1962_v59, %v1966_v60  ;;  %v1879_v46 = vld [vmem:[#allocation8 + $0xb0] sm:$0xff] }
 0x1ca   :  { %v5698_v17 = vadd.f32 %v1784_v14, %v1558_v13  ;;  %v1786_v19 = vpop.f32.mrb[23].mxu0  ;;  %2698 = vmatmul.mubr.bf16.gmra.mrb[48].mxu1 %v6598_v1  ;;  %v1829_v24 = vmax.f32 %v5696_v6, 0.0  ;;  %v1970_v13 = vld [vmem:[#allocation8 + $0x388] sm:$0xff] }
 0x1cb   :  { %v5699_v20 = vadd.f32 %v1786_v19, %v1560_v18  ;;  %2755 = vmatpush1.bf16.msra.mxu1 %v5486_v5  ;;  %v1830_v27 = vmax.f32 %v5697_v12, 0.0  ;;  %v1974_v14 = vld [vmem:[#allocation8 + $0x3a8] sm:$0xff]  ;;  %v5526_v19 = vcombine.low %v1962_v59, %v1966_v60  ;;  %v1899_v59 = vld [vmem:[#allocation8 + $0x150] sm:$0xff] }
 0x1cc   :  { %v1831_v25 = vmax.f32 %v5698_v17, 0.0  ;;  %2756 = vmatprep.subr.bf16.mxu1 %v5495_v11  ;;  %v1903_v60 = vld [vmem:[#allocation8 + $0x170] sm:$0xff] }
 0x1cd   :  { %v1832_v28 = vmax.f32 %v5699_v20, 0.0 }
 0x1ce   :  { %v6604_v31 = vpack.c.bf16 %v1831_v25, %v1829_v24  ;;  %v1564_v33 = vpop.f32.mrb[24].mxu1  ;;  %v5535_v24 = vcombine.high %v1970_v13, %v1974_v14 }
 0x1cf   :  { %v6606_v32 = vpack.c.bf16 %v1832_v28, %v1830_v27  ;;  %v1790_v34 = vpop.f32.mrb[24].mxu0  ;;  %2757 = vmatpush1.bf16.msra.mxu1 %v5494_v21  ;;  %v1566_v39 = vpop.f32.mrb[25].mxu1  ;;  %v1978_v27 = vld [vmem:[#allocation8 + $0x3c8] sm:$0xff] }
 0x1d0   :  { %v5700_v36 = vadd.f32 %v1790_v34, %v1564_v33  ;;  %v1792_v40 = vpop.f32.mrb[25].mxu0  ;;  %2758 = vmatprep.subr.bf16.mxu1 %v5503_v26  ;;  %v1568_v43 = vpop.f32.mrb[26].mxu1  ;;  %v1982_v28 = vld [vmem:[#allocation8 + $0x3e8] sm:$0xff]  ;;  %v5534_v33 = vcombine.low %v1970_v13, %v1974_v14  ;;  %v1923_v13 = vld [vmem:[#allocation8 + $0x210] sm:$0xff] }
 0x1d1   :  { %v5701_v42 = vadd.f32 %v1792_v40, %v1566_v39  ;;  %v1794_v44 = vpop.f32.mrb[26].mxu0  ;;  %2707 = vmatprep.mubr.bf16.mxu1 %v6606_v32  ;;  %v1570_v50 = vpop.f32.mrb[27].mxu1  ;;  %v5543_v34 = vcombine.high %v1978_v27, %v1982_v28  ;;  %v5542_v39 = vcombine.low %v1978_v27, %v1982_v28  ;;  %v1927_v14 = vld [vmem:[#allocation8 + $0x230] sm:$0xff] }
 0x1d2   :  { %v5702_v49 = vadd.f32 %v1794_v44, %v1568_v43  ;;  %v1796_v51 = vpop.f32.mrb[27].mxu0  ;;  %2708 = vmatmul.mubr.bf16.gmra.mrb[52].mxu1 %v6604_v31  ;;  %v1833_v54 = vmax.f32 %v5700_v36, 0.0  ;;  %v1863_v36 = vld [vmem:[#allocation8 + $0x30] sm:$0xff] }
 0x1d3   :  { %v5703_v52 = vadd.f32 %v1796_v51, %v1570_v50  ;;  %2759 = vmatpush1.bf16.msra.mxu1 %v5502_v35  ;;  %v1834_v57 = vmax.f32 %v5701_v42, 0.0  ;;  %v1859_v35 = vld [vmem:[#allocation8 + $0x10] sm:$0xff]  ;;  %v5441_v50 = vcombine.high %v1875_v45, %v1879_v46 }
 0x1d4   :  { %v1835_v55 = vmax.f32 %v5702_v49, 0.0  ;;  %2760 = vmatprep.subr.bf16.mxu1 %v5511_v41  ;;  %v5425_v40 = vcombine.high %v1859_v35, %v1863_v36  ;;  %v1867_v41 = vld [vmem:[#allocation8 + $0x50] sm:$0xff]  ;;  %v5424_v43 = vcombine.low %v1859_v35, %v1863_v36 }
 0x1d5   :  { %v1836_v58 = vmax.f32 %v5703_v52, 0.0  ;;  %v1871_v42 = vld [vmem:[#allocation8 + $0x70] sm:$0xff] }
 0x1d6   :  { %v6610_v61 = vpack.c.bf16 %v1835_v55, %v1833_v54  ;;  %v1574_v63 = vpop.f32.mrb[28].mxu1  ;;  %v5433_v44 = vcombine.high %v1867_v41, %v1871_v42  ;;  %v5432_v49 = vcombine.low %v1867_v41, %v1871_v42  ;;  %v1883_v51 = vld [vmem:[#allocation8 + $0xd0] sm:$0xff] }
 0x1d7   :  { %v6612_v62 = vpack.c.bf16 %v1836_v58, %v1834_v57  ;;  %v1800_v0 = vpop.f32.mrb[28].mxu0  ;;  %2761 = vmatpush1.bf16.msra.mxu1 %v5510_v53  ;;  %v1576_v5 = vpop.f32.mrb[29].mxu1  ;;  %v1887_v52 = vld [vmem:[#allocation8 + $0xf0] sm:$0xff]  ;;  %v5440_v53 = vcombine.low %v1875_v45, %v1879_v46 }
 0x1d8   :  { %v5704_v4 = vadd.f32 %v1800_v0, %v1574_v63  ;;  %v1802_v6 = vpop.f32.mrb[29].mxu0  ;;  %2762 = vmatprep.subr.bf16.mxu1 %v5519_v56  ;;  %v1578_v11 = vpop.f32.mrb[30].mxu1  ;;  %v5449_v54 = vcombine.high %v1883_v51, %v1887_v52  ;;  %v1891_v55 = vld [vmem:[#allocation8 + $0x110] sm:$0xff]  ;;  %v5448_v57 = vcombine.low %v1883_v51, %v1887_v52  ;;  %v5465_v0 = vcombine.high %v1899_v59, %v1903_v60 }
 0x1d9   :  { %v5705_v8 = vadd.f32 %v1802_v6, %v1576_v5  ;;  %v1804_v12 = vpop.f32.mrb[30].mxu0  ;;  %2717 = vmatprep.mubr.bf16.mxu1 %v6612_v62  ;;  %v1580_v16 = vpop.f32.mrb[31].mxu1  ;;  %v1895_v56 = vld [vmem:[#allocation8 + $0x130] sm:$0xff]  ;;  %v5464_v5 = vcombine.low %v1899_v59, %v1903_v60  ;;  %v1868_v59 = vld [vmem:[#allocation8 + $0x58] sm:$0xff] }
 0x1da   :  { %v5706_v15 = vadd.f32 %v1804_v12, %v1578_v11  ;;  %v1806_v17 = vpop.f32.mrb[31].mxu0  ;;  %2718 = vmatmul.mubr.bf16.gmra.mrb[56].mxu1 %v6610_v61  ;;  %v1837_v20 = vmax.f32 %v5704_v4, 0.0  ;;  %v5457_v58 = vcombine.high %v1891_v55, %v1895_v56  ;;  %v5456_v63 = vcombine.low %v1891_v55, %v1895_v56  ;;  %v1911_v4 = vld [vmem:[#allocation8 + $0x1b0] sm:$0xff]  ;;  %v1860_v55 = vld [vmem:[#allocation8 + $0x18] sm:$0xff] }
 0x1db   :  { %v5707_v18 = vadd.f32 %v1806_v17, %v1580_v16  ;;  %2763 = vmatpush1.bf16.msra.mxu1 %v5518_v3  ;;  %v1838_v25 = vmax.f32 %v5705_v8, 0.0  ;;  %v1907_v3 = vld [vmem:[#allocation8 + $0x190] sm:$0xff]  ;;  %v5489_v16 = vcombine.high %v1923_v13, %v1927_v14  ;;  %v1864_v56 = vld [vmem:[#allocation8 + $0x38] sm:$0xff] }
 0x1dc   :  { %v1839_v21 = vmax.f32 %v5706_v15, 0.0  ;;  %2764 = vmatprep.subr.bf16.mxu1 %v5527_v7  ;;  %v5473_v6 = vcombine.high %v1907_v3, %v1911_v4  ;;  %v1915_v7 = vld [vmem:[#allocation8 + $0x1d0] sm:$0xff]  ;;  %v5472_v11 = vcombine.low %v1907_v3, %v1911_v4  ;;  %v1872_v60 = vld [vmem:[#allocation8 + $0x78] sm:$0xff] }
 0x1dd   :  { %v1840_v26 = vmax.f32 %v5707_v18, 0.0  ;;  %v1919_v8 = vld [vmem:[#allocation8 + $0x1f0] sm:$0xff]  ;;  %v1876_v3 = vld [vmem:[#allocation8 + $0x98] sm:$0xff] }
 0x1de   :  { %v6616_v29 = vpack.c.bf16 %v1839_v21, %v1837_v20  ;;  %v5481_v12 = vcombine.high %v1915_v7, %v1919_v8  ;;  %v5480_v15 = vcombine.low %v1915_v7, %v1919_v8  ;;  %v1931_v17 = vld [vmem:[#allocation8 + $0x250] sm:$0xff]  ;;  %v1880_v4 = vld [vmem:[#allocation8 + $0xb8] sm:$0xff] }
 0x1df   :  { %v6618_v30 = vpack.c.bf16 %v1840_v26, %v1838_v25  ;;  %2765 = vmatpush1.bf16.msra.mxu1 %v5526_v19  ;;  %v1935_v18 = vld [vmem:[#allocation8 + $0x270] sm:$0xff]  ;;  %v5488_v19 = vcombine.low %v1923_v13, %v1927_v14  ;;  %v1884_v7 = vld [vmem:[#allocation8 + $0xd8] sm:$0xff] }
 0x1e0   :  { %2766 = vmatprep.subr.bf16.mxu1 %v5535_v24  ;;  %v5497_v20 = vcombine.high %v1931_v17, %v1935_v18  ;;  %v1939_v21 = vld [vmem:[#allocation8 + $0x290] sm:$0xff]  ;;  %v5496_v25 = vcombine.low %v1931_v17, %v1935_v18  ;;  %v1888_v8 = vld [vmem:[#allocation8 + $0xf8] sm:$0xff] }
 0x1e1   :  { %2727 = vmatprep.mubr.bf16.mxu1 %v6618_v30  ;;  %v1943_v24 = vld [vmem:[#allocation8 + $0x2b0] sm:$0xff]  ;;  %v1892_v13 = vld [vmem:[#allocation8 + $0x118] sm:$0xff] }
 0x1e2   :  { %2728 = vmatmul.mubr.bf16.gmra.mrb[60].mxu1 %v6616_v29  ;;  %v5505_v26 = vcombine.high %v1939_v21, %v1943_v24  ;;  %v1947_v27 = vld [vmem:[#allocation8 + $0x2d0] sm:$0xff]  ;;  %v1896_v14 = vld [vmem:[#allocation8 + $0x138] sm:$0xff] }
 0x1e3   :  { %2767 = vmatpush1.bf16.msra.mxu1 %v5534_v33  ;;  %2770 = vmatprep.mubr.bf16.mxu1 %v6576_v23  ;;  %v1951_v28 = vld [vmem:[#allocation8 + $0x2f0] sm:$0xff]  ;;  %v5504_v33 = vcombine.low %v1939_v21, %v1943_v24  ;;  %v1900_v17 = vld [vmem:[#allocation8 + $0x158] sm:$0xff] }
 0x1e4   :  { %2768 = vmatprep.subr.bf16.mxu1 %v5543_v34  ;;  %v5513_v34 = vcombine.high %v1947_v27, %v1951_v28  ;;  %v1955_v35 = vld [vmem:[#allocation8 + $0x310] sm:$0xff]  ;;  %v1904_v18 = vld [vmem:[#allocation8 + $0x178] sm:$0xff] }
 0x1e5   :  { %v1959_v36 = vld [vmem:[#allocation8 + $0x330] sm:$0xff]  ;;  %v1908_v21 = vld [vmem:[#allocation8 + $0x198] sm:$0xff] }
 0x1e6   :  { %v1963_v41 = vld [vmem:[#allocation8 + $0x350] sm:$0xff]  ;;  %v1912_v24 = vld [vmem:[#allocation8 + $0x1b8] sm:$0xff] }
 0x1e7   :  { %2769 = vmatpush1.bf16.msra.mxu1 %v5542_v39  ;;  %v5512_v39 = vcombine.low %v1947_v27, %v1951_v28  ;;  %v1967_v42 = vld [vmem:[#allocation8 + $0x370] sm:$0xff]  ;;  %v1916_v27 = vld [vmem:[#allocation8 + $0x1d8] sm:$0xff] }
 0x1e8   :  { %2851 = vmatprep.subr.bf16.mxu1 %v5425_v40  ;;  %v5521_v40 = vcombine.high %v1955_v35, %v1959_v36  ;;  %v1971_v45 = vld [vmem:[#allocation8 + $0x390] sm:$0xff]  ;;  %v1920_v28 = vld [vmem:[#allocation8 + $0x1f8] sm:$0xff] }
 0x1e9   :  { %v1975_v46 = vld [vmem:[#allocation8 + $0x3b0] sm:$0xff] }
 0x1ea   :  { %2771 = vmatmul.mubr.bf16.vlgmr.msra.gmra.mrb[64].mxu1 %v6574_v22  ;;  %v1979_v51 = vld [vmem:[#allocation8 + $0x3d0] sm:$0xff] }
 0x1eb   :  { %2780 = vmatprep.mubr.bf16.mxu1 %v6582_v48  ;;  %2852 = vmatpush1.bf16.msra.mxu1 %v5424_v43  ;;  %v5520_v43 = vcombine.low %v1955_v35, %v1959_v36  ;;  %v1983_v52 = vld [vmem:[#allocation8 + $0x3f0] sm:$0xff]  ;;  %v1924_v35 = vld [vmem:[#allocation8 + $0x218] sm:$0xff] }
 0x1ec   :  { %2853 = vmatprep.subr.bf16.mxu1 %v5433_v44  ;;  %v5529_v44 = vcombine.high %v1963_v41, %v1967_v42  ;;  %v1928_v36 = vld [vmem:[#allocation8 + $0x238] sm:$0xff] }
 0x1ef   :  { %2854 = vmatpush1.bf16.msra.mxu1 %v5432_v49  ;;  %v5528_v49 = vcombine.low %v1963_v41, %v1967_v42  ;;  %v1932_v41 = vld [vmem:[#allocation8 + $0x258] sm:$0xff] }
 0x1f0   :  { %2855 = vmatprep.subr.bf16.mxu1 %v5441_v50  ;;  %v5537_v50 = vcombine.high %v1971_v45, %v1975_v46  ;;  %v1936_v42 = vld [vmem:[#allocation8 + $0x278] sm:$0xff] }
 0x1f2   :  { %2781 = vmatmul.mubr.bf16.gmra.mrb[68].mxu1 %v6580_v47 }
 0x1f3   :  { %2790 = vmatprep.mubr.bf16.mxu1 %v6588_v10  ;;  %2856 = vmatpush1.bf16.msra.mxu1 %v5440_v53  ;;  %v5536_v53 = vcombine.low %v1971_v45, %v1975_v46  ;;  %v1940_v45 = vld [vmem:[#allocation8 + $0x298] sm:$0xff] }
 0x1f4   :  { %2857 = vmatprep.subr.bf16.mxu1 %v5449_v54  ;;  %v5545_v54 = vcombine.high %v1979_v51, %v1983_v52  ;;  %v1944_v46 = vld [vmem:[#allocation8 + $0x2b8] sm:$0xff] }
 0x1f7   :  { %2858 = vmatpush1.bf16.msra.mxu1 %v5448_v57  ;;  %v5544_v57 = vcombine.low %v1979_v51, %v1983_v52  ;;  %v1948_v51 = vld [vmem:[#allocation8 + $0x2d8] sm:$0xff] }
 0x1f8   :  { %2859 = vmatprep.subr.bf16.mxu1 %v5457_v58  ;;  %v5427_v58 = vcombine.high %v1860_v55, %v1864_v56  ;;  %v1952_v52 = vld [vmem:[#allocation8 + $0x2f8] sm:$0xff] }
 0x1fa   :  { %2791 = vmatmul.mubr.bf16.gmra.mrb[72].mxu1 %v6586_v9 }
 0x1fb   :  { %2800 = vmatprep.mubr.bf16.mxu1 %v6594_v38  ;;  %2860 = vmatpush1.bf16.msra.mxu1 %v5456_v63  ;;  %v5426_v63 = vcombine.low %v1860_v55, %v1864_v56  ;;  %v1956_v55 = vld [vmem:[#allocation8 + $0x318] sm:$0xff] }
 0x1fc   :  { %2861 = vmatprep.subr.bf16.mxu1 %v5465_v0  ;;  %v5435_v0 = vcombine.high %v1868_v59, %v1872_v60  ;;  %v1960_v56 = vld [vmem:[#allocation8 + $0x338] sm:$0xff] }
 0x1ff   :  { %2862 = vmatpush1.bf16.msra.mxu1 %v5464_v5  ;;  %v5434_v5 = vcombine.low %v1868_v59, %v1872_v60  ;;  %v1964_v59 = vld [vmem:[#allocation8 + $0x358] sm:$0xff] }
 0x200   :  { %2863 = vmatprep.subr.bf16.mxu1 %v5473_v6  ;;  %v5443_v6 = vcombine.high %v1876_v3, %v1880_v4  ;;  %v1968_v60 = vld [vmem:[#allocation8 + $0x378] sm:$0xff] }
 0x202   :  { %2801 = vmatmul.mubr.bf16.gmra.mrb[76].mxu1 %v6592_v37 }
 0x203   :  { %2810 = vmatprep.mubr.bf16.mxu1 %v6600_v2  ;;  %2864 = vmatpush1.bf16.msra.mxu1 %v5472_v11  ;;  %v5442_v11 = vcombine.low %v1876_v3, %v1880_v4  ;;  %v1972_v3 = vld [vmem:[#allocation8 + $0x398] sm:$0xff] }
 0x204   :  { %2865 = vmatprep.subr.bf16.mxu1 %v5481_v12  ;;  %v5451_v12 = vcombine.high %v1884_v7, %v1888_v8  ;;  %v1976_v4 = vld [vmem:[#allocation8 + $0x3b8] sm:$0xff] }
 0x207   :  { %2866 = vmatpush1.bf16.msra.mxu1 %v5480_v15  ;;  %v5450_v15 = vcombine.low %v1884_v7, %v1888_v8  ;;  %v1980_v7 = vld [vmem:[#allocation8 + $0x3d8] sm:$0xff] }
 0x208   :  { %2867 = vmatprep.subr.bf16.mxu1 %v5489_v16  ;;  %v5459_v16 = vcombine.high %v1892_v13, %v1896_v14  ;;  %v1984_v8 = vld [vmem:[#allocation8 + $0x3f8] sm:$0xff] }
 0x20a   :  { %2811 = vmatmul.mubr.bf16.gmra.mrb[80].mxu1 %v6598_v1 }
 0x20b   :  { %2820 = vmatprep.mubr.bf16.mxu1 %v6606_v32  ;;  %2868 = vmatpush1.bf16.msra.mxu1 %v5488_v19  ;;  %v5458_v19 = vcombine.low %v1892_v13, %v1896_v14  ;;  %v5546_v13 = vcombine.low %v1980_v7, %v1984_v8 }
 0x20c   :  { %2869 = vmatprep.subr.bf16.mxu1 %v5497_v20  ;;  %v5467_v20 = vcombine.high %v1900_v17, %v1904_v18 }
 0x20f   :  { %2870 = vmatpush1.bf16.msra.mxu1 %v5496_v25  ;;  %v5466_v25 = vcombine.low %v1900_v17, %v1904_v18 }
 0x210   :  { %2871 = vmatprep.subr.bf16.mxu1 %v5505_v26  ;;  %v5475_v26 = vcombine.high %v1908_v21, %v1912_v24 }
 0x212   :  { %2821 = vmatmul.mubr.bf16.gmra.mrb[84].mxu1 %v6604_v31 }
 0x213   :  { %2830 = vmatprep.mubr.bf16.mxu1 %v6612_v62  ;;  %2872 = vmatpush1.bf16.msra.mxu1 %v5504_v33  ;;  %v5474_v33 = vcombine.low %v1908_v21, %v1912_v24 }
 0x214   :  { %2873 = vmatprep.subr.bf16.mxu1 %v5513_v34  ;;  %v5483_v34 = vcombine.high %v1916_v27, %v1920_v28 }
 0x217   :  { %2874 = vmatpush1.bf16.msra.mxu1 %v5512_v39  ;;  %v5482_v39 = vcombine.low %v1916_v27, %v1920_v28 }
 0x218   :  { %2875 = vmatprep.subr.bf16.mxu1 %v5521_v40  ;;  %v5491_v40 = vcombine.high %v1924_v35, %v1928_v36 }
 0x21a   :  { %2831 = vmatmul.mubr.bf16.gmra.mrb[88].mxu1 %v6610_v61 }
 0x21b   :  { %2840 = vmatprep.mubr.bf16.mxu1 %v6618_v30  ;;  %2876 = vmatpush1.bf16.msra.mxu1 %v5520_v43  ;;  %v5490_v43 = vcombine.low %v1924_v35, %v1928_v36 }
 0x21c   :  { %2877 = vmatprep.subr.bf16.mxu1 %v5529_v44  ;;  %v5499_v44 = vcombine.high %v1932_v41, %v1936_v42 }
 0x21f   :  { %2878 = vmatpush1.bf16.msra.mxu1 %v5528_v49  ;;  %v5498_v49 = vcombine.low %v1932_v41, %v1936_v42 }
 0x220   :  { %2879 = vmatprep.subr.bf16.mxu1 %v5537_v50  ;;  %v5507_v50 = vcombine.high %v1940_v45, %v1944_v46 }
 0x222   :  { %2841 = vmatmul.mubr.bf16.gmra.mrb[92].mxu1 %v6616_v29 }
 0x223   :  { %2880 = vmatpush1.bf16.msra.mxu1 %v5536_v53  ;;  %2883 = vmatprep.mubr.bf16.mxu1 %v6576_v23  ;;  %v5506_v53 = vcombine.low %v1940_v45, %v1944_v46 }
 0x224   :  { %2881 = vmatprep.subr.bf16.mxu1 %v5545_v54  ;;  %v5515_v54 = vcombine.high %v1948_v51, %v1952_v52 }
 0x227   :  { %2882 = vmatpush1.bf16.msra.mxu1 %v5544_v57  ;;  %v5514_v57 = vcombine.low %v1948_v51, %v1952_v52 }
 0x228   :  { %2964 = vmatprep.subr.bf16.mxu1 %v5427_v58  ;;  %v5523_v58 = vcombine.high %v1956_v55, %v1960_v56 }
 0x22a   :  { %2884 = vmatmul.mubr.bf16.vlgmr.msra.gmra.mrb[96].mxu1 %v6574_v22 }
 0x22b   :  { %2893 = vmatprep.mubr.bf16.mxu1 %v6582_v48  ;;  %2965 = vmatpush1.bf16.msra.mxu1 %v5426_v63  ;;  %v5522_v63 = vcombine.low %v1956_v55, %v1960_v56 }
 0x22c   :  { %2966 = vmatprep.subr.bf16.mxu1 %v5435_v0  ;;  %v5531_v0 = vcombine.high %v1964_v59, %v1968_v60 }
 0x22f   :  { %2967 = vmatpush1.bf16.msra.mxu1 %v5434_v5  ;;  %v5530_v5 = vcombine.low %v1964_v59, %v1968_v60  ;;  %v6772_v59 = vld [vmem:[#allocation3] sm:$0xff] }
 0x230   :  { %2968 = vmatprep.subr.bf16.mxu1 %v5443_v6  ;;  %v5539_v6 = vcombine.high %v1972_v3, %v1976_v4  ;;  %v6824_v60 = vld [vmem:[#allocation3 + $0x180] sm:$0xff] }
 0x232   :  { %2894 = vmatmul.mubr.bf16.gmra.mrb[100].mxu1 %v6580_v47 }
 0x233   :  { %2903 = vmatprep.mubr.bf16.mxu1 %v6588_v10  ;;  %2969 = vmatpush1.bf16.msra.mxu1 %v5442_v11  ;;  %v5538_v11 = vcombine.low %v1972_v3, %v1976_v4 }
 0x234   :  { %2970 = vmatprep.subr.bf16.mxu1 %v5451_v12  ;;  %v5547_v12 = vcombine.high %v1980_v7, %v1984_v8  ;;  %v8885_v7 = vunpack.c.l.bf16 %v6772_v59 }
 0x237   :  { %2971 = vmatpush1.bf16.msra.mxu1 %v5450_v15 }
 0x238   :  { %2972 = vmatprep.subr.bf16.mxu1 %v5459_v16 }
 0x23a   :  { %2904 = vmatmul.mubr.bf16.gmra.mrb[104].mxu1 %v6586_v9 }
 0x23b   :  { %2913 = vmatprep.mubr.bf16.mxu1 %v6594_v38  ;;  %2973 = vmatpush1.bf16.msra.mxu1 %v5458_v19 }
 0x23c   :  { %2974 = vmatprep.subr.bf16.mxu1 %v5467_v20 }
 0x23f   :  { %2975 = vmatpush1.bf16.msra.mxu1 %v5466_v25 }
 0x240   :  { %2976 = vmatprep.subr.bf16.mxu1 %v5475_v26 }
 0x242   :  { %2914 = vmatmul.mubr.bf16.gmra.mrb[108].mxu1 %v6592_v37 }
 0x243   :  { %2923 = vmatprep.mubr.bf16.mxu1 %v6600_v2  ;;  %2977 = vmatpush1.bf16.msra.mxu1 %v5474_v33 }
 0x244   :  { %2978 = vmatprep.subr.bf16.mxu1 %v5483_v34 }
 0x247   :  { %2979 = vmatpush1.bf16.msra.mxu1 %v5482_v39 }
 0x248   :  { %2980 = vmatprep.subr.bf16.mxu1 %v5491_v40 }
 0x24a   :  { %2924 = vmatmul.mubr.bf16.gmra.mrb[112].mxu1 %v6598_v1 }
 0x24b   :  { %2933 = vmatprep.mubr.bf16.mxu1 %v6606_v32  ;;  %2981 = vmatpush1.bf16.msra.mxu1 %v5490_v43 }
 0x24c   :  { %2982 = vmatprep.subr.bf16.mxu1 %v5499_v44 }
 0x24f   :  { %2983 = vmatpush1.bf16.msra.mxu1 %v5498_v49 }
 0x250   :  { %2984 = vmatprep.subr.bf16.mxu1 %v5507_v50 }
 0x252   :  { %2934 = vmatmul.mubr.bf16.gmra.mrb[116].mxu1 %v6604_v31 }
 0x253   :  { %2943 = vmatprep.mubr.bf16.mxu1 %v6612_v62  ;;  %2985 = vmatpush1.bf16.msra.mxu1 %v5506_v53 }
 0x254   :  { %2986 = vmatprep.subr.bf16.mxu1 %v5515_v54 }
 0x257   :  { %2987 = vmatpush1.bf16.msra.mxu1 %v5514_v57 }
 0x258   :  { %2988 = vmatprep.subr.bf16.mxu1 %v5523_v58 }
 0x25a   :  { %2944 = vmatmul.mubr.bf16.gmra.mrb[120].mxu1 %v6610_v61 }
 0x25b   :  { %2953 = vmatprep.mubr.bf16.mxu1 %v6618_v30  ;;  %2989 = vmatpush1.bf16.msra.mxu1 %v5522_v63  ;;  %v6790_v63 = vld [vmem:[#allocation3 + $0x80] sm:$0xff] }
 0x25c   :  { %2990 = vmatprep.subr.bf16.mxu1 %v5531_v0  ;;  %v6776_v0 = vld [vmem:[#allocation3 + $0x20] sm:$0xff] }
 0x25f   :  { %2991 = vmatpush1.bf16.msra.mxu1 %v5530_v5 }
 0x260   :  { %2992 = vmatprep.subr.bf16.mxu1 %v5539_v6  ;;  %v6782_v6 = vld [vmem:[#allocation3 + $0x40] sm:$0xff] }
 0x262   :  { %2954 = vmatmul.mubr.bf16.gmra.mrb[124].mxu1 %v6616_v29 }
 0x263   :  { %2993 = vmatpush1.bf16.msra.mxu1 %v5538_v11  ;;  %2996 = vmatprep.mubr.bf16.mxu1 %v6576_v23  ;;  %v6786_v11 = vld [vmem:[#allocation3 + $0x60] sm:$0xff] }
 0x264   :  { %2994 = vmatprep.subr.bf16.mxu1 %v5547_v12 }
 0x267   :  { %2995 = vmatpush1.bf16.msra.mxu1 %v5546_v13 }
 0x26a   :  { %2997 = vmatmul.mubr.bf16.vlgmr.msra.gmra.mrb[128].mxu1 %v6574_v22 }
 0x26b   :  { %3006 = vmatprep.mubr.bf16.mxu1 %v6582_v48 }
 0x272   :  { %3007 = vmatmul.mubr.bf16.gmra.mrb[132].mxu1 %v6580_v47 }
 0x273   :  { %3016 = vmatprep.mubr.bf16.mxu1 %v6588_v10 }
 0x27a   :  { %3017 = vmatmul.mubr.bf16.gmra.mrb[136].mxu1 %v6586_v9 }
 0x27b   :  { %3026 = vmatprep.mubr.bf16.mxu1 %v6594_v38 }
 0x27d   :  { %v6661_v14 = vpop.f32.mrb[32].mxu1 }
 0x27e   :  { %v6663_v15 = vpop.f32.mrb[33].mxu1  ;;  %v3077_v3 = vmax.f32 %v6661_v14, 0.0  ;;  %v8890_v14 = vunpack.c.l.bf16 %v6776_v0 }
 0x27f   :  { %v6665_v23 = vpop.f32.mrb[34].mxu1 }
 0x280   :  { %v6667_v16 = vpop.f32.mrb[35].mxu1  ;;  %v3085_v5 = vmax.f32 %v6665_v23, 0.0  ;;  %v8887_v23 = vunpack.c.h.bf16 %v6772_v59  ;;  %v6956_v59 = vld [vmem:[#allocation3 + $0x10] sm:$0xff] }
 0x281   :  { %v3086_v8 = vmax.f32 %v6667_v16, 0.0 }
 0x282   :  { %3027 = vmatmul.mubr.bf16.gmra.mrb[140].mxu1 %v6592_v37 }
 0x283   :  { %3036 = vmatprep.mubr.bf16.mxu1 %v6600_v2 }
 0x285   :  { %v6671_v22 = vpop.f32.mrb[36].mxu1 }
 0x286   :  { %v6673_v47 = vpop.f32.mrb[37].mxu1  ;;  %v3093_v12 = vmax.f32 %v6671_v22, 0.0 }
 0x287   :  { %v6675_v48 = vpop.f32.mrb[38].mxu1  ;;  %v3094_v13 = vmax.f32 %v6673_v47, 0.0 }
 0x288   :  { %v6677_v9 = vpop.f32.mrb[39].mxu1 }
 0x289   :  { %v3102_v22 = vmax.f32 %v6677_v9, 0.0 }
 0x28a   :  { %3037 = vmatmul.mubr.bf16.gmra.mrb[144].mxu1 %v6598_v1 }
 0x28b   :  { %3046 = vmatprep.mubr.bf16.mxu1 %v6606_v32 }
 0x28d   :  { %v6681_v10 = vpop.f32.mrb[40].mxu1 }
 0x28e   :  { %v6683_v38 = vpop.f32.mrb[41].mxu1 }
 0x28f   :  { %v6685_v17 = vpop.f32.mrb[42].mxu1 }
 0x290   :  { %v6687_v37 = vpop.f32.mrb[43].mxu1 }
 0x292   :  { %3047 = vmatmul.mubr.bf16.gmra.mrb[148].mxu1 %v6604_v31 }
 0x293   :  { %3056 = vmatprep.mubr.bf16.mxu1 %v6612_v62 }
 0x295   :  { %v6691_v2 = vpop.f32.mrb[44].mxu1 }
 0x296   :  { %v6693_v18 = vpop.f32.mrb[45].mxu1 }
 0x297   :  { %v6695_v19 = vpop.f32.mrb[46].mxu1 }
 0x298   :  { %v6697_v1 = vpop.f32.mrb[47].mxu1 }
 0x29a   :  { %3057 = vmatmul.mubr.bf16.gmra.mrb[152].mxu1 %v6610_v61 }
 0x29b   :  { %3066 = vmatprep.mubr.bf16.mxu1 %v6618_v30 }
 0x29d   :  { %v6701_v32 = vpop.f32.mrb[48].mxu1 }
 0x29e   :  { %v6703_v20 = vpop.f32.mrb[49].mxu1 }
 0x29f   :  { %v6705_v21 = vpop.f32.mrb[50].mxu1 }
 0x2a0   :  { %v6707_v31 = vpop.f32.mrb[51].mxu1 }
 0x2a2   :  { %3067 = vmatmul.mubr.bf16.gmra.mrb[156].mxu1 %v6616_v29 }
 0x2a5   :  { %v6710_v62 = vpop.f32.mrb[52].mxu1 }
 0x2a6   :  { %v6712_v24 = vpop.f32.mrb[53].mxu1 }
 0x2a7   :  { %v6714_v25 = vpop.f32.mrb[54].mxu1 }
 0x2a8   :  { %v6716_v26 = vpop.f32.mrb[55].mxu1 }
 0x2ad   :  { %v6718_v61 = vpop.f32.mrb[56].mxu1 }
 0x2ae   :  { %v6720_v30 = vpop.f32.mrb[57].mxu1 }
 0x2af   :  { %v6722_v27 = vpop.f32.mrb[58].mxu1 }
 0x2b0   :  { %v6724_v28 = vpop.f32.mrb[59].mxu1 }
 0x2b5   :  { %v6726_v33 = vpop.f32.mrb[60].mxu1 }
 0x2b6   :  { %v6728_v34 = vpop.f32.mrb[61].mxu1 }
 0x2b7   :  { %v6730_v29 = vpop.f32.mrb[62].mxu1 }
 0x2b8   :  { %v6732_v35 = vpop.f32.mrb[63].mxu1 }
 0x2bd   :  { %v6734_v36 = vpop.f32.mrb[64].mxu1 }
 0x2be   :  { %v6736_v39 = vpop.f32.mrb[65].mxu1 }
 0x2bf   :  { %v6738_v40 = vpop.f32.mrb[66].mxu1 }
 0x2c0   :  { %v6740_v41 = vpop.f32.mrb[67].mxu1 }
 0x2c1   :  { %8850 = vst [vmem:[#allocation16_spill] sm:$0xff] %v6740_v41  ;;  %v6854_v41 = vld [vmem:[#allocation3 + $0x48] sm:$0xff] }
 0x2c2   :  { %8872 = vst [vmem:[#allocation38_spill] sm:$0xff] %v6854_v41  ;;  %v6874_v41 = vld [vmem:[#allocation3 + $0xe8] sm:$0xff] }
 0x2c3   :  { %8877 = vst [vmem:[#allocation43_spill] sm:$0xff] %v6874_v41  ;;  %v6896_v41 = vld [vmem:[#allocation3 + $0x168] sm:$0xff] }
 0x2c4   :  { %8882 = vst [vmem:[#allocation48_spill] sm:$0xff] %v6896_v41  ;;  %v6925_v41 = vadd.f32 %v3085_v5, %v8890_v14  ;;  %v8900_v5 = vunpack.c.l.bf16 %v6786_v11 }
 0x2c5   :  { %v6742_v42 = vpop.f32.mrb[68].mxu1 }
 0x2c6   :  { %8851 = vst [vmem:[#allocation17_spill] sm:$0xff] %v6742_v42  ;;  %v6744_v43 = vpop.f32.mrb[69].mxu1  ;;  %v6866_v42 = vld [vmem:[#allocation3 + $0xa8] sm:$0xff]  ;;  %8891 = vst [vmem:[#allocation54_spill] sm:$0xff] %v6925_v41 }
 0x2c7   :  { %8852 = vst [vmem:[#allocation18_spill] sm:$0xff] %v6744_v43  ;;  %v6746_v44 = vpop.f32.mrb[70].mxu1  ;;  %8875 = vst [vmem:[#allocation41_spill] sm:$0xff] %v6866_v42 }
 0x2c8   :  { %8853 = vst [vmem:[#allocation19_spill] sm:$0xff] %v6746_v44  ;;  %v6748_v45 = vpop.f32.mrb[71].mxu1  ;;  %v6862_v44 = vld [vmem:[#allocation3 + $0x88] sm:$0xff] }
 0x2c9   :  { %8854 = vst [vmem:[#allocation20_spill] sm:$0xff] %v6748_v45  ;;  %v6844_v45 = vld [vmem:[#allocation3 + $0x8] sm:$0xff]  ;;  %8874 = vst [vmem:[#allocation40_spill] sm:$0xff] %v6862_v44  ;;  %v6911_v44 = vadd.f32 %v3077_v3, %v8885_v7  ;;  %v3109_v7 = vmax.f32 %v6681_v10, 0.0 }
 0x2cb   :  { %8886 = vst [vmem:[#allocation51_spill] sm:$0xff] %v6911_v44  ;;  %v3333_v9 = vmul.f32 %v6911_v44, %v6911_v44 }
 0x2cd   :  { %v6750_v46 = vpop.f32.mrb[72].mxu1 }
 0x2ce   :  { %8855 = vst [vmem:[#allocation21_spill] sm:$0xff] %v6750_v46  ;;  %v6752_v49 = vpop.f32.mrb[73].mxu1 }
 0x2cf   :  { %8856 = vst [vmem:[#allocation22_spill] sm:$0xff] %v6752_v49  ;;  %v6754_v50 = vpop.f32.mrb[74].mxu1 }
 0x2d0   :  { %8857 = vst [vmem:[#allocation23_spill] sm:$0xff] %v6754_v50  ;;  %v6756_v51 = vpop.f32.mrb[75].mxu1  ;;  %v6834_v50 = vld [vmem:[#allocation3 + $0x1c0] sm:$0xff] }
 0x2d1   :  { %8858 = vst [vmem:[#allocation24_spill] sm:$0xff] %v6756_v51  ;;  %v6828_v51 = vld [vmem:[#allocation3 + $0x1a0] sm:$0xff] }
 0x2d5   :  { %v6758_v52 = vpop.f32.mrb[76].mxu1 }
 0x2d6   :  { %8859 = vst [vmem:[#allocation25_spill] sm:$0xff] %v6758_v52  ;;  %v6760_v53 = vpop.f32.mrb[77].mxu1 }
 0x2d7   :  { %8860 = vst [vmem:[#allocation26_spill] sm:$0xff] %v6760_v53  ;;  %v6762_v54 = vpop.f32.mrb[78].mxu1  ;;  %v6814_v53 = vld [vmem:[#allocation3 + $0x140] sm:$0xff] }
 0x2d8   :  { %8861 = vst [vmem:[#allocation27_spill] sm:$0xff] %v6762_v54  ;;  %v6764_v55 = vpop.f32.mrb[79].mxu1  ;;  %v6818_v54 = vld [vmem:[#allocation3 + $0x160] sm:$0xff] }
 0x2d9   :  { %8862 = vst [vmem:[#allocation28_spill] sm:$0xff] %v6764_v55  ;;  %v6806_v55 = vld [vmem:[#allocation3 + $0x100] sm:$0xff] }
 0x2dd   :  { %v6766_v56 = vpop.f32.mrb[80].mxu1 }
 0x2de   :  { %8863 = vst [vmem:[#allocation29_spill] sm:$0xff] %v6766_v56  ;;  %v6768_v57 = vpop.f32.mrb[81].mxu1  ;;  %v6810_v56 = vld [vmem:[#allocation3 + $0x120] sm:$0xff] }
 0x2df   :  { %8864 = vst [vmem:[#allocation30_spill] sm:$0xff] %v6768_v57  ;;  %v6770_v58 = vpop.f32.mrb[82].mxu1  ;;  %v6798_v57 = vld [vmem:[#allocation3 + $0xc0] sm:$0xff] }
 0x2e0   :  { %8865 = vst [vmem:[#allocation31_spill] sm:$0xff] %v6770_v58  ;;  %v6779_v4 = vpop.f32.mrb[83].mxu1  ;;  %v6802_v58 = vld [vmem:[#allocation3 + $0xe0] sm:$0xff] }
 0x2e1   :  { %8866 = vst [vmem:[#allocation32_spill] sm:$0xff] %v6779_v4  ;;  %v6794_v4 = vld [vmem:[#allocation3 + $0xa0] sm:$0xff] }
 0x2e5   :  { %v6821_v52 = vpop.f32.mrb[84].mxu1 }
 0x2e6   :  { %8867 = vst [vmem:[#allocation33_spill] sm:$0xff] %v6821_v52  ;;  %v6831_v49 = vpop.f32.mrb[85].mxu1  ;;  %v6838_v52 = vld [vmem:[#allocation3 + $0x1e0] sm:$0xff] }
 0x2e7   :  { %8868 = vst [vmem:[#allocation34_spill] sm:$0xff] %v6831_v49  ;;  %v6841_v46 = vpop.f32.mrb[86].mxu1  ;;  %v6848_v49 = vld [vmem:[#allocation3 + $0x28] sm:$0xff] }
 0x2e8   :  { %8869 = vst [vmem:[#allocation35_spill] sm:$0xff] %v6841_v46  ;;  %8870 = vst [vmem:[#allocation36_spill] sm:$0xff] %v6848_v49  ;;  %v6851_v43 = vpop.f32.mrb[87].mxu1  ;;  %v6858_v46 = vld [vmem:[#allocation3 + $0x68] sm:$0xff] }
 0x2e9   :  { %8871 = vst [vmem:[#allocation37_spill] sm:$0xff] %v6851_v43  ;;  %8873 = vst [vmem:[#allocation39_spill] sm:$0xff] %v6858_v46  ;;  %v6870_v49 = vld [vmem:[#allocation3 + $0xc8] sm:$0xff]  ;;  %v3078_v43 = vmax.f32 %v6663_v15, 0.0 }
 0x2ea   :  { %8876 = vst [vmem:[#allocation42_spill] sm:$0xff] %v6870_v49  ;;  %v6880_v46 = vld [vmem:[#allocation3 + $0x108] sm:$0xff] }
 0x2eb   :  { %8878 = vst [vmem:[#allocation44_spill] sm:$0xff] %v6880_v46  ;;  %v6886_v49 = vld [vmem:[#allocation3 + $0x128] sm:$0xff] }
 0x2ec   :  { %8879 = vst [vmem:[#allocation45_spill] sm:$0xff] %v6886_v49  ;;  %v6892_v15 = vld [vmem:[#allocation3 + $0x148] sm:$0xff] }
 0x2ed   :  { %v6889_v42 = vpop.f32.mrb[88].mxu1  ;;  %8881 = vst [vmem:[#allocation47_spill] sm:$0xff] %v6892_v15  ;;  %v6904_v46 = vld [vmem:[#allocation3 + $0x188] sm:$0xff]  ;;  %v6915_v15 = vadd.f32 %v3078_v43, %v8887_v23  ;;  %v3101_v23 = vmax.f32 %v6675_v48, 0.0  ;;  %v3110_v48 = vmax.f32 %v6683_v38, 0.0 }
 0x2ee   :  { %8880 = vst [vmem:[#allocation46_spill] sm:$0xff] %v6889_v42  ;;  %v6899_v16 = vpop.f32.mrb[89].mxu1  ;;  %v6932_v43 = vld [vmem:[#allocation3 + $0x1c8] sm:$0xff] }
 0x2ef   :  { %8883 = vst [vmem:[#allocation49_spill] sm:$0xff] %v6899_v16  ;;  %v6907_v49 = vpop.f32.mrb[90].mxu1  ;;  %8888 = vst [vmem:[#allocation52_spill] sm:$0xff] %v6915_v15  ;;  %v6918_v16 = vld [vmem:[#allocation3 + $0x1a8] sm:$0xff]  ;;  %v3334_v47 = vmul.f32 %v6915_v15, %v6915_v15  ;;  %v6971_v44 = vadd.f32 %v3101_v23, %v8900_v5 }
 0x2f0   :  { %8884 = vst [vmem:[#allocation50_spill] sm:$0xff] %v6907_v49  ;;  %v6921_v42 = vpop.f32.mrb[91].mxu1  ;;  %v8892_v49 = vunpack.c.h.bf16 %v6776_v0  ;;  %8894 = vst [vmem:[#allocation56_spill] sm:$0xff] %v6932_v43  ;;  %v8896_v0 = vunpack.c.l.bf16 %v6782_v6  ;;  %v8905_v43 = vunpack.c.l.bf16 %v6790_v63 }
 0x2f1   :  { %8889 = vst [vmem:[#allocation53_spill] sm:$0xff] %v6921_v42  ;;  %v6938_v42 = vld [vmem:[#allocation3 + $0x1e8] sm:$0xff]  ;;  %8901 = vst [vmem:[#allocation60_spill] sm:$0xff] %v6971_v44 }
 0x2f2   :  { %v6929_v3 = vadd.f32 %v3086_v8, %v8892_v49  ;;  %8895 = vst [vmem:[#allocation57_spill] sm:$0xff] %v6938_v42  ;;  %v6943_v49 = vadd.f32 %v3093_v12, %v8896_v0  ;;  %v8898_v8 = vunpack.c.h.bf16 %v6782_v6  ;;  %v3341_v6 = vmul.f32 %v6925_v41, %v6925_v41  ;;  %v6966_v0 = vld [vmem:[#allocation3 + $0x30] sm:$0xff] }
 0x2f3   :  { %v8902_v12 = vunpack.c.h.bf16 %v6786_v11  ;;  %v3117_v41 = vmax.f32 %v6685_v17, 0.0  ;;  %v6987_v23 = vadd.f32 %v3109_v7, %v8905_v43  ;;  %v8907_v11 = vunpack.c.h.bf16 %v6790_v63  ;;  %v7004_v43 = vld [vmem:[#allocation3 + $0x50] sm:$0xff] }
 0x2f4   :  { %8893 = vst [vmem:[#allocation55_spill] sm:$0xff] %v6929_v3  ;;  %8897 = vst [vmem:[#allocation58_spill] sm:$0xff] %v6943_v49  ;;  %v6947_v14 = vadd.f32 %v3094_v13, %v8898_v8  ;;  %v3342_v10 = vmul.f32 %v6929_v3, %v6929_v3  ;;  %v3118_v3 = vmax.f32 %v6687_v37, 0.0  ;;  %v3349_v38 = vmul.f32 %v6943_v49, %v6943_v49 }
 0x2f5   :  { %v6963_v13 = vpop.f32.mrb[92].mxu1  ;;  %v6975_v15 = vadd.f32 %v3102_v22, %v8902_v12  ;;  %8906 = vst [vmem:[#allocation63_spill] sm:$0xff] %v6987_v23  ;;  %v6991_v22 = vadd.f32 %v3110_v48, %v8907_v11  ;;  %v6995_v17 = vadd.f32 %v3334_v47, %v3333_v9  ;;  %v3125_v37 = vmax.f32 %v6691_v2, 0.0  ;;  %v7008_v48 = vld [vmem:[#allocation3 + $0x70] sm:$0xff] }
 0x2f6   :  { %8899 = vst [vmem:[#allocation59_spill] sm:$0xff] %v6947_v14  ;;  %v6979_v42 = vpop.f32.mrb[93].mxu1  ;;  %v3350_v8 = vmul.f32 %v6947_v14, %v6947_v14  ;;  %v3126_v12 = vmax.f32 %v6693_v18, 0.0  ;;  %v3357_v2 = vmul.f32 %v6971_v44, %v6971_v44  ;;  %v8909_v9 = vunpack.c.l.bf16 %v6794_v4 }
 0x2f7   :  { %8903 = vst [vmem:[#allocation61_spill] sm:$0xff] %v6975_v15  ;;  %8904 = vst [vmem:[#allocation62_spill] sm:$0xff] %v6979_v42  ;;  %v6993_v5 = vpop.f32.mrb[94].mxu1  ;;  %v7002_v42 = vadd.f32 %v3342_v10, %v3341_v6  ;;  %v3358_v18 = vmul.f32 %v6975_v15, %v6975_v15  ;;  %v8911_v10 = vunpack.c.h.bf16 %v6794_v4  ;;  %v3365_v7 = vmul.f32 %v6987_v23, %v6987_v23 }
 0x2f8   :  { %8908 = vst [vmem:[#allocation64_spill] sm:$0xff] %v6991_v22  ;;  %v6999_v49 = vpop.f32.mrb[95].mxu1  ;;  %v7017_v6 = vadd.f32 %v3117_v41, %v8909_v9  ;;  %v7023_v63 = vadd.f32 %v3350_v8, %v3349_v38  ;;  %v3366_v47 = vmul.f32 %v6991_v22, %v6991_v22  ;;  %v8913_v44 = vunpack.c.l.bf16 %v6798_v57 }
 0x2f9   :  { %v7021_v11 = vadd.f32 %v3118_v3, %v8911_v10  ;;  %v8915_v41 = vunpack.c.h.bf16 %v6798_v57  ;;  %v3133_v4 = vmax.f32 %v6695_v19, 0.0  ;;  %v3134_v3 = vmax.f32 %v6697_v1, 0.0  ;;  %v7054_v1 = vld [vmem:[#allocation3 + $0x90] sm:$0xff] }
 0x2fa   :  { %8910 = vst [vmem:[#allocation65_spill] sm:$0xff] %v7017_v6  ;;  %v7032_v15 = vadd.f32 %v3125_v37, %v8913_v44  ;;  %v3141_v38 = vmax.f32 %v6701_v32, 0.0  ;;  %v3142_v8 = vmax.f32 %v6703_v20, 0.0  ;;  %v3149_v10 = vmax.f32 %v6705_v21, 0.0  ;;  %8917 = vst [vmem:[#allocation69_spill] sm:$0xff] %v7054_v1 }
 0x2fb   :  { %8912 = vst [vmem:[#allocation66_spill] sm:$0xff] %v7021_v11  ;;  %v7036_v9 = vadd.f32 %v3126_v12, %v8915_v41  ;;  %v3150_v14 = vmax.f32 %v6707_v31, 0.0  ;;  %v7046_v44 = vadd.f32 %v3358_v18, %v3357_v2  ;;  %v3373_v57 = vmul.f32 %v7017_v6, %v7017_v6  ;;  %v7062_v12 = vld [vmem:[#allocation3 + $0xb0] sm:$0xff] }
 0x2fc   :  { %8914 = vst [vmem:[#allocation67_spill] sm:$0xff] %v7032_v15  ;;  %v3374_v19 = vmul.f32 %v7021_v11, %v7021_v11  ;;  %v7057_v20 = vadd.f32 %v3366_v47, %v3365_v7  ;;  %8918 = vst [vmem:[#allocation70_spill] sm:$0xff] %v7062_v12  ;;  %v3381_v41 = vmul.f32 %v7032_v15, %v7032_v15  ;;  %v8919_v32 = vunpack.c.l.bf16 %v6802_v58 }
 0x2fd   :  { %8916 = vst [vmem:[#allocation68_spill] sm:$0xff] %v7036_v9  ;;  %v7044_v23 = vpop.f32.mrb[96].mxu1  ;;  %v3382_v6 = vmul.f32 %v7036_v9, %v7036_v9  ;;  %v8921_v47 = vunpack.c.h.bf16 %v6802_v58  ;;  %v8923_v2 = vunpack.c.l.bf16 %v6806_v55  ;;  %v8925_v18 = vunpack.c.h.bf16 %v6806_v55 }
 0x2fe   :  { %v7052_v37 = vpop.f32.mrb[97].mxu1  ;;  %v7072_v7 = vadd.f32 %v3133_v4, %v8919_v32  ;;  %v8927_v9 = vunpack.c.l.bf16 %v6810_v56  ;;  %v8929_v4 = vunpack.c.h.bf16 %v6810_v56  ;;  %v7096_v58 = vadd.f32 %v3374_v19, %v3373_v57  ;;  %v6076_v57 = vld [vmem:[#allocation9 + $0x14] ss:$8 sps:$4 sm:$0xff]  }
 0x2ff   :  { %v7059_v21 = vpop.f32.mrb[98].mxu1  ;;  %v7076_v11 = vadd.f32 %v3134_v3, %v8921_v47  ;;  %v7082_v22 = vadd.f32 %v3141_v38, %v8923_v2  ;;  %v7086_v15 = vadd.f32 %v3142_v8, %v8925_v18  ;;  %v3157_v3 = vmax.f32 %v6710_v62, 0.0  ;;  %v7100_v38 = vld [vmem:[#allocation3 + $0xd0] sm:$0xff]  ;;  %v6071_v8 = vld [vmem:[#allocation9] ss:$8 sps:$4 sm:$0xff]  }
 0x300   :  { %8920 = vst [vmem:[#allocation71_spill] sm:$0xff] %v7072_v7  ;;  %v7078_v31 = vpop.f32.mrb[99].mxu1  ;;  %v7090_v12 = vadd.f32 %v3149_v10, %v8927_v9  ;;  %v7094_v32 = vadd.f32 %v3150_v14, %v8929_v4  ;;  %v3158_v47 = vmax.f32 %v6712_v24, 0.0  ;;  %8931 = vst [vmem:[#allocation77_spill] sm:$0xff] %v7100_v38  ;;  %v6073_v2 = vld [vmem:[#allocation9 + $0x4] ss:$8 sps:$4 sm:$0xff]   ;;  %v7109_v62 = vadd.f32 %v3382_v6, %v3381_v41 }
 0x301   :  { %8922 = vst [vmem:[#allocation72_spill] sm:$0xff] %v7076_v11  ;;  %8924 = vst [vmem:[#allocation73_spill] sm:$0xff] %v7082_v22  ;;  %v3165_v18 = vmax.f32 %v6714_v25, 0.0  ;;  %v3166_v9 = vmax.f32 %v6716_v26, 0.0  ;;  %v7106_v14 = vld [vmem:[#allocation3 + $0xf0] sm:$0xff]  ;;  %v3389_v24 = vmul.f32 %v7072_v7, %v7072_v7  ;;  %v3390_v19 = vmul.f32 %v7076_v11, %v7076_v11  ;;  %4725 = vmatprep.subr.bf16.mxu0 %v6073_v2 }
 0x302   :  { %8926 = vst [vmem:[#allocation74_spill] sm:$0xff] %v7086_v15  ;;  %8928 = vst [vmem:[#allocation75_spill] sm:$0xff] %v7090_v12  ;;  %v3397_v25 = vmul.f32 %v7082_v22, %v7082_v22  ;;  %v3398_v26 = vmul.f32 %v7086_v15, %v7086_v15  ;;  %v3405_v56 = vmul.f32 %v7090_v12, %v7090_v12  ;;  %4726 = vmatpush1.bf16.msra.mxu0 %v6071_v8  ;;  %v6074_v10 = vld [vmem:[#allocation9 + $0x10] ss:$8 sps:$4 sm:$0xff]  }
 0x303   :  { %8930 = vst [vmem:[#allocation76_spill] sm:$0xff] %v7094_v32  ;;  %8932 = vst [vmem:[#allocation78_spill] sm:$0xff] %v7106_v14  ;;  %v3406_v6 = vmul.f32 %v7094_v32, %v7094_v32  ;;  %v8933_v55 = vunpack.c.l.bf16 %v6814_v53  ;;  %v8935_v2 = vunpack.c.h.bf16 %v6814_v53  ;;  %v3173_v15 = vmax.f32 %v6718_v61, 0.0  ;;  %4727 = vmatprep.subr.bf16.mxu0 %v6076_v57  ;;  %v6079_v32 = vld [vmem:[#allocation9 + $0x24] ss:$8 sps:$4 sm:$0xff]   ;;  %v7154_v57 = vld [vmem:[#allocation3 + $0x110] sm:$0xff] }
 0x304   :  { %v3174_v7 = vmax.f32 %v6720_v30, 0.0  ;;  %v8937_v11 = vunpack.c.l.bf16 %v6818_v54  ;;  %v8939_v14 = vunpack.c.h.bf16 %v6818_v54  ;;  %v3181_v53 = vmax.f32 %v6722_v27, 0.0  ;;  %8941 = vst [vmem:[#allocation83_spill] sm:$0xff] %v7154_v57 }
 0x305   :  { %v7124_v41 = vpop.f32.mrb[100].mxu1  ;;  %v7128_v4 = vadd.f32 %v3157_v3, %v8933_v55  ;;  %v7132_v22 = vadd.f32 %v3158_v47, %v8935_v2  ;;  %v3182_v47 = vmax.f32 %v6724_v28, 0.0  ;;  %v7150_v61 = vadd.f32 %v3390_v19, %v3389_v24  ;;  %v6077_v19 = vld [vmem:[#allocation9 + $0x20] ss:$8 sps:$4 sm:$0xff]  }
 0x306   :  { %v7136_v12 = vpop.f32.mrb[101].mxu1  ;;  %v7140_v8 = vadd.f32 %v3165_v18, %v8937_v11  ;;  %v7144_v3 = vadd.f32 %v3166_v9, %v8939_v14  ;;  %v7158_v18 = vld [vmem:[#allocation3 + $0x130] sm:$0xff]  ;;  %v7161_v9 = vadd.f32 %v3398_v26, %v3397_v25  ;;  %v7163_v27 = vadd.f32 %v3406_v6, %v3405_v56  ;;  %4728 = vmatpush1.bf16.msra.mxu0 %v6074_v10 }
 0x307   :  { %8934 = vst [vmem:[#allocation79_spill] sm:$0xff] %v7128_v4  ;;  %8936 = vst [vmem:[#allocation80_spill] sm:$0xff] %v7132_v22  ;;  %v7148_v55 = vpop.f32.mrb[102].mxu1  ;;  %v7166_v14 = vld [vmem:[#allocation3 + $0x150] sm:$0xff]  ;;  %v3413_v2 = vmul.f32 %v7128_v4, %v7128_v4  ;;  %v3414_v11 = vmul.f32 %v7132_v22, %v7132_v22  ;;  %v8944_v54 = vunpack.c.l.bf16 %v6824_v60  ;;  %v8946_v56 = vunpack.c.h.bf16 %v6824_v60  ;;  %4729 = vmatprep.subr.bf16.mxu0 %v6079_v32 }
 0x308   :  { %8938 = vst [vmem:[#allocation81_spill] sm:$0xff] %v7140_v8  ;;  %8940 = vst [vmem:[#allocation82_spill] sm:$0xff] %v7144_v3  ;;  %v7152_v30 = vpop.f32.mrb[103].mxu1  ;;  %v6082_v6 = vld [vmem:[#allocation9 + $0x34] ss:$8 sps:$4 sm:$0xff]   ;;  %v3421_v10 = vmul.f32 %v7140_v8, %v7140_v8  ;;  %v3422_v24 = vmul.f32 %v7144_v3, %v7144_v3  ;;  %v8948_v28 = vunpack.c.l.bf16 %v6828_v51  ;;  %v8950_v22 = vunpack.c.h.bf16 %v6828_v51 }
 0x309   :  { %8942 = vst [vmem:[#allocation84_spill] sm:$0xff] %v7158_v18  ;;  %8943 = vst [vmem:[#allocation85_spill] sm:$0xff] %v7166_v14  ;;  %v7175_v25 = vadd.f32 %v3173_v15, %v8944_v54  ;;  %v7179_v26 = vadd.f32 %v3174_v7, %v8946_v56  ;;  %v3189_v60 = vmax.f32 %v6726_v33, 0.0  ;;  %v3190_v7 = vmax.f32 %v6728_v34, 0.0  ;;  %v6080_v33 = vld [vmem:[#allocation9 + $0x30] ss:$8 sps:$4 sm:$0xff]  }
 0x30a   :  { %v7187_v4 = vadd.f32 %v3181_v53, %v8948_v28  ;;  %v7191_v15 = vadd.f32 %v3182_v47, %v8950_v22  ;;  %v3197_v32 = vmax.f32 %v6730_v29, 0.0  ;;  %v3198_v54 = vmax.f32 %v6732_v35, 0.0  ;;  %v7201_v53 = vld [vmem:[#allocation3 + $0x170] sm:$0xff]  ;;  %4730 = vmatpush1.bf16.msra.mxu0 %v6077_v19  ;;  %v6085_v3 = vld [vmem:[#allocation9 + $0x44] ss:$8 sps:$4 sm:$0xff]  }
 0x30b   :  { %8945 = vst [vmem:[#allocation86_spill] sm:$0xff] %v7175_v25  ;;  %8947 = vst [vmem:[#allocation87_spill] sm:$0xff] %v7179_v26  ;;  %v3079_v56 = vmax.f32 %v6734_v36, 0.0  ;;  %v7205_v47 = vadd.f32 %v3414_v11, %v3413_v2  ;;  %v3429_v34 = vmul.f32 %v7175_v25, %v7175_v25  ;;  %v3430_v29 = vmul.f32 %v7179_v26, %v7179_v26  ;;  %v7213_v36 = vld [vmem:[#allocation3 + $0x190] sm:$0xff] }
 0x30c   :  { %8949 = vst [vmem:[#allocation88_spill] sm:$0xff] %v7187_v4  ;;  %8951 = vst [vmem:[#allocation89_spill] sm:$0xff] %v7191_v15  ;;  %4731 = vmatprep.subr.bf16.mxu0 %v6082_v6  ;;  %v7216_v51 = vadd.f32 %v3422_v24, %v3421_v10  ;;  %v3437_v2 = vmul.f32 %v7187_v4, %v7187_v4  ;;  %v3438_v11 = vmul.f32 %v7191_v15, %v7191_v15 }
 0x30d   :  { %v7198_v8 = vpop.f32.mrb[104].mxu1  ;;  %8952 = vst [vmem:[#allocation90_spill] sm:$0xff] %v7201_v53  ;;  %8953 = vst [vmem:[#allocation91_spill] sm:$0xff] %v7213_v36  ;;  %v3087_v19 = vmax.f32 %v6738_v40, 0.0  ;;  %v8955_v25 = vunpack.c.l.bf16 %v6834_v50  ;;  %v8957_v28 = vunpack.c.h.bf16 %v6834_v50  ;;  %v8959_v24 = vunpack.c.l.bf16 %v6838_v52  ;;  %v8981_v36 = vld [vmem:[#allocation39_spill] sm:$0xff] }
 0x30e   :  { %v7211_v35 = vpop.f32.mrb[105].mxu1  ;;  %v8961_v4 = vunpack.c.h.bf16 %v6838_v52  ;;  %v8964_v40 = vunpack.c.l.bf16 %v6844_v45  ;;  %4732 = vmatpush1.bf16.msra.mxu0 %v6080_v33  ;;  %v8972_v33 = vld [vmem:[#allocation16_spill] sm:$0xff]  ;;  %v8982_v38 = vunpack.c.l.bf16 %v8981_v36 }
 0x30f   :  { %v7223_v22 = vpop.f32.mrb[106].mxu1  ;;  %v7227_v26 = vadd.f32 %v3189_v60, %v8955_v25  ;;  %v7231_v6 = vadd.f32 %v3190_v7, %v8957_v28  ;;  %v7235_v10 = vadd.f32 %v3197_v32, %v8959_v24  ;;  %v3080_v25 = vmax.f32 %v6736_v39, 0.0  ;;  %v8966_v60 = vld [vmem:[#allocation17_spill] sm:$0xff]  ;;  %v8967_v24 = vld [vmem:[#allocation19_spill] sm:$0xff]  ;;  %4733 = vmatprep.subr.bf16.mxu0 %v6085_v3  ;;  %v8969_v39 = vld [vmem:[#allocation36_spill] sm:$0xff] }
 0x310   :  { %8954 = vst [vmem:[#allocation92_spill] sm:$0xff] %v7223_v22  ;;  %v7239_v53 = vadd.f32 %v3198_v54, %v8961_v4  ;;  %v7241_v15 = vpop.f32.mrb[107].mxu1  ;;  %v7245_v14 = vadd.f32 %v3079_v56, %v8964_v40  ;;  %v3095_v50 = vmax.f32 %v8966_v60, 0.0  ;;  %v6083_v28 = vld [vmem:[#allocation9 + $0x40] ss:$8 sps:$4 sm:$0xff]   ;;  %v7250_v32 = vadd.f32 %v3430_v29, %v3429_v34  ;;  %v7253_v4 = vld [vmem:[#allocation3 + $0x1b0] sm:$0xff] }
 0x311   :  { %8956 = vst [vmem:[#allocation93_spill] sm:$0xff] %v7227_v26  ;;  %8958 = vst [vmem:[#allocation94_spill] sm:$0xff] %v7231_v6  ;;  %v3103_v52 = vmax.f32 %v8967_v24, 0.0  ;;  %v6088_v56 = vld [vmem:[#allocation9 + $0x54] ss:$8 sps:$4 sm:$0xff]   ;;  %v7257_v40 = vadd.f32 %v3438_v11, %v3437_v2  ;;  %v8970_v60 = vunpack.c.l.bf16 %v8969_v39  ;;  %v3088_v7 = vmax.f32 %v8972_v33, 0.0 }
 0x312   :  { %8960 = vst [vmem:[#allocation95_spill] sm:$0xff] %v7235_v10  ;;  %8962 = vst [vmem:[#allocation96_spill] sm:$0xff] %v7239_v53  ;;  %v7264_v34 = vld [vmem:[#allocation3 + $0x1d0] sm:$0xff]  ;;  %v3445_v24 = vmul.f32 %v7227_v26, %v7227_v26  ;;  %v3446_v18 = vmul.f32 %v7231_v6, %v7231_v6  ;;  %v3453_v3 = vmul.f32 %v7235_v10, %v7235_v10  ;;  %4734 = vmatpush1.bf16.msra.mxu0 %v6083_v28  ;;  %v7316_v22 = vld [vmem:[#allocation3 + $0x18] sm:$0xff] }
 0x313   :  { %8963 = vst [vmem:[#allocation97_spill] sm:$0xff] %v7241_v15  ;;  %8965 = vst [vmem:[#allocation98_spill] sm:$0xff] %v7245_v14  ;;  %v7261_v57 = vadd.f32 %v3087_v19, %v8970_v60  ;;  %v3454_v2 = vmul.f32 %v7239_v53, %v7239_v53  ;;  %v3335_v11 = vmul.f32 %v7245_v14, %v7245_v14  ;;  %v8974_v19 = vunpack.c.h.bf16 %v6844_v45  ;;  %v8976_v33 = vld [vmem:[#allocation38_spill] sm:$0xff]  ;;  %v8984_v15 = vld [vmem:[#allocation20_spill] sm:$0xff] }
 0x314   :  { %8968 = vst [vmem:[#allocation17_spill] sm:$0xff] %v7253_v4  ;;  %8973 = vst [vmem:[#allocation36_spill] sm:$0xff] %v7264_v34  ;;  %v8977_v29 = vunpack.c.l.bf16 %v8976_v33  ;;  %v8979_v26 = vld [vmem:[#allocation18_spill] sm:$0xff]  ;;  %v7290_v53 = vadd.f32 %v3103_v52, %v8982_v38  ;;  %v3104_v14 = vmax.f32 %v8984_v15, 0.0  ;;  %4735 = vmatprep.subr.bf16.mxu0 %v6088_v56  ;;  %v8989_v38 = vld [vmem:[#allocation21_spill] sm:$0xff]  ;;  %v7309_v45 = vadd.f32 %v3446_v18, %v3445_v24 }
 0x315   :  { %8971 = vst [vmem:[#allocation19_spill] sm:$0xff] %v7261_v57  ;;  %v7279_v60 = vadd.f32 %v3080_v25, %v8974_v19  ;;  %v3096_v4 = vmax.f32 %v8979_v26, 0.0  ;;  %v7286_v6 = vpop.f32.mrb[108].mxu1  ;;  %v6086_v10 = vld [vmem:[#allocation9 + $0x50] ss:$8 sps:$4 sm:$0xff]   ;;  %v3343_v28 = vmul.f32 %v7261_v57, %v7261_v57  ;;  %v3111_v52 = vmax.f32 %v8989_v38, 0.0 }
 0x316   :  { %v7283_v54 = vadd.f32 %v3095_v50, %v8977_v29  ;;  %8980 = vst [vmem:[#allocation18_spill] sm:$0xff] %v7286_v6  ;;  %8983 = vst [vmem:[#allocation39_spill] sm:$0xff] %v7290_v53  ;;  %v7293_v1 = vpop.f32.mrb[109].mxu1  ;;  %v7296_v25 = vld [vmem:[#allocation3 + $0x1f0] sm:$0xff]  ;;  %v6091_v26 = vld [vmem:[#allocation9 + $0x64] ss:$8 sps:$4 sm:$0xff]   ;;  %v8987_v29 = vunpack.c.h.bf16 %v8969_v39  ;;  %v7311_v34 = vadd.f32 %v3454_v2, %v3453_v3  ;;  %v8994_v18 = vunpack.c.h.bf16 %v8976_v33  ;;  %4736 = vmatpush1.bf16.msra.mxu0 %v6086_v10 }
 0x317   :  { %8975 = vst [vmem:[#allocation16_spill] sm:$0xff] %v7279_v60  ;;  %8985 = vst [vmem:[#allocation20_spill] sm:$0xff] %v7293_v1  ;;  %v7306_v15 = vpop.f32.mrb[110].mxu1  ;;  %v8992_v50 = vld [vmem:[#allocation23_spill] sm:$0xff]  ;;  %v6089_v3 = vld [vmem:[#allocation9 + $0x60] ss:$8 sps:$4 sm:$0xff]   ;;  %v3359_v2 = vmul.f32 %v7290_v53, %v7290_v53  ;;  %4737 = vmatprep.subr.bf16.mxu0 %v6091_v26 }
 0x318   :  { %8978 = vst [vmem:[#allocation38_spill] sm:$0xff] %v7283_v54  ;;  %8986 = vst [vmem:[#allocation99_spill] sm:$0xff] %v7296_v25  ;;  %v7303_v19 = vadd.f32 %v3088_v7, %v8987_v29  ;;  %v3119_v56 = vmax.f32 %v8992_v50, 0.0  ;;  %v7314_v6 = vpop.f32.mrb[111].mxu1  ;;  %v3462_v7 = vadd.f32 %v6995_v17, %v3335_v11  ;;  %v3336_v29 = vmul.f32 %v7279_v60, %v7279_v60  ;;  %v7335_v11 = vld [vmem:[#allocation3 + $0x38] sm:$0xff]  ;;  %v8998_v33 = vld [vmem:[#allocation40_spill] sm:$0xff] }
 0x319   :  { %8990 = vst [vmem:[#allocation21_spill] sm:$0xff] %v7306_v15  ;;  %8991 = vst [vmem:[#allocation101_spill] sm:$0xff] %v7311_v34  ;;  %v3351_v38 = vmul.f32 %v7283_v54, %v7283_v54  ;;  %v7326_v24 = vadd.f32 %v3096_v4, %v8994_v18  ;;  %v8996_v50 = vunpack.c.h.bf16 %v8981_v36  ;;  %v6094_v54 = vld [vmem:[#allocation9 + $0x74] ss:$8 sps:$4 sm:$0xff]   ;;  %v3471_v4 = vadd.f32 %v7002_v42, %v3343_v28  ;;  %v9005_v60 = vld [vmem:[#allocation24_spill] sm:$0xff] }
 0x31a   :  { %8988 = vst [vmem:[#allocation100_spill] sm:$0xff] %v7303_v19  ;;  %8993 = vst [vmem:[#allocation23_spill] sm:$0xff] %v7314_v6  ;;  %v3344_v10 = vmul.f32 %v7303_v19, %v7303_v19  ;;  %v8999_v18 = vunpack.c.l.bf16 %v8998_v33  ;;  %v9001_v36 = vld [vmem:[#allocation22_spill] sm:$0xff]  ;;  %v3120_v34 = vmax.f32 %v9005_v60, 0.0  ;;  %v9006_v39 = vld [vmem:[#allocation25_spill] sm:$0xff]  ;;  %v7353_v42 = vadd.f32 %v3462_v7, %v3336_v29  ;;  %4738 = vmatpush1.bf16.msra.mxu0 %v6089_v3 }
 0x31b   :  { %8995 = vst [vmem:[#allocation102_spill] sm:$0xff] %v7326_v24  ;;  %v7332_v1 = vadd.f32 %v3104_v14, %v8996_v50  ;;  %v3112_v14 = vmax.f32 %v9001_v36, 0.0  ;;  %v9002_v50 = vld [vmem:[#allocation41_spill] sm:$0xff]  ;;  %v3127_v26 = vmax.f32 %v9006_v39, 0.0  ;;  %v3480_v28 = vadd.f32 %v7023_v63, %v3351_v38  ;;  %v7360_v36 = vld [vmem:[#allocation3 + $0x58] sm:$0xff]  ;;  %4739 = vmatprep.subr.bf16.mxu0 %v6094_v54 }
 0x31c   :  { %v7343_v53 = vadd.f32 %v3111_v52, %v8999_v18  ;;  %v9003_v57 = vunpack.c.l.bf16 %v9002_v50  ;;  %v3352_v52 = vmul.f32 %v7326_v24, %v7326_v24  ;;  %v3489_v60 = vadd.f32 %v7046_v44, %v3359_v2  ;;  %v9008_v7 = vld [vmem:[#allocation27_spill] sm:$0xff]  ;;  %v6097_v38 = vld [vmem:[#allocation9 + $0x84] ss:$8 sps:$4 sm:$0xff]  }
 0x31d   :  { %8997 = vst [vmem:[#allocation103_spill] sm:$0xff] %v7332_v1  ;;  %v7358_v18 = vpop.f32.mrb[112].mxu1  ;;  %v3360_v39 = vmul.f32 %v7332_v1, %v7332_v1  ;;  %v3135_v29 = vmax.f32 %v9008_v7, 0.0  ;;  %v7370_v24 = vadd.f32 %v3471_v4, %v3344_v10  ;;  %v9010_v3 = vunpack.c.h.bf16 %v8998_v33  ;;  %v7380_v2 = vld [vmem:[#allocation3 + $0x78] sm:$0xff]  ;;  %v9016_v10 = vld [vmem:[#allocation42_spill] sm:$0xff] }
 0x31e   :  { %9000 = vst [vmem:[#allocation40_spill] sm:$0xff] %v7343_v53  ;;  %v7348_v17 = vadd.f32 %v3119_v56, %v9003_v57  ;;  %9007 = vst [vmem:[#allocation41_spill] sm:$0xff] %v7358_v18  ;;  %v6092_v56 = vld [vmem:[#allocation9 + $0x70] ss:$8 sps:$4 sm:$0xff]   ;;  %v7367_v25 = vpop.f32.mrb[113].mxu1  ;;  %v3367_v57 = vmul.f32 %v7343_v53, %v7343_v53  ;;  %v9014_v54 = vunpack.c.h.bf16 %v9002_v50  ;;  %v9017_v1 = vunpack.c.l.bf16 %v9016_v10 }
 0x31f   :  { %9009 = vst [vmem:[#allocation24_spill] sm:$0xff] %v7367_v25  ;;  %v7376_v19 = vadd.f32 %v3112_v14, %v9010_v3  ;;  %v7378_v44 = vpop.f32.mrb[114].mxu1  ;;  %9013 = vst [vmem:[#allocation104_spill] sm:$0xff] %v7380_v2  ;;  %v9019_v33 = vld [vmem:[#allocation26_spill] sm:$0xff]  ;;  %v7396_v25 = vadd.f32 %v3480_v28, %v3352_v52  ;;  %v7400_v6 = vld [vmem:[#allocation3 + $0x98] sm:$0xff]  ;;  %4740 = vmatpush1.bf16.msra.mxu0 %v6092_v56 }
 0x320   :  { %9004 = vst [vmem:[#allocation22_spill] sm:$0xff] %v7348_v17  ;;  %9012 = vst [vmem:[#allocation27_spill] sm:$0xff] %v7378_v44  ;;  %v3375_v63 = vmul.f32 %v7348_v17, %v7348_v17  ;;  %v7387_v4 = vadd.f32 %v3120_v34, %v9014_v54  ;;  %v7391_v53 = vadd.f32 %v3127_v26, %v9017_v1  ;;  %v3128_v14 = vmax.f32 %v9019_v33, 0.0  ;;  %v7394_v3 = vpop.f32.mrb[115].mxu1  ;;  %v9021_v44 = vld [vmem:[#allocation29_spill] sm:$0xff]  ;;  %v9023_v1 = vld [vmem:[#allocation43_spill] sm:$0xff] }
 0x321   :  { %9011 = vst [vmem:[#allocation25_spill] sm:$0xff] %v7376_v19  ;;  %9020 = vst [vmem:[#allocation26_spill] sm:$0xff] %v7394_v3  ;;  %v3143_v18 = vmax.f32 %v9021_v44, 0.0  ;;  %v6095_v34 = vld [vmem:[#allocation9 + $0x80] ss:$8 sps:$4 sm:$0xff]   ;;  %v7403_v54 = vadd.f32 %v3489_v60, %v3360_v39  ;;  %v9024_v26 = vunpack.c.l.bf16 %v9023_v1  ;;  %4741 = vmatprep.subr.bf16.mxu0 %v6097_v38  ;;  %v3498_v44 = vadd.f32 %v7057_v20, %v3367_v57  ;;  %v9027_v50 = vld [vmem:[#allocation31_spill] sm:$0xff] }
 0x322   :  { %9015 = vst [vmem:[#allocation105_spill] sm:$0xff] %v7387_v4  ;;  %9018 = vst [vmem:[#allocation42_spill] sm:$0xff] %v7391_v53  ;;  %v9026_v33 = vld [vmem:[#allocation28_spill] sm:$0xff]  ;;  %v6100_v52 = vld [vmem:[#allocation9 + $0x94] ss:$8 sps:$4 sm:$0xff]   ;;  %v3368_v7 = vmul.f32 %v7376_v19, %v7376_v19  ;;  %v3151_v56 = vmax.f32 %v9027_v50, 0.0  ;;  %v3507_v39 = vadd.f32 %v7096_v58, %v3375_v63  ;;  %v3383_v38 = vmul.f32 %v7391_v53, %v7391_v53 }
 0x323   :  { %9022 = vst [vmem:[#allocation29_spill] sm:$0xff] %v7400_v6  ;;  %v7407_v17 = vadd.f32 %v3135_v29, %v9024_v26  ;;  %v3136_v3 = vmax.f32 %v9026_v33, 0.0  ;;  %v7415_v15 = vld [vmem:[#allocation3 + $0xb8] sm:$0xff]  ;;  %v3376_v29 = vmul.f32 %v7387_v4, %v7387_v4  ;;  %v9029_v26 = vunpack.c.h.bf16 %v9016_v10  ;;  %v9031_v57 = vld [vmem:[#allocation44_spill] sm:$0xff]  ;;  %v9034_v50 = vld [vmem:[#allocation30_spill] sm:$0xff]  ;;  %4742 = vmatpush1.bf16.msra.mxu0 %v6095_v34 }
 0x324   :  { %9028 = vst [vmem:[#allocation28_spill] sm:$0xff] %v7415_v15  ;;  %v9032_v33 = vunpack.c.l.bf16 %v9031_v57  ;;  %v3144_v19 = vmax.f32 %v9034_v50, 0.0  ;;  %v9035_v6 = vld [vmem:[#allocation33_spill] sm:$0xff]  ;;  %v6098_v63 = vld [vmem:[#allocation9 + $0x90] ss:$8 sps:$4 sm:$0xff]   ;;  %v9037_v10 = vunpack.c.h.bf16 %v9023_v1  ;;  %4743 = vmatprep.subr.bf16.mxu0 %v6100_v52  ;;  %v7448_v58 = vadd.f32 %v3498_v44, %v3368_v7 }
 0x325   :  { %9025 = vst [vmem:[#allocation43_spill] sm:$0xff] %v7407_v17  ;;  %v7425_v20 = vadd.f32 %v3128_v14, %v9029_v26  ;;  %v3159_v60 = vmax.f32 %v9035_v6, 0.0  ;;  %v7433_v2 = vpop.f32.mrb[116].mxu1  ;;  %v3391_v53 = vmul.f32 %v7407_v17, %v7407_v17  ;;  %v9039_v26 = vld [vmem:[#allocation35_spill] sm:$0xff]  ;;  %v6103_v4 = vld [vmem:[#allocation9 + $0xa4] ss:$8 sps:$4 sm:$0xff]   ;;  %v9049_v44 = vunpack.c.h.bf16 %v9031_v57 }
 0x326   :  { %v7429_v28 = vadd.f32 %v3143_v18, %v9032_v33  ;;  %9036 = vst [vmem:[#allocation30_spill] sm:$0xff] %v7433_v2  ;;  %v7440_v14 = vadd.f32 %v3136_v3, %v9037_v10  ;;  %v3167_v18 = vmax.f32 %v9039_v26, 0.0  ;;  %v7443_v33 = vpop.f32.mrb[117].mxu1  ;;  %v7445_v50 = vld [vmem:[#allocation3 + $0xd8] sm:$0xff]  ;;  %v9042_v34 = vld [vmem:[#allocation45_spill] sm:$0xff]  ;;  %v9045_v17 = vld [vmem:[#allocation32_spill] sm:$0xff]  ;;  %v7458_v26 = vadd.f32 %v3507_v39, %v3376_v29 }
 0x327   :  { %9030 = vst [vmem:[#allocation31_spill] sm:$0xff] %v7425_v20  ;;  %9040 = vst [vmem:[#allocation35_spill] sm:$0xff] %v7443_v33  ;;  %v9043_v2 = vunpack.c.l.bf16 %v9042_v34  ;;  %v3152_v1 = vmax.f32 %v9045_v17, 0.0  ;;  %v7455_v3 = vpop.f32.mrb[118].mxu1  ;;  %v3516_v33 = vadd.f32 %v7109_v62, %v3383_v38  ;;  %v3384_v52 = vmul.f32 %v7425_v20, %v7425_v20  ;;  %v7465_v7 = vld [vmem:[#allocation3 + $0xf8] sm:$0xff]  ;;  %v9054_v62 = vld [vmem:[#allocation34_spill] sm:$0xff]  ;;  %4744 = vmatpush1.bf16.msra.mxu0 %v6098_v63 }
 0x328   :  { %9033 = vst [vmem:[#allocation44_spill] sm:$0xff] %v7429_v28  ;;  %9038 = vst [vmem:[#allocation33_spill] sm:$0xff] %v7440_v14  ;;  %v7463_v6 = vpop.f32.mrb[119].mxu1  ;;  %v3399_v17 = vmul.f32 %v7429_v28, %v7429_v28  ;;  %v9051_v39 = vld [vmem:[#allocation47_spill] sm:$0xff]  ;;  %v3160_v38 = vmax.f32 %v9054_v62, 0.0  ;;  %v9058_v57 = vld [vmem:[#allocation37_spill] sm:$0xff]  ;;  %4745 = vmatprep.subr.bf16.mxu0 %v6103_v4 }
 0x329   :  { %9041 = vst [vmem:[#allocation106_spill] sm:$0xff] %v7445_v50  ;;  %v7452_v15 = vadd.f32 %v3151_v56, %v9043_v2  ;;  %9046 = vst [vmem:[#allocation32_spill] sm:$0xff] %v7455_v3  ;;  %v7472_v56 = vadd.f32 %v3144_v19, %v9049_v44  ;;  %v9052_v29 = vunpack.c.l.bf16 %v9051_v39  ;;  %v6101_v20 = vld [vmem:[#allocation9 + $0xa0] ss:$8 sps:$4 sm:$0xff]   ;;  %v3392_v2 = vmul.f32 %v7440_v14, %v7440_v14  ;;  %v9061_v63 = vld [vmem:[#allocation46_spill] sm:$0xff] }
 0x32a   :  { %9047 = vst [vmem:[#allocation107_spill] sm:$0xff] %v7458_v26  ;;  %9048 = vst [vmem:[#allocation108_spill] sm:$0xff] %v7463_v6  ;;  %v3525_v6 = vadd.f32 %v7150_v61, %v3391_v53  ;;  %v9055_v3 = vld [vmem:[#allocation48_spill] sm:$0xff]  ;;  %v3168_v19 = vmax.f32 %v9058_v57, 0.0  ;;  %v9059_v44 = vunpack.c.h.bf16 %v9042_v34  ;;  %v3175_v62 = vmax.f32 %v9061_v63, 0.0  ;;  %v9062_v14 = vld [vmem:[#allocation50_spill] sm:$0xff] }
 0x32b   :  { %9044 = vst [vmem:[#allocation45_spill] sm:$0xff] %v7452_v15  ;;  %9050 = vst [vmem:[#allocation109_spill] sm:$0xff] %v7472_v56  ;;  %v7476_v10 = vadd.f32 %v3159_v60, %v9052_v29  ;;  %v9056_v50 = vunpack.c.l.bf16 %v9055_v3  ;;  %v3407_v60 = vmul.f32 %v7452_v15, %v7452_v15  ;;  %v7495_v53 = vadd.f32 %v3516_v33, %v3384_v52  ;;  %v9080_v15 = vld [vmem:[#allocation62_spill] sm:$0xff] }
 0x32c   :  { %v7491_v29 = vadd.f32 %v3152_v1, %v9059_v44  ;;  %v3183_v26 = vmax.f32 %v9062_v14, 0.0  ;;  %v3534_v57 = vadd.f32 %v7161_v9, %v3399_v17  ;;  %v3400_v34 = vmul.f32 %v7472_v56, %v7472_v56  ;;  %4746 = vmatpush1.bf16.msra.mxu0 %v6101_v20 }
 0x32d   :  { %9053 = vst [vmem:[#allocation47_spill] sm:$0xff] %v7476_v10  ;;  %v7484_v28 = vadd.f32 %v3167_v18, %v9056_v50  ;;  %v7498_v18 = vld [vmem:[#allocation3 + $0x118] sm:$0xff]  ;;  %v3415_v1 = vmul.f32 %v7476_v10, %v7476_v10  ;;  %v9063_v44 = vunpack.c.h.bf16 %v9051_v39  ;;  %v7511_v52 = vpop.f32.mrb[120].mxu1  ;;  %v7513_v14 = vadd.f32 %v3525_v6, %v3392_v2 }
 0x32e   :  { %9060 = vst [vmem:[#allocation48_spill] sm:$0xff] %v7491_v29  ;;  %v9065_v9 = vunpack.c.h.bf16 %v9055_v3  ;;  %v7521_v4 = vpop.f32.mrb[121].mxu1  ;;  %v7523_v50 = vld [vmem:[#allocation3 + $0x138] sm:$0xff]  ;;  %v3408_v20 = vmul.f32 %v7491_v29, %v7491_v29  ;;  %v9067_v6 = vunpack.c.l.bf16 %v6904_v46  ;;  %v3089_v29 = vmax.f32 %v7059_v21, 0.0 }
 0x32f   :  { %9057 = vst [vmem:[#allocation34_spill] sm:$0xff] %v7484_v28  ;;  %v7509_v33 = vadd.f32 %v3160_v38, %v9063_v44  ;;  %v3423_v63 = vmul.f32 %v7484_v28, %v7484_v28  ;;  %v3543_v38 = vadd.f32 %v7163_v27, %v3407_v60  ;;  %v9069_v44 = vld [vmem:[#allocation49_spill] sm:$0xff]  ;;  %v7534_v3 = vpop.f32.mrb[122].mxu1  ;;  %v7544_v60 = vld [vmem:[#allocation3 + $0x158] sm:$0xff]  ;;  %v3081_v27 = vmax.f32 %v7044_v23, 0.0 }
 0x330   :  { %v7519_v17 = vadd.f32 %v3168_v19, %v9065_v9  ;;  %v7531_v2 = vadd.f32 %v3175_v62, %v9067_v6  ;;  %v3176_v61 = vmax.f32 %v9069_v44, 0.0  ;;  %v9070_v19 = vunpack.c.l.bf16 %v6918_v16  ;;  %v9072_v28 = vld [vmem:[#allocation53_spill] sm:$0xff]  ;;  %v7541_v39 = vpop.f32.mrb[123].mxu1 }
 0x331   :  { %9064 = vst [vmem:[#allocation37_spill] sm:$0xff] %v7509_v33  ;;  %v3184_v10 = vmax.f32 %v9072_v28, 0.0  ;;  %v7547_v62 = vadd.f32 %v3534_v57, %v3400_v34  ;;  %v3552_v6 = vadd.f32 %v7205_v47, %v3415_v1  ;;  %v3416_v44 = vmul.f32 %v7509_v33, %v7509_v33  ;;  %v7566_v1 = vld [vmem:[#allocation3 + $0x178] sm:$0xff] }
 0x332   :  { %9066 = vst [vmem:[#allocation46_spill] sm:$0xff] %v7519_v17  ;;  %9068 = vst [vmem:[#allocation50_spill] sm:$0xff] %v7531_v2  ;;  %v7538_v9 = vadd.f32 %v3183_v26, %v9070_v19  ;;  %v3561_v19 = vadd.f32 %v7216_v51, %v3423_v63  ;;  %v3424_v28 = vmul.f32 %v7519_v17, %v7519_v17  ;;  %v9073_v47 = vunpack.c.h.bf16 %v6904_v46 }
 0x333   :  { %v7558_v56 = vadd.f32 %v3543_v38, %v3408_v20  ;;  %v3431_v57 = vmul.f32 %v7531_v2, %v7531_v2  ;;  %v9075_v23 = vunpack.c.h.bf16 %v6918_v16  ;;  %v7576_v38 = vld [vmem:[#allocation3 + $0x198] sm:$0xff]  ;;  %v7579_v46 = vadd.f32 %v3552_v6, %v3416_v44 }
 0x334   :  { %9071 = vst [vmem:[#allocation49_spill] sm:$0xff] %v7538_v9  ;;  %v7564_v34 = vadd.f32 %v3176_v61, %v9073_v47  ;;  %v3439_v63 = vmul.f32 %v7538_v9, %v7538_v9  ;;  %v3191_v61 = vmax.f32 %v6963_v13, 0.0  ;;  %v3082_v47 = vmax.f32 %v7052_v37, 0.0 }
 0x335   :  { %v7573_v26 = vadd.f32 %v3184_v10, %v9075_v23  ;;  %v7583_v51 = vpop.f32.mrb[124].mxu1  ;;  %v7586_v9 = vadd.f32 %v3561_v19, %v3424_v28  ;;  %v9077_v16 = vunpack.c.l.bf16 %v6956_v59  ;;  %v9078_v23 = vunpack.c.l.bf16 %v6966_v0 }
 0x336   :  { %9074 = vst [vmem:[#allocation53_spill] sm:$0xff] %v7564_v34  ;;  %v3090_v6 = vmax.f32 %v7078_v31, 0.0  ;;  %v7597_v44 = vpop.f32.mrb[125].mxu1  ;;  %v3570_v13 = vadd.f32 %v7250_v32, %v3431_v57  ;;  %v3432_v37 = vmul.f32 %v7564_v34, %v7564_v34  ;;  %v3192_v19 = vmax.f32 %v9080_v15, 0.0  ;;  %v7611_v31 = vld [vmem:[#allocation3 + $0x1b8] sm:$0xff] }
 0x337   :  { %9076 = vst [vmem:[#allocation110_spill] sm:$0xff] %v7573_v26  ;;  %v7590_v10 = vadd.f32 %v3081_v27, %v9077_v16  ;;  %v7594_v21 = vadd.f32 %v3089_v29, %v9078_v23  ;;  %v3097_v28 = vmax.f32 %v7124_v41, 0.0  ;;  %v7604_v20 = vpop.f32.mrb[126].mxu1  ;;  %v3579_v27 = vadd.f32 %v7257_v40, %v3439_v63  ;;  %v9081_v23 = vld [vmem:[#allocation56_spill] sm:$0xff] }
 0x338   :  { %v3440_v29 = vmul.f32 %v7573_v26, %v7573_v26  ;;  %v7609_v16 = vpop.f32.mrb[127].mxu1  ;;  %v9082_v2 = vunpack.c.l.bf16 %v9081_v23  ;;  %v3199_v41 = vmax.f32 %v6993_v5, 0.0  ;;  %v9084_v34 = vunpack.c.h.bf16 %v6956_v59 }
 0x339   :  { %9079 = vst [vmem:[#allocation111_spill] sm:$0xff] %v7594_v21  ;;  %v3105_v63 = vmax.f32 %v7148_v55, 0.0  ;;  %v3337_v26 = vmul.f32 %v7590_v10, %v7590_v10  ;;  %v3345_v32 = vmul.f32 %v7594_v21, %v7594_v21  ;;  %v9085_v57 = vunpack.c.h.bf16 %v6966_v0 }
 0x33a   :  { %v7617_v15 = vadd.f32 %v3191_v61, %v9082_v2  ;;  %v7622_v40 = vadd.f32 %v3082_v47, %v9084_v34  ;;  %v7633_v2 = vld [vmem:[#allocation3 + $0x1d8] sm:$0xff]  ;;  %v7636_v61 = vadd.f32 %v3570_v13, %v3432_v37  ;;  %v9087_v59 = vunpack.c.h.bf16 %v9081_v23  ;;  %v9091_v37 = vld [vmem:[#allocation57_spill] sm:$0xff] }
 0x33b   :  { %v7631_v17 = vadd.f32 %v3090_v6, %v9085_v57  ;;  %v9089_v55 = vunpack.c.l.bf16 %v7004_v43  ;;  %v3098_v33 = vmax.f32 %v7136_v12, 0.0  ;;  %v7647_v21 = vadd.f32 %v3579_v27, %v3440_v29 }
 0x33c   :  { %9083 = vst [vmem:[#allocation62_spill] sm:$0xff] %v7617_v15  ;;  %v7640_v34 = vadd.f32 %v3192_v19, %v9087_v59  ;;  %v3200_v0 = vmax.f32 %v6999_v49, 0.0  ;;  %v3106_v6 = vmax.f32 %v7152_v30, 0.0  ;;  %v3447_v13 = vmul.f32 %v7617_v15, %v7617_v15 }
 0x33d   :  { %9086 = vst [vmem:[#allocation56_spill] sm:$0xff] %v7631_v17  ;;  %v7644_v47 = vadd.f32 %v3097_v28, %v9089_v55  ;;  %v9092_v19 = vunpack.c.l.bf16 %v9091_v37  ;;  %v3338_v28 = vmul.f32 %v7622_v40, %v7622_v40  ;;  %v9094_v12 = vunpack.c.l.bf16 %v7008_v48  ;;  %v2998_v29 = vpop.f32.mrb[128].mxu1 }
 0x33e   :  { %9088 = vst [vmem:[#allocation112_spill] sm:$0xff] %v7640_v34  ;;  %v3473_v49 = vadd.f32 %v7370_v24, %v3345_v32  ;;  %v3346_v30 = vmul.f32 %v7631_v17, %v7631_v17  ;;  %v3083_v59 = vmax.f32 %v2998_v29, 0.0  ;;  %v3000_v55 = vpop.f32.mrb[129].mxu1  ;;  %v3464_v57 = vadd.f32 %v7353_v42, %v3337_v26 }
 0x33f   :  { %9090 = vst [vmem:[#allocation113_spill] sm:$0xff] %v7644_v47  ;;  %v7656_v23 = vadd.f32 %v3199_v41, %v9092_v19  ;;  %v7662_v27 = vadd.f32 %v3105_v63, %v9094_v12  ;;  %v7670_v41 = vmul.f32 %v7640_v34, %v7640_v34  ;;  %v3353_v19 = vmul.f32 %v7644_v47, %v7644_v47  ;;  %v3002_v24 = vpop.f32.mrb[130].mxu1 }
 0x340   :  { %v9096_v63 = vunpack.c.h.bf16 %v7004_v43  ;;  %v3084_v5 = vmax.f32 %v3000_v55, 0.0  ;;  %v9098_v32 = vunpack.c.h.bf16 %v7008_v48  ;;  %v3113_v29 = vmax.f32 %v7198_v8, 0.0  ;;  %v3004_v17 = vpop.f32.mrb[131].mxu1 }
 0x341   :  { %9093 = vst [vmem:[#allocation57_spill] sm:$0xff] %v7656_v23  ;;  %9095 = vst [vmem:[#allocation114_spill] sm:$0xff] %v7662_v27  ;;  %v9100_v42 = vunpack.c.l.bf16 %v7316_v22  ;;  %v3091_v34 = vmax.f32 %v3002_v24, 0.0  ;;  %v3361_v47 = vmul.f32 %v7662_v27, %v7662_v27  ;;  %v3114_v43 = vmax.f32 %v7211_v35, 0.0 }
 0x342   :  { %v7676_v12 = vadd.f32 %v3098_v33, %v9096_v63  ;;  %v7680_v15 = vadd.f32 %v3106_v6, %v9098_v32  ;;  %v9102_v33 = vunpack.c.h.bf16 %v7316_v22  ;;  %v3092_v48 = vmax.f32 %v3004_v17, 0.0 }
 0x343   :  { %v7685_v26 = vadd.f32 %v3083_v59, %v9100_v42  ;;  %v9103_v6 = vunpack.c.l.bf16 %v7335_v11  ;;  %v3465_v59 = vadd.f32 %v3464_v57, %v3338_v28  ;;  %v3474_v24 = vadd.f32 %v3473_v49, %v3346_v30  ;;  %v9105_v42 = vld [vmem:[#allocation92_spill] sm:$0xff] }
 0x344   :  { %9097 = vst [vmem:[#allocation115_spill] sm:$0xff] %v7676_v12  ;;  %9099 = vst [vmem:[#allocation116_spill] sm:$0xff] %v7680_v15  ;;  %v7692_v55 = vadd.f32 %v3084_v5, %v9102_v33  ;;  %v3354_v32 = vmul.f32 %v7676_v12, %v7676_v12  ;;  %v3121_v27 = vmax.f32 %v9105_v42, 0.0  ;;  %v9106_v35 = vunpack.c.h.bf16 %v7335_v11  ;;  %v9107_v5 = vld [vmem:[#allocation69_spill] sm:$0xff] }
 0x345   :  { %9101 = vst [vmem:[#allocation117_spill] sm:$0xff] %v7685_v26  ;;  %v7696_v63 = vadd.f32 %v3091_v34, %v9103_v6  ;;  %v3339_v8 = vmul.f32 %v7685_v26, %v7685_v26  ;;  %v9108_v34 = vunpack.c.l.bf16 %v9107_v5  ;;  %v3482_v49 = vadd.f32 %v7396_v25, %v3353_v19 }
 0x346   :  { %v7705_v22 = vadd.f32 %v3092_v48, %v9106_v35  ;;  %v3340_v17 = vmul.f32 %v7692_v55, %v7692_v55  ;;  %v9110_v30 = vunpack.c.h.bf16 %v9091_v37  ;;  %v3491_v11 = vadd.f32 %v7403_v54, %v3361_v47  ;;  %v9114_v37 = vld [vmem:[#allocation70_spill] sm:$0xff] }
 0x347   :  { %9104 = vst [vmem:[#allocation118_spill] sm:$0xff] %v7696_v63  ;;  %v7711_v33 = vadd.f32 %v3113_v29, %v9108_v34  ;;  %v3347_v57 = vmul.f32 %v7696_v63, %v7696_v63  ;;  %v3466_v28 = vadd.f32 %v3465_v59, %v3339_v8  ;;  %v3362_v48 = vmul.f32 %v7680_v15, %v7680_v15  ;;  %v3008_v29 = vpop.f32.mrb[132].mxu1  ;;  %v9117_v8 = vld [vmem:[#allocation97_spill] sm:$0xff] }
 0x348   :  { %v7718_v6 = vadd.f32 %v3200_v0, %v9110_v30  ;;  %v9112_v42 = vunpack.c.h.bf16 %v9107_v5  ;;  %v3099_v34 = vmax.f32 %v3008_v29, 0.0  ;;  %v3010_v12 = vpop.f32.mrb[133].mxu1  ;;  %v3348_v25 = vmul.f32 %v7705_v22, %v7705_v22 }
 0x349   :  { %9109 = vst [vmem:[#allocation92_spill] sm:$0xff] %v7711_v33  ;;  %v3467_v63 = vadd.f32 %v3466_v28, %v3340_v17  ;;  %v3475_v19 = vadd.f32 %v3474_v24, %v3347_v57  ;;  %v7730_v0 = vadd.f32 %v7309_v45, %v3447_v13  ;;  %v9115_v54 = vunpack.c.l.bf16 %v9114_v37  ;;  %v9120_v13 = vld [vmem:[#allocation18_spill] sm:$0xff] }
 0x34a   :  { %9111 = vst [vmem:[#allocation69_spill] sm:$0xff] %v7718_v6  ;;  %v7725_v35 = vadd.f32 %v3114_v43, %v9112_v42  ;;  %v3122_v59 = vmax.f32 %v9117_v8, 0.0  ;;  %v3100_v5 = vmax.f32 %v3010_v12, 0.0  ;;  %v3012_v43 = vpop.f32.mrb[134].mxu1  ;;  %v3369_v30 = vmul.f32 %v7711_v33, %v7711_v33  ;;  %v9122_v33 = vld [vmem:[#allocation104_spill] sm:$0xff] }
 0x34b   :  { %v7734_v47 = vadd.f32 %v3121_v27, %v9115_v54  ;;  %v9118_v17 = vunpack.c.l.bf16 %v7360_v36  ;;  %v3107_v42 = vmax.f32 %v3012_v43, 0.0  ;;  %v3014_v24 = vpop.f32.mrb[135].mxu1  ;;  %3468 = vadd.xlane.f32.xlu0 %v3467_v63  ;;  %v3483_v45 = vadd.f32 %v3482_v49, %v3354_v32 }
 0x34c   :  { %9113 = vst [vmem:[#allocation119_spill] sm:$0xff] %v7725_v35  ;;  %v3129_v57 = vmax.f32 %v9120_v13, 0.0  ;;  %v9121_v27 = vunpack.c.h.bf16 %v7360_v36  ;;  %v3108_v54 = vmax.f32 %v3014_v24, 0.0  ;;  %v3492_v12 = vadd.f32 %v3491_v11, %v3362_v48 }
 0x34d   :  { %9116 = vst [vmem:[#allocation70_spill] sm:$0xff] %v7734_v47  ;;  %v7741_v28 = vadd.f32 %v3099_v34, %v9118_v17  ;;  %v3370_v8 = vmul.f32 %v7725_v35, %v7725_v35  ;;  %v9123_v15 = vunpack.c.l.bf16 %v9122_v33  ;;  %v3476_v34 = vadd.f32 %v3475_v19, %v3348_v25  ;;  %v9128_v25 = vld [vmem:[#allocation21_spill] sm:$0xff]  ;;  %v3018_v13 = vpop.f32.mrb[136].mxu1 }
 0x34e   :  { %v7746_v29 = vadd.f32 %v3100_v5, %v9121_v27  ;;  %v3377_v32 = vmul.f32 %v7734_v47, %v7734_v47  ;;  %v9125_v36 = vunpack.c.h.bf16 %v9114_v37  ;;  %v9127_v11 = vunpack.c.h.bf16 %v9122_v33 }
 0x34f   :  { %9119 = vst [vmem:[#allocation97_spill] sm:$0xff] %v7741_v28  ;;  %v7752_v26 = vadd.f32 %v3107_v42, %v9123_v15  ;;  %v3355_v63 = vmul.f32 %v7741_v28, %v7741_v28  ;;  %v3500_v15 = vadd.f32 %v7448_v58, %v3369_v30  ;;  %v3137_v19 = vmax.f32 %v9128_v25, 0.0  ;;  %3477 = vadd.xlane.f32.xlu0 %v3476_v34  ;;  %v9132_v58 = vld [vmem:[#allocation20_spill] sm:$0xff] }
 0x350   :  { %v7760_v49 = vadd.f32 %v3122_v59, %v9125_v36  ;;  %v7764_v48 = vadd.f32 %v3108_v54, %v9127_v11  ;;  %v3356_v5 = vmul.f32 %v7746_v29, %v7746_v29  ;;  %v7774_v37 = vmul.f32 %v7656_v23, %v7656_v23  ;;  %v9129_v59 = vld [vmem:[#allocation77_spill] sm:$0xff]  ;;  %v3020_v54 = vpop.f32.mrb[137].mxu1  ;;  %v9134_v23 = vld [vmem:[#allocation23_spill] sm:$0xff] }
 0x351   :  { %9124 = vst [vmem:[#allocation18_spill] sm:$0xff] %v7752_v26  ;;  %v3363_v43 = vmul.f32 %v7752_v26, %v7752_v26  ;;  %v3484_v17 = vadd.f32 %v3483_v45, %v3355_v63  ;;  %v7778_v33 = vmul.f32 %v7718_v6, %v7718_v6  ;;  %v9130_v42 = vunpack.c.l.bf16 %v9129_v59  ;;  %v9133_v63 = vld [vmem:[#allocation107_spill] sm:$0xff] }
 0x352   :  { %9126 = vst [vmem:[#allocation104_spill] sm:$0xff] %v7760_v49  ;;  %v3130_v30 = vmax.f32 %v9132_v58, 0.0  ;;  %v3115_v27 = vmax.f32 %v3018_v13, 0.0  ;;  %v3364_v45 = vmul.f32 %v7764_v48, %v7764_v48  ;;  %v3509_v11 = vadd.f32 %v9133_v63, %v3377_v32  ;;  %v9138_v13 = vld [vmem:[#allocation29_spill] sm:$0xff] }
 0x353   :  { %v7782_v24 = vadd.f32 %v3129_v57, %v9130_v42  ;;  %v3485_v36 = vadd.f32 %v3484_v17, %v3356_v5  ;;  %v3493_v34 = vadd.f32 %v3492_v12, %v3363_v43  ;;  %v3378_v25 = vmul.f32 %v7760_v49, %v7760_v49  ;;  %v3022_v57 = vpop.f32.mrb[138].mxu1  ;;  %v9135_v42 = vld [vmem:[#allocation78_spill] sm:$0xff]  ;;  %v9143_v49 = vld [vmem:[#allocation41_spill] sm:$0xff] }
 0x354   :  { %v3138_v6 = vmax.f32 %v9134_v23, 0.0  ;;  %v3116_v47 = vmax.f32 %v3020_v54, 0.0  ;;  %v9136_v26 = vunpack.c.l.bf16 %v9135_v42  ;;  %v9139_v35 = vunpack.c.l.bf16 %v9138_v13  ;;  %v3024_v12 = vpop.f32.mrb[139].mxu1 }
 0x355   :  { %9131 = vst [vmem:[#allocation21_spill] sm:$0xff] %v7782_v24  ;;  %v3123_v17 = vmax.f32 %v3022_v57, 0.0  ;;  %3486 = vadd.xlane.f32.xlu1 %v3485_v36  ;;  %v3501_v43 = vadd.f32 %v3500_v15, %v3370_v8  ;;  %v9141_v32 = vunpack.c.h.bf16 %v9129_v59  ;;  %v3145_v23 = vmax.f32 %v9143_v49, 0.0  ;;  %v9150_v49 = vld [vmem:[#allocation27_spill] sm:$0xff] }
 0x356   :  { %v7793_v58 = vadd.f32 %v3137_v19, %v9136_v26  ;;  %v7797_v5 = vadd.f32 %v3115_v27, %v9139_v35  ;;  %v9144_v54 = vunpack.c.h.bf16 %v9138_v13  ;;  %v3124_v26 = vmax.f32 %v3024_v12, 0.0  ;;  %v9146_v27 = vld [vmem:[#allocation28_spill] sm:$0xff] }
 0x357   :  { %v7801_v63 = vadd.f32 %v3130_v30, %v9141_v32  ;;  %v3385_v19 = vmul.f32 %v7782_v24, %v7782_v24  ;;  %v9147_v36 = vunpack.c.l.bf16 %v9146_v27  ;;  %v3494_v15 = vadd.f32 %v3493_v34, %v3364_v45 }
 0x358   :  { %9137 = vst [vmem:[#allocation77_spill] sm:$0xff] %v7793_v58  ;;  %9140 = vst [vmem:[#allocation20_spill] sm:$0xff] %v7797_v5  ;;  %v7806_v28 = vadd.f32 %v3116_v47, %v9144_v54  ;;  %v3371_v35 = vmul.f32 %v7797_v5, %v7797_v5  ;;  %v9149_v59 = vunpack.c.h.bf16 %v9135_v42  ;;  %v3153_v57 = vmax.f32 %v9150_v49, 0.0  ;;  %v9153_v42 = vld [vmem:[#allocation83_spill] sm:$0xff] }
 0x359   :  { %9142 = vst [vmem:[#allocation107_spill] sm:$0xff] %v7801_v63  ;;  %v7814_v8 = vadd.f32 %v3123_v17, %v9147_v36  ;;  %v9151_v47 = vunpack.c.h.bf16 %v9146_v27  ;;  %v3393_v32 = vmul.f32 %v7793_v58, %v7793_v58  ;;  %3495 = vadd.xlane.f32.xlu1 %v3494_v15  ;;  %v3510_v34 = vadd.f32 %v3509_v11, %v3378_v25  ;;  %v6106_v11 = vld [vmem:[#allocation9 + $0xb4] ss:$8 sps:$4 sm:$0xff]  }
 0x35a   :  { %9145 = vst [vmem:[#allocation23_spill] sm:$0xff] %v7806_v28  ;;  %v7818_v30 = vadd.f32 %v3138_v6, %v9149_v59  ;;  %v3372_v12 = vmul.f32 %v7806_v28, %v7806_v28  ;;  %v3502_v45 = vadd.f32 %v3501_v43, %v3371_v35  ;;  %v3386_v6 = vmul.f32 %v7801_v63, %v7801_v63  ;;  %v3028_v59 = vpop.f32.mrb[140].mxu1  ;;  %v9157_v35 = vld [vmem:[#allocation84_spill] sm:$0xff]  ;;  %v6104_v28 = vld [vmem:[#allocation9 + $0xb0] ss:$8 sps:$4 sm:$0xff]  }
 0x35b   :  { %9148 = vst [vmem:[#allocation78_spill] sm:$0xff] %v7814_v8  ;;  %v7823_v13 = vadd.f32 %v3124_v26, %v9151_v47  ;;  %v3379_v17 = vmul.f32 %v7814_v8, %v7814_v8  ;;  %v9154_v54 = vunpack.c.l.bf16 %v9153_v42  ;;  %v9156_v26 = vld [vmem:[#allocation24_spill] sm:$0xff]  ;;  %v3518_v47 = vadd.f32 %v7495_v53, %v3385_v19  ;;  %v3030_v24 = vpop.f32.mrb[141].mxu1  ;;  %v9161_v53 = vld [vmem:[#allocation106_spill] sm:$0xff]  ;;  %4747 = vmatprep.subr.bf16.mxu0 %v6106_v11 }
 0x35c   :  { %v3146_v36 = vmax.f32 %v9156_v26, 0.0  ;;  %v3131_v58 = vmax.f32 %v3028_v59, 0.0  ;;  %v3503_v15 = vadd.f32 %v3502_v45, %v3372_v12  ;;  %v3394_v25 = vmul.f32 %v7818_v30, %v7818_v30  ;;  %v3032_v5 = vpop.f32.mrb[142].mxu1  ;;  %4748 = vmatpush1.bf16.msra.mxu0 %v6104_v28 }
 0x35d   :  { %9152 = vst [vmem:[#allocation29_spill] sm:$0xff] %v7823_v13  ;;  %v7835_v27 = vadd.f32 %v3145_v23, %v9154_v54  ;;  %v3380_v49 = vmul.f32 %v7823_v13, %v7823_v13  ;;  %v3511_v43 = vadd.f32 %v3510_v34, %v3379_v17  ;;  %v9158_v63 = vunpack.c.l.bf16 %v9157_v35  ;;  %v9160_v54 = vld [vmem:[#allocation26_spill] sm:$0xff]  ;;  %v3034_v17 = vpop.f32.mrb[143].mxu1 }
 0x35e   :  { %v3154_v26 = vmax.f32 %v9160_v54, 0.0  ;;  %v3132_v8 = vmax.f32 %v3030_v24, 0.0  ;;  %v3527_v13 = vadd.f32 %v7513_v14, %v3393_v32  ;;  %v9162_v19 = vunpack.c.l.bf16 %v9161_v53  ;;  %3504 = vadd.xlane.f32.xlu0 %v3503_v15 }
 0x35f   :  { %9155 = vst [vmem:[#allocation41_spill] sm:$0xff] %v7835_v27  ;;  %v7845_v23 = vadd.f32 %v3153_v57, %v9158_v63  ;;  %v3139_v12 = vmax.f32 %v3032_v5, 0.0  ;;  %v3512_v45 = vadd.f32 %v3511_v43, %v3380_v49  ;;  %v3401_v63 = vmul.f32 %v7835_v27, %v7835_v27 }
 0x360   :  { %v7851_v59 = vadd.f32 %v3131_v58, %v9162_v19  ;;  %v9164_v57 = vunpack.c.h.bf16 %v9153_v42  ;;  %v9166_v24 = vunpack.c.h.bf16 %v9161_v53  ;;  %v3140_v14 = vmax.f32 %v3034_v17, 0.0  ;;  %v9168_v58 = vld [vmem:[#allocation30_spill] sm:$0xff]  ;;  %v6109_v42 = vld [vmem:[#allocation9 + $0xc4] ss:$8 sps:$4 sm:$0xff]   ;;  %v6107_v17 = vld [vmem:[#allocation9 + $0xc0] ss:$8 sps:$4 sm:$0xff]  }
 0x361   :  { %9159 = vst [vmem:[#allocation28_spill] sm:$0xff] %v7845_v23  ;;  %v3161_v32 = vmax.f32 %v9168_v58, 0.0  ;;  %v9169_v49 = vunpack.c.l.bf16 %v7465_v7  ;;  %3513 = vadd.xlane.f32.xlu1 %v3512_v45  ;;  %v3519_v43 = vadd.f32 %v3518_v47, %v3386_v6  ;;  %v9171_v28 = vunpack.c.h.bf16 %v7465_v7  ;;  %4749 = vmatprep.subr.bf16.mxu0 %v6109_v42  ;;  %v9173_v7 = vld [vmem:[#allocation35_spill] sm:$0xff]  ;;  %v9176_v42 = vld [vmem:[#allocation108_spill] sm:$0xff] }
 0x362   :  { %9163 = vst [vmem:[#allocation27_spill] sm:$0xff] %v7851_v59  ;;  %v7857_v34 = vadd.f32 %v3146_v36, %v9164_v57  ;;  %v7861_v54 = vadd.f32 %v3132_v8, %v9166_v24  ;;  %v3387_v5 = vmul.f32 %v7851_v59, %v7851_v59  ;;  %v3409_v36 = vmul.f32 %v7845_v23, %v7845_v23 }
 0x363   :  { %v7868_v15 = vadd.f32 %v3139_v12, %v9169_v49  ;;  %v9170_v8 = vunpack.c.h.bf16 %v9157_v35  ;;  %v7878_v53 = vadd.f32 %v3140_v14, %v9171_v28  ;;  %v9172_v12 = vld [vmem:[#allocation32_spill] sm:$0xff]  ;;  %v3528_v45 = vadd.f32 %v3527_v13, %v3394_v25  ;;  %v3038_v14 = vpop.f32.mrb[144].mxu1  ;;  %4750 = vmatpush1.bf16.msra.mxu0 %v6107_v17  ;;  %v9174_v49 = vld [vmem:[#allocation85_spill] sm:$0xff]  ;;  %v9177_v17 = vld [vmem:[#allocation90_spill] sm:$0xff] }
 0x364   :  { %9165 = vst [vmem:[#allocation83_spill] sm:$0xff] %v7857_v34  ;;  %9167 = vst [vmem:[#allocation24_spill] sm:$0xff] %v7861_v54  ;;  %v3388_v19 = vmul.f32 %v7861_v54, %v7861_v54  ;;  %v3169_v57 = vmax.f32 %v9172_v12, 0.0  ;;  %v3520_v47 = vadd.f32 %v3519_v43, %v3387_v5  ;;  %v3536_v35 = vadd.f32 %v7547_v62, %v3401_v63  ;;  %v3040_v5 = vpop.f32.mrb[145].mxu1  ;;  %v6112_v43 = vld [vmem:[#allocation9 + $0xd4] ss:$8 sps:$4 sm:$0xff]  }
 0x365   :  { %v7874_v11 = vadd.f32 %v3154_v26, %v9170_v8  ;;  %v3395_v6 = vmul.f32 %v7868_v15, %v7868_v15  ;;  %v3402_v26 = vmul.f32 %v7857_v34, %v7857_v34  ;;  %v3162_v24 = vmax.f32 %v9173_v7, 0.0  ;;  %v3042_v27 = vpop.f32.mrb[146].mxu1  ;;  %v6110_v34 = vld [vmem:[#allocation9 + $0xd0] ss:$8 sps:$4 sm:$0xff]   ;;  %4751 = vmatprep.subr.bf16.mxu0 %v6112_v43  ;;  %v6113_v43 = vld [vmem:[#allocation9 + $0xe0] ss:$8 sps:$4 sm:$0xff]  }
 0x366   :  { %v3396_v58 = vmul.f32 %v7878_v53, %v7878_v53  ;;  %v9175_v8 = vunpack.c.l.bf16 %v9174_v49  ;;  %v3147_v12 = vmax.f32 %v3038_v14, 0.0  ;;  %v3521_v13 = vadd.f32 %v3520_v47, %v3388_v19 }
 0x367   :  { %v3529_v25 = vadd.f32 %v3528_v45, %v3395_v6  ;;  %v3545_v62 = vadd.f32 %v7558_v56, %v3409_v36  ;;  %v3410_v63 = vmul.f32 %v7874_v11, %v7874_v11  ;;  %v3170_v7 = vmax.f32 %v9176_v42, 0.0  ;;  %v3044_v6 = vpop.f32.mrb[147].mxu1  ;;  %4752 = vmatpush1.bf16.msra.mxu0 %v6110_v34 }
 0x368   :  { %v7893_v28 = vadd.f32 %v3161_v32, %v9175_v8  ;;  %v3148_v23 = vmax.f32 %v3040_v5, 0.0  ;;  %v9178_v59 = vunpack.c.l.bf16 %v9177_v17  ;;  %v9179_v32 = vunpack.c.l.bf16 %v7498_v18  ;;  %3522 = vadd.xlane.f32.xlu0 %v3521_v13 }
 0x369   :  { %v3155_v19 = vmax.f32 %v3042_v27, 0.0  ;;  %v3530_v56 = vadd.f32 %v3529_v25, %v3396_v58  ;;  %v9180_v36 = vunpack.c.h.bf16 %v9174_v49  ;;  %v3177_v45 = vmax.f32 %v7511_v52, 0.0  ;;  %v6115_v49 = vld [vmem:[#allocation9 + $0xe4] ss:$8 sps:$4 sm:$0xff]  }
 0x36a   :  { %v7901_v54 = vadd.f32 %v3169_v57, %v9178_v59  ;;  %v7905_v14 = vadd.f32 %v3147_v12, %v9179_v32  ;;  %v9181_v8 = vunpack.c.h.bf16 %v7498_v18  ;;  %v3156_v59 = vmax.f32 %v3044_v6, 0.0  ;;  %4753 = vmatprep.subr.bf16.mxu0 %v6115_v49  ;;  %v3048_v6 = vpop.f32.mrb[148].mxu1 }
 0x36b   :  { %v7909_v47 = vadd.f32 %v3162_v24, %v9180_v36  ;;  %v3417_v57 = vmul.f32 %v7893_v28, %v7893_v28  ;;  %v9182_v58 = vunpack.c.l.bf16 %v7523_v50  ;;  %3531 = vadd.xlane.f32.xlu1 %v3530_v56  ;;  %v3537_v24 = vadd.f32 %v3536_v35, %v3402_v26  ;;  %4754 = vmatpush1.bf16.msra.mxu0 %v6113_v43 }
 0x36c   :  { %v7914_v5 = vadd.f32 %v3148_v23, %v9181_v8  ;;  %v3403_v27 = vmul.f32 %v7905_v14, %v7905_v14  ;;  %v9183_v52 = vunpack.c.h.bf16 %v9177_v17  ;;  %v3185_v23 = vmax.f32 %v7534_v3, 0.0 }
 0x36d   :  { %v7922_v12 = vadd.f32 %v3155_v19, %v9182_v58  ;;  %v9184_v34 = vunpack.c.h.bf16 %v7523_v50  ;;  %v3425_v42 = vmul.f32 %v7901_v54, %v7901_v54  ;;  %v3546_v17 = vadd.f32 %v3545_v62, %v3410_v63 }
 0x36e   :  { %v7926_v18 = vadd.f32 %v3170_v7, %v9183_v52  ;;  %v3404_v25 = vmul.f32 %v7914_v5, %v7914_v5  ;;  %v3538_v26 = vadd.f32 %v3537_v24, %v3403_v27  ;;  %v3418_v3 = vmul.f32 %v7909_v47, %v7909_v47  ;;  %v9185_v7 = vld [vmem:[#allocation91_spill] sm:$0xff]  ;;  %v9187_v24 = vld [vmem:[#allocation17_spill] sm:$0xff] }
 0x36f   :  { %v7931_v13 = vadd.f32 %v3156_v59, %v9184_v34  ;;  %v3411_v35 = vmul.f32 %v7922_v12, %v7922_v12  ;;  %v9186_v50 = vunpack.c.l.bf16 %v9185_v7  ;;  %v3178_v19 = vmax.f32 %v7521_v4, 0.0  ;;  %v3050_v59 = vpop.f32.mrb[149].mxu1  ;;  %v6118_v27 = vld [vmem:[#allocation9 + $0xf4] ss:$8 sps:$4 sm:$0xff]  }
 0x370   :  { %v3554_v36 = vadd.f32 %v7579_v46, %v3417_v57  ;;  %v3163_v8 = vmax.f32 %v3048_v6, 0.0  ;;  %v3539_v62 = vadd.f32 %v3538_v26, %v3404_v25  ;;  %v3426_v58 = vmul.f32 %v7926_v18, %v7926_v18  ;;  %v3052_v34 = vpop.f32.mrb[150].mxu1  ;;  %4755 = vmatprep.subr.bf16.mxu0 %v6118_v27 }
 0x371   :  { %v7943_v32 = vadd.f32 %v3177_v45, %v9186_v50  ;;  %v3412_v56 = vmul.f32 %v7931_v13, %v7931_v13  ;;  %v3547_v63 = vadd.f32 %v3546_v17, %v3411_v35  ;;  %v9188_v45 = vunpack.c.l.bf16 %v9187_v24  ;;  %v6116_v50 = vld [vmem:[#allocation9 + $0xf0] ss:$8 sps:$4 sm:$0xff]   ;;  %v3054_v35 = vpop.f32.mrb[151].mxu1 }
 0x372   :  { %v3186_v4 = vmax.f32 %v7541_v39, 0.0  ;;  %v3164_v52 = vmax.f32 %v3050_v59, 0.0  ;;  %v3563_v43 = vadd.f32 %v7586_v9, %v3425_v42  ;;  %v9189_v46 = vunpack.c.l.bf16 %v7544_v60  ;;  %3540 = vadd.xlane.f32.xlu0 %v3539_v62  ;;  %4756 = vmatpush1.bf16.msra.mxu0 %v6116_v50 }
 0x373   :  { %v7953_v49 = vadd.f32 %v3185_v23, %v9188_v45  ;;  %v3171_v25 = vmax.f32 %v3052_v34, 0.0  ;;  %v3548_v26 = vadd.f32 %v3547_v63, %v3412_v56  ;;  %v3433_v23 = vmul.f32 %v7943_v32, %v7943_v32 }
 0x374   :  { %v7959_v57 = vadd.f32 %v3163_v8, %v9189_v46  ;;  %v9190_v17 = vunpack.c.h.bf16 %v9185_v7  ;;  %v9191_v6 = vunpack.c.h.bf16 %v7544_v60  ;;  %v3172_v9 = vmax.f32 %v3054_v35, 0.0  ;;  %v6121_v7 = vld [vmem:[#allocation9 + $0x104] ss:$8 sps:$4 sm:$0xff]  }
 0x375   :  { %v3193_v42 = vmax.f32 %v7583_v51, 0.0  ;;  %v9192_v56 = vunpack.c.l.bf16 %v7566_v1  ;;  %3549 = vadd.xlane.f32.xlu1 %v3548_v26  ;;  %v3555_v63 = vadd.f32 %v3554_v36, %v3418_v3  ;;  %v9193_v60 = vunpack.c.h.bf16 %v9187_v24  ;;  %4838 = vmatprep.subr.bf16.mxu0 %v6121_v7  ;;  %v9195_v35 = vld [vmem:[#allocation36_spill] sm:$0xff] }
 0x376   :  { %v7965_v39 = vadd.f32 %v3178_v19, %v9190_v17  ;;  %v7969_v59 = vadd.f32 %v3164_v52, %v9191_v6  ;;  %v3419_v8 = vmul.f32 %v7959_v57, %v7959_v57  ;;  %v3441_v19 = vmul.f32 %v7953_v49, %v7953_v49 }
 0x377   :  { %v7976_v62 = vadd.f32 %v3171_v25, %v9192_v56  ;;  %v7982_v27 = vadd.f32 %v3186_v4, %v9193_v60  ;;  %v9194_v45 = vunpack.c.h.bf16 %v7566_v1  ;;  %v3201_v34 = vmax.f32 %v7604_v20, 0.0  ;;  %v3058_v4 = vpop.f32.mrb[152].mxu1  ;;  %v9197_v56 = vld [vmem:[#allocation99_spill] sm:$0xff] }
 0x378   :  { %v3420_v52 = vmul.f32 %v7969_v59, %v7969_v59  ;;  %v3556_v36 = vadd.f32 %v3555_v63, %v3419_v8  ;;  %v3564_v50 = vadd.f32 %v3563_v43, %v3426_v58  ;;  %v3572_v46 = vadd.f32 %v7636_v61, %v3433_v23  ;;  %v3060_v6 = vpop.f32.mrb[153].mxu1 }
 0x379   :  { %v7986_v51 = vadd.f32 %v3172_v9, %v9194_v45  ;;  %v3427_v3 = vmul.f32 %v7976_v62, %v7976_v62  ;;  %v3434_v24 = vmul.f32 %v7965_v39, %v7965_v39  ;;  %v3194_v1 = vmax.f32 %v7597_v44, 0.0  ;;  %v3062_v8 = vpop.f32.mrb[154].mxu1 }
 0x37a   :  { %v9196_v26 = vunpack.c.l.bf16 %v9195_v35  ;;  %v3179_v17 = vmax.f32 %v3058_v4, 0.0  ;;  %v3557_v9 = vadd.f32 %v3556_v36, %v3420_v52  ;;  %v3581_v43 = vadd.f32 %v7647_v21, %v3441_v19  ;;  %v3064_v52 = vpop.f32.mrb[155].mxu1  ;;  %v9200_v21 = vld [vmem:[#allocation101_spill] sm:$0xff] }
 0x37b   :  { %v3428_v25 = vmul.f32 %v7986_v51, %v7986_v51  ;;  %v3565_v58 = vadd.f32 %v3564_v50, %v3427_v3  ;;  %v3442_v61 = vmul.f32 %v7982_v27, %v7982_v27  ;;  %v3202_v23 = vmax.f32 %v7609_v16, 0.0 }
 0x37c   :  { %v8001_v20 = vadd.f32 %v3193_v42, %v9196_v26  ;;  %v3180_v44 = vmax.f32 %v3060_v6, 0.0  ;;  %v9198_v63 = vunpack.c.l.bf16 %v9197_v56  ;;  %v9199_v42 = vunpack.c.l.bf16 %v7576_v38  ;;  %3558 = vadd.xlane.f32.xlu0 %v3557_v9 }
 0x37d   :  { %v3187_v45 = vmax.f32 %v3062_v8, 0.0  ;;  %v3566_v3 = vadd.f32 %v3565_v58, %v3428_v25  ;;  %v3597_v19 = vadd.f32 %v9200_v21, %v7774_v37  ;;  %v9201_v36 = vunpack.c.h.bf16 %v9195_v35 }
 0x37e   :  { %v8009_v7 = vadd.f32 %v3201_v34, %v9198_v63  ;;  %v8013_v60 = vadd.f32 %v3179_v17, %v9199_v42  ;;  %v9202_v50 = vunpack.c.h.bf16 %v7576_v38  ;;  %v3188_v34 = vmax.f32 %v3064_v52, 0.0 }
 0x37f   :  { %v8019_v16 = vadd.f32 %v3194_v1, %v9201_v36  ;;  %v3449_v26 = vmul.f32 %v8001_v20, %v8001_v20  ;;  %v9203_v25 = vunpack.c.l.bf16 %v7611_v31  ;;  %3567 = vadd.xlane.f32.xlu1 %v3566_v3  ;;  %v3573_v37 = vadd.f32 %v3572_v46, %v3434_v24 }
 0x380   :  { %v8023_v4 = vadd.f32 %v3180_v44, %v9202_v50  ;;  %v3435_v17 = vmul.f32 %v8013_v60, %v8013_v60  ;;  %v3589_v1 = vadd.f32 %v7730_v0, %v7670_v41  ;;  %v9204_v38 = vunpack.c.h.bf16 %v9197_v56 }
 0x381   :  { %v8031_v6 = vadd.f32 %v3187_v45, %v9203_v25  ;;  %v9205_v9 = vunpack.c.h.bf16 %v7611_v31  ;;  %v3457_v8 = vmul.f32 %v8009_v7, %v8009_v7  ;;  %v3582_v63 = vadd.f32 %v3581_v43, %v3442_v61  ;;  %v6358_v31 = vld [vmem:[#allocation3 + $0x1f8] sm:$0xff] }
 0x382   :  { %v8037_v35 = vadd.f32 %v3202_v23, %v9204_v38  ;;  %v3436_v44 = vmul.f32 %v8023_v4, %v8023_v4  ;;  %v3574_v24 = vadd.f32 %v3573_v37, %v3435_v17  ;;  %v3598_v41 = vadd.f32 %v3597_v19, %v7778_v33  ;;  %v3068_v23 = vpop.f32.mrb[156].mxu1 }
 0x383   :  { %v8041_v58 = vadd.f32 %v3188_v34, %v9205_v9  ;;  %v3443_v46 = vmul.f32 %v8031_v6, %v8031_v6  ;;  %v3450_v0 = vmul.f32 %v8019_v16, %v8019_v16  ;;  %v267_v56 = vunpack.c.l.bf16 %v6358_v31  ;;  %v3070_v3 = vpop.f32.mrb[157].mxu1 }
 0x384   :  { %v3590_v45 = vadd.f32 %v3589_v1, %v3449_v26  ;;  %v3195_v52 = vmax.f32 %v3068_v23, 0.0  ;;  %v3575_v21 = vadd.f32 %v3574_v24, %v3436_v44  ;;  %v3458_v50 = vmul.f32 %v8037_v35, %v8037_v35  ;;  %v3072_v61 = vpop.f32.mrb[158].mxu1 }
 0x385   :  { %v3444_v42 = vmul.f32 %v8041_v58, %v8041_v58  ;;  %v3583_v36 = vadd.f32 %v3582_v63, %v3443_v46  ;;  %v3196_v43 = vmax.f32 %v3070_v3, 0.0  ;;  %v268_v33 = vunpack.c.h.bf16 %v6358_v31  ;;  %v3074_v37 = vpop.f32.mrb[159].mxu1 }
 0x386   :  { %v3599_v19 = vadd.f32 %v3598_v41, %v3457_v8  ;;  %v9206_v34 = vunpack.c.l.bf16 %v7633_v2  ;;  %v3203_v25 = vmax.f32 %v3072_v61, 0.0  ;;  %3576 = vadd.xlane.f32.xlu0 %v3575_v21  ;;  %v9207_v26 = vunpack.c.h.bf16 %v7633_v2 }
 0x387   :  { %v3584_v38 = vadd.f32 %v3583_v36, %v3444_v42  ;;  %v3204_v9 = vmax.f32 %v3074_v37, 0.0  ;;  %v3591_v8 = vadd.f32 %v3590_v45, %v3450_v0  ;;  %v9209_v37 = vld [vmem:[#allocation51_spill] sm:$0xff] }
 0x388   :  { %v8058_v17 = vadd.f32 %v3195_v52, %v9206_v34  ;;  %v8062_v1 = vadd.f32 %v3196_v43, %v9207_v26  ;;  %v8066_v46 = vadd.f32 %v3203_v25, %v267_v56  ;;  %v3600_v2 = vadd.f32 %v3599_v19, %v3458_v50  ;;  %v9208_v34 = vld [vmem:[#allocation52_spill] sm:$0xff] }
 0x389   :  { %3585 = vadd.xlane.f32.xlu1 %v3584_v38  ;;  %v8068_v24 = vadd.f32 %v3204_v9, %v268_v33  ;;  %v9210_v26 = vld [vmem:[#allocation16_spill] sm:$0xff] }
 0x38a   :  { %v3451_v44 = vmul.f32 %v8058_v17, %v8058_v17  ;;  %v3452_v63 = vmul.f32 %v8062_v1, %v8062_v1  ;;  %v3459_v41 = vmul.f32 %v8066_v46, %v8066_v46 }
 0x38b   :  { %v3460_v31 = vmul.f32 %v8068_v24, %v8068_v24 }
 0x38c   :  { %v3592_v23 = vadd.f32 %v3591_v8, %v3451_v44  ;;  %v3601_v52 = vadd.f32 %v3600_v2, %v3459_v41  ;;  %v9211_v44 = vld [vmem:[#allocation98_spill] sm:$0xff] }
 0x38e   :  { %v3593_v42 = vadd.f32 %v3592_v23, %v3452_v63  ;;  %v3602_v56 = vadd.f32 %v3601_v52, %v3460_v31  ;;  %v9216_v52 = vld [vmem:[#allocation55_spill] sm:$0xff] }
 0x390   :  { %3594 = vadd.xlane.f32.xlu0 %v3593_v42  ;;  %3603 = vadd.xlane.f32.xlu1 %v3602_v56 }
 0x3d8   :  { %v3469_v3 = vpop.xlane.xlu0 %3468 }
 0x3d9   :  { %v3605_v0 = vmax.f32 %v3469_v3, 1e-30  ;;  %v9217_v3 = vld [vmem:[#allocation54_spill] sm:$0xff] }
 0x3db   :  { %6263 = vrsqrt.f32 %v3605_v0 }
 0x3dc   :  { %v3478_v45 = vpop.xlane.xlu0 %3477 }
 0x3dd   :  { %v3606_v21 = vmax.f32 %v3478_v45, 1e-30  ;;  %v9218_v45 = vld [vmem:[#allocation100_spill] sm:$0xff] }
 0x3df   :  { %6265 = vrsqrt.f32 %v3606_v21 }
 0x3e2   :  { %v3487_v36 = vpop.xlane.xlu1 %3486 }
 0x3e3   :  { %v3607_v43 = vmax.f32 %v3487_v36, 1e-30  ;;  %v9219_v36 = vld [vmem:[#allocation19_spill] sm:$0xff] }
 0x3e5   :  { %6267 = vrsqrt.f32 %v3607_v43  ;;  %v6264_v33 = vpop.eup %6263 }
 0x3e6   :  { %v3496_v61 = vpop.xlane.xlu1 %3495  ;;  %v3638_v25 = vmul.f32 %v6264_v33, %v9208_v34  ;;  %v3637_v38 = vmul.f32 %v6264_v33, %v9209_v37  ;;  %v8079_v9 = vmul.f32 %v6264_v33, %v9210_v26  ;;  %v8082_v8 = vmul.f32 %v6264_v33, %v9211_v44  ;;  %v6119_v37 = vld [vmem:[#allocation9 + $0x100] ss:$8 sps:$4 sm:$0xff]  }
 0x3e7   :  { %v3608_v50 = vmax.f32 %v3496_v61, 1e-30  ;;  %v8085_v23 = vmul.f32 %v6264_v33, %v7622_v40  ;;  %v8088_v2 = vmul.f32 %v6264_v33, %v7590_v10  ;;  %v8091_v31 = vmul.f32 %v6264_v33, %v7692_v55  ;;  %v9220_v61 = vld [vmem:[#allocation56_spill] sm:$0xff]  ;;  %v9222_v10 = vld [vmem:[#allocation111_spill] sm:$0xff] }
 0x3e8   :  { %9212 = vst [vmem:[#allocation84_spill] sm:$0xff] %v8082_v8 }
 0x3e9   :  { %6269 = vrsqrt.f32 %v3608_v50  ;;  %v6266_v63 = vpop.eup %6265  ;;  %9213 = vst [vmem:[#allocation26_spill] sm:$0xff] %v8085_v23  ;;  %9214 = vst [vmem:[#allocation106_spill] sm:$0xff] %v8088_v2 }
 0x3ea   :  { %9215 = vst [vmem:[#allocation30_spill] sm:$0xff] %v8091_v31  ;;  %v3646_v56 = vmul.f32 %v6266_v63, %v9216_v52  ;;  %v3645_v0 = vmul.f32 %v6266_v63, %v9217_v3  ;;  %v8096_v21 = vmul.f32 %v6266_v63, %v9218_v45  ;;  %v8099_v43 = vmul.f32 %v6266_v63, %v9219_v36  ;;  %v6124_v3 = vld [vmem:[#allocation9 + $0x114] ss:$8 sps:$4 sm:$0xff]   ;;  %v9240_v31 = vld [vmem:[#allocation61_spill] sm:$0xff] }
 0x3eb   :  { %v3505_v19 = vpop.xlane.xlu0 %3504  ;;  %v8102_v50 = vmul.f32 %v6266_v63, %v9220_v61  ;;  %v8116_v45 = vmul.f32 %v6266_v63, %v7705_v22  ;;  %v9231_v22 = vld [vmem:[#allocation102_spill] sm:$0xff] }
 0x3ec   :  { %v3609_v41 = vmax.f32 %v3505_v19, 1e-30  ;;  %v8105_v19 = vmul.f32 %v6266_v63, %v9222_v10  ;;  %v3766_v55 = vpack.c.bf16 %v3646_v56, %v3638_v25  ;;  %v3765_v34 = vpack.c.bf16 %v3645_v0, %v3637_v38  ;;  %v9225_v25 = vld [vmem:[#allocation59_spill] sm:$0xff]  ;;  %v9226_v0 = vld [vmem:[#allocation117_spill] sm:$0xff] }
 0x3ed   :  { %9221 = vst [vmem:[#allocation32_spill] sm:$0xff] %v8102_v50  ;;  %9224 = vst [vmem:[#allocation85_spill] sm:$0xff] %v8116_v45  ;;  %v8122_v36 = vmul.f32 %v6264_v33, %v9226_v0  ;;  %v6127_v0 = vld [vmem:[#allocation9 + $0x124] ss:$8 sps:$4 sm:$0xff]  }
 0x3ee   :  { %v3514_v42 = vpop.xlane.xlu1 %3513  ;;  %6271 = vrsqrt.f32 %v3609_v41  ;;  %9223 = vst [vmem:[#allocation35_spill] sm:$0xff] %v8105_v19  ;;  %4757 = vmatprep.mubr.bf16.mxu0 %v3766_v55  ;;  %v6122_v41 = vld [vmem:[#allocation9 + $0x110] ss:$8 sps:$4 sm:$0xff]   ;;  %v9241_v45 = vld [vmem:[#allocation60_spill] sm:$0xff] }
 0x3ef   :  { %v3610_v40 = vmax.f32 %v3514_v42, 1e-30  ;;  %v6268_v52 = vpop.eup %6267  ;;  %4758 = vmatmul.mubr.bf16.vlgmr.msra.gmra.mrb[32].mxu0 %v3765_v34  ;;  %9227 = vst [vmem:[#allocation108_spill] sm:$0xff] %v8122_v36  ;;  %v9230_v42 = vld [vmem:[#allocation58_spill] sm:$0xff]  ;;  %v9245_v50 = vld [vmem:[#allocation116_spill] sm:$0xff] }
 0x3f0   :  { %v3654_v38 = vmul.f32 %v6268_v52, %v9225_v25  ;;  %4839 = vmatpush1.bf16.msra.mxu0 %v6119_v37  ;;  %v3653_v44 = vmul.f32 %v6268_v52, %v9230_v42  ;;  %v8129_v26 = vmul.f32 %v6268_v52, %v9231_v22  ;;  %v9233_v55 = vld [vmem:[#allocation38_spill] sm:$0xff]  ;;  %v9235_v25 = vld [vmem:[#allocation115_spill] sm:$0xff]  ;;  %v8143_v42 = vmul.f32 %v6268_v52, %v7746_v29 }
 0x3f1   :  { %6273 = vrsqrt.f32 %v3610_v40  ;;  %v9228_v40 = vld [vmem:[#allocation118_spill] sm:$0xff]  ;;  %v8132_v34 = vmul.f32 %v6268_v52, %v9233_v55  ;;  %v8135_v2 = vmul.f32 %v6268_v52, %v9235_v25  ;;  %4840 = vmatprep.subr.bf16.mxu0 %v6124_v3  ;;  %v9242_v25 = vld [vmem:[#allocation103_spill] sm:$0xff] }
 0x3f2   :  { %v8125_v61 = vmul.f32 %v6266_v63, %v9228_v40  ;;  %9232 = vst [vmem:[#allocation91_spill] sm:$0xff] %v8129_v26  ;;  %v9237_v63 = vld [vmem:[#allocation113_spill] sm:$0xff]  ;;  %9239 = vst [vmem:[#allocation101_spill] sm:$0xff] %v8143_v42  ;;  %v9247_v37 = vld [vmem:[#allocation114_spill] sm:$0xff] }
 0x3f3   :  { %9234 = vst [vmem:[#allocation17_spill] sm:$0xff] %v8132_v34  ;;  %9236 = vst [vmem:[#allocation36_spill] sm:$0xff] %v8135_v2  ;;  %v6270_v56 = vpop.eup %6269  ;;  %v8138_v40 = vmul.f32 %v6268_v52, %v9237_v63  ;;  %v6133_v26 = vld [vmem:[#allocation9 + $0x144] ss:$8 sps:$4 sm:$0xff]  }
 0x3f4   :  { %9229 = vst [vmem:[#allocation90_spill] sm:$0xff] %v8125_v61  ;;  %v3662_v55 = vmul.f32 %v6270_v56, %v9240_v31  ;;  %v3661_v19 = vmul.f32 %v6270_v56, %v9241_v45  ;;  %v8148_v23 = vmul.f32 %v6270_v56, %v9242_v25  ;;  %v8154_v8 = vmul.f32 %v6270_v56, %v9245_v50  ;;  %v6125_v31 = vld [vmem:[#allocation9 + $0x120] ss:$8 sps:$4 sm:$0xff]   ;;  %v9256_v50 = vld [vmem:[#allocation119_spill] sm:$0xff] }
 0x3f5   :  { %v3523_v10 = vpop.xlane.xlu0 %3522  ;;  %9238 = vst [vmem:[#allocation99_spill] sm:$0xff] %v8138_v40  ;;  %v8157_v36 = vmul.f32 %v6270_v56, %v9247_v37  ;;  %4841 = vmatpush1.bf16.msra.mxu0 %v6122_v41  ;;  %v8168_v41 = vmul.f32 %v6270_v56, %v7764_v48  ;;  %v9258_v37 = vld [vmem:[#allocation92_spill] sm:$0xff]  ;;  %v6128_v40 = vld [vmem:[#allocation9 + $0x130] ss:$8 sps:$4 sm:$0xff]  }
 0x3f6   :  { %v3611_v33 = vmax.f32 %v3523_v10, 1e-30  ;;  %v9243_v10 = vld [vmem:[#allocation39_spill] sm:$0xff]  ;;  %9246 = vst [vmem:[#allocation51_spill] sm:$0xff] %v8154_v8  ;;  %v3774_v29 = vpack.c.bf16 %v3662_v55, %v3654_v38  ;;  %v3773_v61 = vpack.c.bf16 %v3661_v19, %v3653_v44  ;;  %4842 = vmatprep.subr.bf16.mxu0 %v6127_v0  ;;  %v9250_v19 = vld [vmem:[#allocation64_spill] sm:$0xff]  ;;  %v9251_v38 = vld [vmem:[#allocation25_spill] sm:$0xff] }
 0x3f7   :  { %v8151_v3 = vmul.f32 %v6270_v56, %v9243_v10  ;;  %9248 = vst [vmem:[#allocation16_spill] sm:$0xff] %v8157_v36  ;;  %9249 = vst [vmem:[#allocation98_spill] sm:$0xff] %v8168_v41  ;;  %v9252_v55 = vld [vmem:[#allocation40_spill] sm:$0xff]  ;;  %v9254_v0 = vld [vmem:[#allocation97_spill] sm:$0xff] }
 0x3f8   :  { %v3532_v22 = vpop.xlane.xlu1 %3531  ;;  %6275 = vrsqrt.f32 %v3611_v33  ;;  %v6272_v10 = vpop.eup %6271  ;;  %v6130_v33 = vld [vmem:[#allocation9 + $0x134] ss:$8 sps:$4 sm:$0xff]   ;;  %4767 = vmatprep.mubr.bf16.mxu0 %v3774_v29  ;;  %v9267_v29 = vld [vmem:[#allocation104_spill] sm:$0xff] }
 0x3f9   :  { %9244 = vst [vmem:[#allocation52_spill] sm:$0xff] %v8151_v3  ;;  %v3612_v63 = vmax.f32 %v3532_v22, 1e-30  ;;  %v3670_v44 = vmul.f32 %v6272_v10, %v9250_v19  ;;  %v8172_v22 = vmul.f32 %v6272_v10, %v9251_v38  ;;  %v8175_v25 = vmul.f32 %v6272_v10, %v9252_v55  ;;  %4768 = vmatmul.mubr.bf16.gmra.mrb[36].mxu0 %v3773_v61  ;;  %v9260_v19 = vld [vmem:[#allocation18_spill] sm:$0xff]  ;;  %v9264_v61 = vld [vmem:[#allocation105_spill] sm:$0xff]  ;;  %v9271_v41 = vld [vmem:[#allocation63_spill] sm:$0xff] }
 0x3fa   :  { %v8181_v2 = vmul.f32 %v6272_v10, %v9256_v50  ;;  %v8184_v48 = vmul.f32 %v6272_v10, %v9258_v37  ;;  %v8189_v38 = vmul.f32 %v6270_v56, %v9260_v19  ;;  %4843 = vmatpush1.bf16.msra.mxu0 %v6125_v31  ;;  %v9262_v36 = vld [vmem:[#allocation66_spill] sm:$0xff] }
 0x3fb   :  { %6277 = vrsqrt.f32 %v3612_v63  ;;  %9253 = vst [vmem:[#allocation55_spill] sm:$0xff] %v8175_v25  ;;  %v8178_v63 = vmul.f32 %v6268_v52, %v9254_v0  ;;  %v6274_v45 = vpop.eup %6273  ;;  %v9263_v0 = vld [vmem:[#allocation65_spill] sm:$0xff]  ;;  %v9265_v50 = vld [vmem:[#allocation22_spill] sm:$0xff]  ;;  %4844 = vmatprep.subr.bf16.mxu0 %v6130_v33  ;;  %v9274_v33 = vld [vmem:[#allocation23_spill] sm:$0xff] }
 0x3fc   :  { %9257 = vst [vmem:[#allocation100_spill] sm:$0xff] %v8181_v2  ;;  %9259 = vst [vmem:[#allocation19_spill] sm:$0xff] %v8184_v48  ;;  %v3678_v52 = vmul.f32 %v6274_v45, %v9262_v36  ;;  %v3677_v8 = vmul.f32 %v6274_v45, %v9263_v0  ;;  %v8194_v34 = vmul.f32 %v6274_v45, %v9264_v61  ;;  %v9269_v56 = vld [vmem:[#allocation70_spill] sm:$0xff] }
 0x3fd   :  { %9255 = vst [vmem:[#allocation54_spill] sm:$0xff] %v8178_v63  ;;  %9261 = vst [vmem:[#allocation56_spill] sm:$0xff] %v8189_v38  ;;  %v8197_v3 = vmul.f32 %v6274_v45, %v9265_v50  ;;  %v8200_v42 = vmul.f32 %v6274_v45, %v9267_v29  ;;  %v8203_v31 = vmul.f32 %v6274_v45, %v9269_v56  ;;  %v6136_v50 = vld [vmem:[#allocation9 + $0x154] ss:$8 sps:$4 sm:$0xff]  }
 0x3fe   :  { %v3782_v0 = vpack.c.bf16 %v3678_v52, %v3670_v44  ;;  %v3669_v61 = vmul.f32 %v6272_v10, %v9271_v41  ;;  %4845 = vmatpush1.bf16.msra.mxu0 %v6128_v40  ;;  %v6131_v44 = vld [vmem:[#allocation9 + $0x140] ss:$8 sps:$4 sm:$0xff]   ;;  %v9278_v29 = vld [vmem:[#allocation78_spill] sm:$0xff] }
 0x3ff   :  { %v3541_v55 = vpop.xlane.xlu0 %3540  ;;  %9266 = vst [vmem:[#allocation111_spill] sm:$0xff] %v8197_v3  ;;  %9268 = vst [vmem:[#allocation59_spill] sm:$0xff] %v8200_v42  ;;  %v9272_v52 = vld [vmem:[#allocation29_spill] sm:$0xff]  ;;  %4846 = vmatprep.subr.bf16.mxu0 %v6133_v26  ;;  %v8226_v2 = vmul.f32 %v6274_v45, %v9278_v29  ;;  %v9282_v56 = vld [vmem:[#allocation42_spill] sm:$0xff] }
 0x400   :  { %v3613_v37 = vmax.f32 %v3541_v55, 1e-30  ;;  %9270 = vst [vmem:[#allocation117_spill] sm:$0xff] %v8203_v31  ;;  %4777 = vmatprep.mubr.bf16.mxu0 %v3782_v0  ;;  %v3781_v36 = vpack.c.bf16 %v3677_v8, %v3669_v61  ;;  %v8217_v41 = vmul.f32 %v6274_v45, %v9272_v52  ;;  %v9280_v0 = vld [vmem:[#allocation68_spill] sm:$0xff]  ;;  %v9281_v8 = vld [vmem:[#allocation31_spill] sm:$0xff]  ;;  %v9289_v42 = vld [vmem:[#allocation21_spill] sm:$0xff] }
 0x401   :  { %9279 = vst [vmem:[#allocation38_spill] sm:$0xff] %v8226_v2  ;;  %v9284_v26 = vld [vmem:[#allocation107_spill] sm:$0xff]  ;;  %v9293_v45 = vld [vmem:[#allocation77_spill] sm:$0xff] }
 0x402   :  { %v3550_v19 = vpop.xlane.xlu1 %3549  ;;  %6279 = vrsqrt.f32 %v3613_v37  ;;  %9273 = vst [vmem:[#allocation118_spill] sm:$0xff] %v8217_v41  ;;  %v6276_v63 = vpop.eup %6275  ;;  %v8220_v37 = vmul.f32 %v6272_v10, %v9274_v33  ;;  %4778 = vmatmul.mubr.bf16.gmra.mrb[40].mxu0 %v3781_v36  ;;  %v6134_v29 = vld [vmem:[#allocation9 + $0x150] ss:$8 sps:$4 sm:$0xff]   ;;  %v6139_v41 = vld [vmem:[#allocation9 + $0x164] ss:$8 sps:$4 sm:$0xff]  }
 0x403   :  { %v3614_v55 = vmax.f32 %v3550_v19, 1e-30  ;;  %v9276_v19 = vld [vmem:[#allocation20_spill] sm:$0xff]  ;;  %v3686_v40 = vmul.f32 %v6276_v63, %v9280_v0  ;;  %v8230_v61 = vmul.f32 %v6276_v63, %v9281_v8  ;;  %v8236_v48 = vmul.f32 %v6276_v63, %v9284_v26  ;;  %4847 = vmatpush1.bf16.msra.mxu0 %v6131_v44  ;;  %v9287_v8 = vld [vmem:[#allocation33_spill] sm:$0xff]  ;;  %v9288_v36 = vld [vmem:[#allocation43_spill] sm:$0xff] }
 0x404   :  { %9275 = vst [vmem:[#allocation58_spill] sm:$0xff] %v8220_v37  ;;  %v8223_v38 = vmul.f32 %v6272_v10, %v9276_v19  ;;  %v9286_v19 = vld [vmem:[#allocation72_spill] sm:$0xff]  ;;  %v8250_v26 = vmul.f32 %v6276_v63, %v9289_v42  ;;  %4848 = vmatprep.subr.bf16.mxu0 %v6136_v50  ;;  %v9291_v10 = vld [vmem:[#allocation71_spill] sm:$0xff] }
 0x405   :  { %6281 = vrsqrt.f32 %v3614_v55  ;;  %v6278_v52 = vpop.eup %6277  ;;  %v8233_v55 = vmul.f32 %v6276_v63, %v9282_v56  ;;  %9285 = vst [vmem:[#allocation113_spill] sm:$0xff] %v8236_v48  ;;  %v9295_v2 = vld [vmem:[#allocation67_spill] sm:$0xff]  ;;  %v9309_v48 = vld [vmem:[#allocation41_spill] sm:$0xff] }
 0x406   :  { %9277 = vst [vmem:[#allocation102_spill] sm:$0xff] %v8223_v38  ;;  %v3694_v0 = vmul.f32 %v6278_v52, %v9286_v19  ;;  %v8244_v31 = vmul.f32 %v6278_v52, %v9287_v8  ;;  %v8247_v56 = vmul.f32 %v6278_v52, %v9288_v36  ;;  %9290 = vst [vmem:[#allocation61_spill] sm:$0xff] %v8250_v26 }
 0x407   :  { %9283 = vst [vmem:[#allocation115_spill] sm:$0xff] %v8233_v55  ;;  %v3693_v37 = vmul.f32 %v6278_v52, %v9291_v10  ;;  %v8254_v44 = vmul.f32 %v6278_v52, %v7818_v30  ;;  %v8257_v38 = vmul.f32 %v6278_v52, %v9293_v45  ;;  %v3685_v3 = vmul.f32 %v6276_v63, %v9295_v2  ;;  %v6137_v45 = vld [vmem:[#allocation9 + $0x160] ss:$8 sps:$4 sm:$0xff]   ;;  %v9300_v10 = vld [vmem:[#allocation27_spill] sm:$0xff] }
 0x408   :  { %v3790_v8 = vpack.c.bf16 %v3694_v0, %v3686_v40  ;;  %4849 = vmatpush1.bf16.msra.mxu0 %v6134_v29  ;;  %v8269_v40 = vmul.f32 %v6278_v52, %v7878_v53  ;;  %v8272_v2 = vmul.f32 %v6278_v52, %v7868_v15  ;;  %v8278_v36 = vmul.f32 %v6276_v63, %v9300_v10  ;;  %v9303_v30 = vld [vmem:[#allocation109_spill] sm:$0xff]  ;;  %v9304_v15 = vld [vmem:[#allocation44_spill] sm:$0xff]  ;;  %v6140_v10 = vld [vmem:[#allocation9 + $0x170] ss:$8 sps:$4 sm:$0xff]  }
 0x409   :  { %v3559_v33 = vpop.xlane.xlu0 %3558  ;;  %9292 = vst [vmem:[#allocation60_spill] sm:$0xff] %v8254_v44  ;;  %9294 = vst [vmem:[#allocation103_spill] sm:$0xff] %v8257_v38  ;;  %v3789_v0 = vpack.c.bf16 %v3693_v37, %v3685_v3  ;;  %4850 = vmatprep.subr.bf16.mxu0 %v6139_v41  ;;  %v9310_v41 = vld [vmem:[#allocation75_spill] sm:$0xff] }
 0x40a   :  { %v3615_v25 = vmax.f32 %v3559_v33, 1e-30  ;;  %4787 = vmatprep.mubr.bf16.mxu0 %v3790_v8  ;;  %9296 = vst [vmem:[#allocation39_spill] sm:$0xff] %v8269_v40  ;;  %9297 = vst [vmem:[#allocation116_spill] sm:$0xff] %v8272_v2  ;;  %v9302_v8 = vld [vmem:[#allocation74_spill] sm:$0xff]  ;;  %v9312_v2 = vld [vmem:[#allocation73_spill] sm:$0xff] }
 0x40b   :  { %9301 = vst [vmem:[#allocation64_spill] sm:$0xff] %v8278_v36  ;;  %4788 = vmatmul.mubr.bf16.gmra.mrb[44].mxu0 %v3789_v0  ;;  %v9308_v0 = vld [vmem:[#allocation45_spill] sm:$0xff] }
 0x40c   :  { %v3568_v19 = vpop.xlane.xlu1 %3567  ;;  %6283 = vrsqrt.f32 %v3615_v25  ;;  %v6280_v33 = vpop.eup %6279  ;;  %v6142_v25 = vld [vmem:[#allocation9 + $0x174] ss:$8 sps:$4 sm:$0xff]   ;;  %4851 = vmatpush1.bf16.msra.mxu0 %v6137_v45  ;;  %v6145_v40 = vld [vmem:[#allocation9 + $0x184] ss:$8 sps:$4 sm:$0xff]  }
 0x40d   :  { %v3616_v50 = vmax.f32 %v3568_v19, 1e-30  ;;  %v9298_v19 = vld [vmem:[#allocation24_spill] sm:$0xff]  ;;  %v3702_v29 = vmul.f32 %v6280_v33, %v9302_v8  ;;  %v8282_v26 = vmul.f32 %v6280_v33, %v9303_v30  ;;  %v8285_v52 = vmul.f32 %v6280_v33, %v9304_v15  ;;  %4852 = vmatprep.subr.bf16.mxu0 %v6142_v25 }
 0x40e   :  { %v8275_v42 = vmul.f32 %v6276_v63, %v9298_v19  ;;  %v9306_v19 = vld [vmem:[#allocation76_spill] sm:$0xff]  ;;  %v3701_v55 = vmul.f32 %v6280_v33, %v9312_v2 }
 0x40f   :  { %6285 = vrsqrt.f32 %v3616_v50  ;;  %v6282_v53 = vpop.eup %6281  ;;  %v9305_v50 = vld [vmem:[#allocation83_spill] sm:$0xff]  ;;  %v9307_v8 = vld [vmem:[#allocation48_spill] sm:$0xff] }
 0x410   :  { %9299 = vst [vmem:[#allocation114_spill] sm:$0xff] %v8275_v42  ;;  %v8288_v3 = vmul.f32 %v6280_v33, %v9305_v50  ;;  %v3710_v30 = vmul.f32 %v6282_v53, %v9306_v19  ;;  %v8296_v38 = vmul.f32 %v6282_v53, %v9307_v8  ;;  %v8299_v15 = vmul.f32 %v6282_v53, %v9308_v0  ;;  %v9311_v63 = vld [vmem:[#allocation28_spill] sm:$0xff] }
 0x411   :  { %v8302_v50 = vmul.f32 %v6280_v33, %v9309_v48  ;;  %v3709_v42 = vmul.f32 %v6282_v53, %v9310_v41  ;;  %v8306_v45 = vmul.f32 %v6282_v53, %v7874_v11  ;;  %v8309_v36 = vmul.f32 %v6282_v53, %v9311_v63  ;;  %4853 = vmatpush1.bf16.msra.mxu0 %v6140_v10  ;;  %v6143_v63 = vld [vmem:[#allocation9 + $0x180] ss:$8 sps:$4 sm:$0xff]  }
 0x412   :  { %v3798_v8 = vpack.c.bf16 %v3710_v30, %v3702_v29  ;;  %v8321_v29 = vmul.f32 %v6282_v53, %v7931_v13  ;;  %v8324_v2 = vmul.f32 %v6282_v53, %v7922_v12  ;;  %4854 = vmatprep.subr.bf16.mxu0 %v6145_v40  ;;  %v8330_v41 = vmul.f32 %v6280_v33, %v7905_v14  ;;  %v9318_v11 = vld [vmem:[#allocation37_spill] sm:$0xff]  ;;  %v9319_v12 = vld [vmem:[#allocation47_spill] sm:$0xff] }
 0x413   :  { %v3577_v37 = vpop.xlane.xlu0 %3576  ;;  %v3797_v30 = vpack.c.bf16 %v3709_v42, %v3701_v55  ;;  %v6146_v40 = vld [vmem:[#allocation9 + $0x190] ss:$8 sps:$4 sm:$0xff]  }
 0x414   :  { %v3617_v44 = vmax.f32 %v3577_v37, 1e-30  ;;  %4797 = vmatprep.mubr.bf16.mxu0 %v3798_v8  ;;  %9313 = vst [vmem:[#allocation25_spill] sm:$0xff] %v8321_v29  ;;  %9314 = vst [vmem:[#allocation40_spill] sm:$0xff] %v8324_v2  ;;  %v9317_v8 = vld [vmem:[#allocation80_spill] sm:$0xff] }
 0x415   :  { %9316 = vst [vmem:[#allocation119_spill] sm:$0xff] %v8330_v41  ;;  %4798 = vmatmul.mubr.bf16.gmra.mrb[48].mxu0 %v3797_v30  ;;  %v9322_v30 = vld [vmem:[#allocation34_spill] sm:$0xff]  ;;  %v6151_v29 = vld [vmem:[#allocation9 + $0x1a4] ss:$8 sps:$4 sm:$0xff]   ;;  %v9325_v41 = vld [vmem:[#allocation79_spill] sm:$0xff] }
 0x416   :  { %v3586_v19 = vpop.xlane.xlu1 %3585  ;;  %6287 = vrsqrt.f32 %v3617_v44  ;;  %v6284_v37 = vpop.eup %6283  ;;  %v6148_v44 = vld [vmem:[#allocation9 + $0x194] ss:$8 sps:$4 sm:$0xff]   ;;  %4855 = vmatpush1.bf16.msra.mxu0 %v6143_v63 }
 0x417   :  { %v3618_v25 = vmax.f32 %v3586_v19, 1e-30  ;;  %v8327_v19 = vmul.f32 %v6280_v33, %v7914_v5  ;;  %v3718_v10 = vmul.f32 %v6284_v37, %v9317_v8  ;;  %v8334_v48 = vmul.f32 %v6284_v37, %v9318_v11  ;;  %v9320_v33 = vld [vmem:[#allocation82_spill] sm:$0xff]  ;;  %4856 = vmatprep.subr.bf16.mxu0 %v6148_v44  ;;  %v9324_v5 = vld [vmem:[#allocation81_spill] sm:$0xff] }
 0x418   :  { %v8337_v53 = vmul.f32 %v6284_v37, %v9319_v12  ;;  %v8340_v55 = vmul.f32 %v6284_v37, %v7909_v47  ;;  %v9321_v11 = vld [vmem:[#allocation46_spill] sm:$0xff]  ;;  %v8354_v47 = vmul.f32 %v6284_v37, %v7893_v28  ;;  %v3717_v2 = vmul.f32 %v6284_v37, %v9325_v41 }
 0x419   :  { %6289 = vrsqrt.f32 %v3618_v25  ;;  %9315 = vst [vmem:[#allocation97_spill] sm:$0xff] %v8327_v19  ;;  %v6286_v13 = vpop.eup %6285 }
 0x41a   :  { %v3726_v25 = vmul.f32 %v6286_v13, %v9320_v33  ;;  %v8348_v8 = vmul.f32 %v6286_v13, %v9321_v11  ;;  %v8351_v12 = vmul.f32 %v6286_v13, %v9322_v30  ;;  %9323 = vst [vmem:[#allocation92_spill] sm:$0xff] %v8354_v47  ;;  %v3725_v19 = vmul.f32 %v6286_v13, %v9324_v5 }
 0x41b   :  { %v8358_v63 = vmul.f32 %v6286_v13, %v7926_v18  ;;  %v8361_v14 = vmul.f32 %v6286_v13, %v7901_v54  ;;  %4857 = vmatpush1.bf16.msra.mxu0 %v6146_v40  ;;  %v6149_v54 = vld [vmem:[#allocation9 + $0x1a0] ss:$8 sps:$4 sm:$0xff]   ;;  %v8376_v41 = vmul.f32 %v6286_v13, %v7976_v62  ;;  %v8382_v5 = vmul.f32 %v6284_v37, %v7959_v57 }
 0x41c   :  { %v3806_v11 = vpack.c.bf16 %v3726_v25, %v3718_v10  ;;  %v8373_v10 = vmul.f32 %v6286_v13, %v7986_v51  ;;  %v3805_v25 = vpack.c.bf16 %v3725_v19, %v3717_v2  ;;  %4858 = vmatprep.subr.bf16.mxu0 %v6151_v29  ;;  %v9331_v18 = vld [vmem:[#allocation53_spill] sm:$0xff]  ;;  %v9332_v51 = vld [vmem:[#allocation50_spill] sm:$0xff] }
 0x41d   :  { %v3595_v42 = vpop.xlane.xlu0 %3594  ;;  %v3604_v33 = vpop.xlane.xlu1 %3603  ;;  %9327 = vst [vmem:[#allocation66_spill] sm:$0xff] %v8376_v41  ;;  %9329 = vst [vmem:[#allocation105_spill] sm:$0xff] %v8382_v5  ;;  %v9333_v19 = vld [vmem:[#allocation89_spill] sm:$0xff] }
 0x41e   :  { %v3619_v0 = vmax.f32 %v3595_v42, 1e-30  ;;  %v3620_v44 = vmax.f32 %v3604_v33, 1e-30  ;;  %4807 = vmatprep.mubr.bf16.mxu0 %v3806_v11  ;;  %9326 = vst [vmem:[#allocation18_spill] sm:$0xff] %v8373_v10  ;;  %v8379_v33 = vmul.f32 %v6284_v37, %v7969_v59  ;;  %v9330_v11 = vld [vmem:[#allocation87_spill] sm:$0xff] }
 0x41f   :  { %4808 = vmatmul.mubr.bf16.gmra.mrb[52].mxu0 %v3805_v25  ;;  %v6152_v37 = vld [vmem:[#allocation9 + $0x1b0] ss:$8 sps:$4 sm:$0xff]   ;;  %v9340_v41 = vld [vmem:[#allocation93_spill] sm:$0xff] }
 0x420   :  { %6291 = vrsqrt.f32 %v3619_v0  ;;  %v6288_v42 = vpop.eup %6287  ;;  %v6154_v0 = vld [vmem:[#allocation9 + $0x1b4] ss:$8 sps:$4 sm:$0xff]   ;;  %9328 = vst [vmem:[#allocation65_spill] sm:$0xff] %v8379_v33  ;;  %4859 = vmatpush1.bf16.msra.mxu0 %v6149_v54  ;;  %v9341_v33 = vld [vmem:[#allocation112_spill] sm:$0xff] }
 0x421   :  { %6293 = vrsqrt.f32 %v3620_v44  ;;  %v3734_v40 = vmul.f32 %v6288_v42, %v9330_v11  ;;  %v8386_v28 = vmul.f32 %v6288_v42, %v9331_v18  ;;  %v8389_v30 = vmul.f32 %v6288_v42, %v9332_v51  ;;  %v9334_v44 = vld [vmem:[#allocation88_spill] sm:$0xff]  ;;  %v9335_v11 = vld [vmem:[#allocation110_spill] sm:$0xff]  ;;  %4860 = vmatprep.subr.bf16.mxu0 %v6154_v0 }
 0x422   :  { %v8392_v2 = vmul.f32 %v6288_v42, %v7965_v39  ;;  %v8395_v29 = vmul.f32 %v6288_v42, %v7943_v32  ;;  %v9336_v39 = vld [vmem:[#allocation49_spill] sm:$0xff]  ;;  %v8416_v54 = vmul.f32 %v6288_v42, %v8023_v4  ;;  %v6160_v0 = vld [vmem:[#allocation9 + $0x1d4] ss:$8 sps:$4 sm:$0xff]  }
 0x423   :  { %v6290_v62 = vpop.eup %6289  ;;  %v6157_v32 = vld [vmem:[#allocation9 + $0x1c4] ss:$8 sps:$4 sm:$0xff]  }
 0x424   :  { %v3742_v13 = vmul.f32 %v6290_v62, %v9333_v19  ;;  %v3741_v18 = vmul.f32 %v6290_v62, %v9334_v44  ;;  %v8404_v25 = vmul.f32 %v6290_v62, %v9335_v11  ;;  %v8407_v51 = vmul.f32 %v6290_v62, %v9336_v39  ;;  %9337 = vst [vmem:[#allocation22_spill] sm:$0xff] %v8416_v54  ;;  %v9338_v39 = vld [vmem:[#allocation86_spill] sm:$0xff] }
 0x425   :  { %v8410_v47 = vmul.f32 %v6290_v62, %v7982_v27  ;;  %v8413_v57 = vmul.f32 %v6290_v62, %v7953_v49  ;;  %v8419_v19 = vmul.f32 %v6290_v62, %v8041_v58  ;;  %v3733_v59 = vmul.f32 %v6288_v42, %v9338_v39  ;;  %4861 = vmatpush1.bf16.msra.mxu0 %v6152_v37  ;;  %v6155_v58 = vld [vmem:[#allocation9 + $0x1c0] ss:$8 sps:$4 sm:$0xff]   ;;  %v9339_v27 = vld [vmem:[#allocation94_spill] sm:$0xff] }
 0x426   :  { %v3814_v44 = vpack.c.bf16 %v3742_v13, %v3734_v40  ;;  %v8433_v40 = vmul.f32 %v6290_v62, %v8031_v6  ;;  %4862 = vmatprep.subr.bf16.mxu0 %v6157_v32  ;;  %v8436_v39 = vmul.f32 %v6288_v42, %v8013_v60  ;;  %v9342_v37 = vld [vmem:[#allocation62_spill] sm:$0xff]  ;;  %v9345_v32 = vld [vmem:[#allocation57_spill] sm:$0xff] }
 0x427   :  { %v3813_v11 = vpack.c.bf16 %v3741_v18, %v3733_v59  ;;  %v6158_v42 = vld [vmem:[#allocation9 + $0x1d0] ss:$8 sps:$4 sm:$0xff]   ;;  %v6166_v60 = vld [vmem:[#allocation9 + $0x1f4] ss:$8 sps:$4 sm:$0xff]  }
 0x428   :  { %4817 = vmatprep.mubr.bf16.mxu0 %v3814_v44 }
 0x429   :  { %4818 = vmatmul.mubr.bf16.gmra.mrb[56].mxu0 %v3813_v11 }
 0x42a   :  { %v6292_v13 = vpop.eup %6291  ;;  %4863 = vmatpush1.bf16.msra.mxu0 %v6155_v58 }
 0x42b   :  { %v3750_v5 = vmul.f32 %v6292_v13, %v9339_v27  ;;  %v3749_v49 = vmul.f32 %v6292_v13, %v9340_v41  ;;  %v8441_v10 = vmul.f32 %v6292_v13, %v9341_v33  ;;  %v6294_v44 = vpop.eup %6293  ;;  %v8444_v4 = vmul.f32 %v6292_v13, %v9342_v37  ;;  %v9343_v41 = vld [vmem:[#allocation96_spill] sm:$0xff]  ;;  %v9344_v33 = vld [vmem:[#allocation69_spill] sm:$0xff]  ;;  %4864 = vmatprep.subr.bf16.mxu0 %v6160_v0 }
 0x42c   :  { %v8447_v6 = vmul.f32 %v6292_v13, %v8019_v16  ;;  %v8450_v62 = vmul.f32 %v6292_v13, %v8001_v20  ;;  %v3758_v59 = vmul.f32 %v6294_v44, %v9343_v41  ;;  %v8456_v18 = vmul.f32 %v6294_v44, %v9344_v33  ;;  %v9346_v16 = vld [vmem:[#allocation95_spill] sm:$0xff]  ;;  %v6163_v37 = vld [vmem:[#allocation9 + $0x1e4] ss:$8 sps:$4 sm:$0xff]  }
 0x42d   :  { %v8459_v11 = vmul.f32 %v6294_v44, %v9345_v32  ;;  %v8462_v27 = vmul.f32 %v6292_v13, %v8062_v1  ;;  %v3757_v20 = vmul.f32 %v6294_v44, %v9346_v16  ;;  %v8466_v54 = vmul.f32 %v6294_v44, %v8037_v35 }
 0x42e   :  { %v8469_v58 = vmul.f32 %v6294_v44, %v8009_v7  ;;  %v8472_v41 = vmul.f32 %v6294_v44, %v8068_v24  ;;  %v3822_v33 = vpack.c.bf16 %v3758_v59, %v3750_v5  ;;  %v3824_v32 = vpack.c.bf16 %v8456_v18, %v8441_v10  ;;  %4865 = vmatpush1.bf16.msra.mxu0 %v6158_v42  ;;  %v6161_v59 = vld [vmem:[#allocation9 + $0x1e0] ss:$8 sps:$4 sm:$0xff]   ;;  %v6164_v7 = vld [vmem:[#allocation9 + $0x1f0] ss:$8 sps:$4 sm:$0xff]   ;;  %v6169_v24 = vld [vmem:[#allocation9 + $0x204] ss:$8 sps:$4 sm:$0xff]  }
 0x42f   :  { %v3823_v1 = vpack.c.bf16 %v8459_v11, %v8444_v4  ;;  %v8479_v0 = vmul.f32 %v6292_v13, %v8058_v17  ;;  %v3826_v35 = vpack.c.bf16 %v8466_v54, %v8447_v6  ;;  %v8488_v5 = vmul.f32 %v6294_v44, %v8066_v46  ;;  %4866 = vmatprep.subr.bf16.mxu0 %v6163_v37  ;;  %v6167_v46 = vld [vmem:[#allocation9 + $0x200] ss:$8 sps:$4 sm:$0xff]   ;;  %v6172_v44 = vld [vmem:[#allocation9 + $0x214] ss:$8 sps:$4 sm:$0xff]   ;;  %v6217_v10 = vld [vmem:[#allocation9 + $0x304] ss:$8 sps:$4 sm:$0xff]  }
 0x430   :  { %4827 = vmatprep.mubr.bf16.mxu0 %v3822_v33  ;;  %v3821_v16 = vpack.c.bf16 %v3757_v20, %v3749_v49  ;;  %v9347_v13 = vpack.c.bf16 %v8096_v21, %v8079_v9  ;;  %v9348_v49 = vld [vmem:[#allocation84_spill] sm:$0xff]  ;;  %v9350_v20 = vld [vmem:[#allocation91_spill] sm:$0xff]  ;;  %v9403_v54 = vld [vmem:[#allocation90_spill] sm:$0xff] }
 0x431   :  { %v3827_v17 = vpack.c.bf16 %v8488_v5, %v8479_v0  ;;  %v9349_v42 = vpack.c.bf16 %v8099_v43, %v9348_v49  ;;  %v9351_v37 = vpack.c.bf16 %v8148_v23, %v9350_v20  ;;  %v6170_v33 = vld [vmem:[#allocation9 + $0x210] ss:$8 sps:$4 sm:$0xff]   ;;  %v6175_v9 = vld [vmem:[#allocation9 + $0x224] ss:$8 sps:$4 sm:$0xff]   ;;  %v6173_v21 = vld [vmem:[#allocation9 + $0x220] ss:$8 sps:$4 sm:$0xff]   ;;  %v9355_v43 = vpack.c.bf16 %v8194_v34, %v8172_v22 }
 0x432   :  { %4828 = vmatmul.mubr.bf16.gmra.mrb[60].mxu0 %v3821_v16  ;;  %v6176_v16 = vld [vmem:[#allocation9 + $0x230] ss:$8 sps:$4 sm:$0xff]   ;;  %v6181_v23 = vld [vmem:[#allocation9 + $0x244] ss:$8 sps:$4 sm:$0xff]   ;;  %v9359_v20 = vpack.c.bf16 %v8244_v31, %v8230_v61  ;;  %v6185_v22 = vld [vmem:[#allocation9 + $0x260] ss:$8 sps:$4 sm:$0xff]  }
 0x433   :  { %4867 = vmatpush1.bf16.msra.mxu0 %v6161_v59  ;;  %4870 = vmatprep.mubr.bf16.mxu0 %v9347_v13  ;;  %v9353_v59 = vld [vmem:[#allocation17_spill] sm:$0xff]  ;;  %v9357_v49 = vld [vmem:[#allocation55_spill] sm:$0xff]  ;;  %v9404_v6 = vld [vmem:[#allocation108_spill] sm:$0xff] }
 0x434   :  { %4868 = vmatprep.subr.bf16.mxu0 %v6166_v60  ;;  %v6178_v60 = vld [vmem:[#allocation9 + $0x234] ss:$8 sps:$4 sm:$0xff]   ;;  %v6179_v13 = vld [vmem:[#allocation9 + $0x240] ss:$8 sps:$4 sm:$0xff]   ;;  %v6187_v34 = vld [vmem:[#allocation9 + $0x264] ss:$8 sps:$4 sm:$0xff]  }
 0x435   :  { %v6193_v31 = vld [vmem:[#allocation9 + $0x284] ss:$8 sps:$4 sm:$0xff]   ;;  %v6191_v61 = vld [vmem:[#allocation9 + $0x280] ss:$8 sps:$4 sm:$0xff]   ;;  %v6218_v11 = vld [vmem:[#allocation9 + $0x310] ss:$8 sps:$4 sm:$0xff]  }
 0x436   :  { %v6215_v18 = vld [vmem:[#allocation9 + $0x300] ss:$8 sps:$4 sm:$0xff]  }
 0x437   :  { %4869 = vmatpush1.bf16.msra.mxu0 %v6164_v7  ;;  %v9352_v7 = vld [vmem:[#allocation52_spill] sm:$0xff] }
 0x438   :  { %4951 = vmatprep.subr.bf16.mxu0 %v6169_v24  ;;  %v9354_v24 = vpack.c.bf16 %v9352_v7, %v9353_v59  ;;  %v6188_v7 = vld [vmem:[#allocation9 + $0x270] ss:$8 sps:$4 sm:$0xff]   ;;  %v6196_v59 = vld [vmem:[#allocation9 + $0x294] ss:$8 sps:$4 sm:$0xff]  }
 0x43a   :  { %4871 = vmatmul.mubr.bf16.vlgmr.msra.gmra.mrb[32].mxu0 %v9349_v42 }
 0x43b   :  { %4880 = vmatprep.mubr.bf16.mxu0 %v9351_v37  ;;  %4952 = vmatpush1.bf16.msra.mxu0 %v6167_v46  ;;  %v6184_v46 = vld [vmem:[#allocation9 + $0x254] ss:$8 sps:$4 sm:$0xff]   ;;  %v6182_v37 = vld [vmem:[#allocation9 + $0x250] ss:$8 sps:$4 sm:$0xff]  }
 0x43c   :  { %4953 = vmatprep.subr.bf16.mxu0 %v6172_v44  ;;  %v9356_v44 = vld [vmem:[#allocation111_spill] sm:$0xff] }
 0x43d   :  { %v9358_v42 = vpack.c.bf16 %v9356_v44, %v9357_v49  ;;  %v9368_v44 = vld [vmem:[#allocation32_spill] sm:$0xff]  ;;  %v6212_v49 = vld [vmem:[#allocation9 + $0x2f0] ss:$8 sps:$4 sm:$0xff]  }
 0x43f   :  { %4954 = vmatpush1.bf16.msra.mxu0 %v6170_v33  ;;  %v6190_v33 = vld [vmem:[#allocation9 + $0x274] ss:$8 sps:$4 sm:$0xff]  }
 0x440   :  { %4955 = vmatprep.subr.bf16.mxu0 %v6175_v9  ;;  %v9360_v9 = vld [vmem:[#allocation115_spill] sm:$0xff] }
 0x442   :  { %4881 = vmatmul.mubr.bf16.gmra.mrb[36].mxu0 %v9354_v24  ;;  %v9363_v24 = vpack.c.bf16 %v8299_v15, %v8285_v52  ;;  %v9366_v52 = vpack.c.bf16 %v8404_v25, %v8386_v28  ;;  %v6200_v15 = vld [vmem:[#allocation9 + $0x2b0] ss:$8 sps:$4 sm:$0xff]   ;;  %v6209_v28 = vld [vmem:[#allocation9 + $0x2e0] ss:$8 sps:$4 sm:$0xff]   ;;  %v6214_v25 = vld [vmem:[#allocation9 + $0x2f4] ss:$8 sps:$4 sm:$0xff]  }
 0x443   :  { %4890 = vmatprep.mubr.bf16.mxu0 %v9355_v43  ;;  %4956 = vmatpush1.bf16.msra.mxu0 %v6173_v21  ;;  %v9361_v21 = vpack.c.bf16 %v8247_v56, %v9360_v9  ;;  %v9364_v56 = vpack.c.bf16 %v8348_v8, %v8334_v48  ;;  %v6194_v43 = vld [vmem:[#allocation9 + $0x290] ss:$8 sps:$4 sm:$0xff]   ;;  %v6205_v48 = vld [vmem:[#allocation9 + $0x2c4] ss:$8 sps:$4 sm:$0xff]   ;;  %v6203_v8 = vld [vmem:[#allocation9 + $0x2c0] ss:$8 sps:$4 sm:$0xff]  }
 0x444   :  { %4957 = vmatprep.subr.bf16.mxu0 %v6178_v60  ;;  %v9362_v60 = vpack.c.bf16 %v8296_v38, %v8282_v26  ;;  %v6199_v38 = vld [vmem:[#allocation9 + $0x2a4] ss:$8 sps:$4 sm:$0xff]   ;;  %v6197_v26 = vld [vmem:[#allocation9 + $0x2a0] ss:$8 sps:$4 sm:$0xff]   ;;  %v6226_v9 = vld [vmem:[#allocation9 + $0x334] ss:$8 sps:$4 sm:$0xff]  }
 0x447   :  { %4958 = vmatpush1.bf16.msra.mxu0 %v6176_v16  ;;  %v6202_v16 = vld [vmem:[#allocation9 + $0x2b4] ss:$8 sps:$4 sm:$0xff]  }
 0x448   :  { %4959 = vmatprep.subr.bf16.mxu0 %v6181_v23  ;;  %v9365_v23 = vpack.c.bf16 %v8351_v12, %v8337_v53  ;;  %v6206_v53 = vld [vmem:[#allocation9 + $0x2d0] ss:$8 sps:$4 sm:$0xff]   ;;  %v6211_v12 = vld [vmem:[#allocation9 + $0x2e4] ss:$8 sps:$4 sm:$0xff]  }
 0x44a   :  { %4891 = vmatmul.mubr.bf16.gmra.mrb[40].mxu0 %v9358_v42  ;;  %v9371_v42 = vld [vmem:[#allocation35_spill] sm:$0xff] }
 0x44b   :  { %4900 = vmatprep.mubr.bf16.mxu0 %v9359_v20  ;;  %4960 = vmatpush1.bf16.msra.mxu0 %v6179_v13  ;;  %v6208_v13 = vld [vmem:[#allocation9 + $0x2d4] ss:$8 sps:$4 sm:$0xff]  }
 0x44c   :  { %4961 = vmatprep.subr.bf16.mxu0 %v6184_v46  ;;  %v9367_v46 = vpack.c.bf16 %v8407_v51, %v8389_v30  ;;  %v9369_v30 = vld [vmem:[#allocation26_spill] sm:$0xff] }
 0x44d   :  { %v9370_v51 = vpack.c.bf16 %v9368_v44, %v9369_v30  ;;  %v9372_v20 = vld [vmem:[#allocation106_spill] sm:$0xff]  ;;  %v9392_v44 = vpack.c.bf16 %v8306_v45, %v8288_v3  ;;  %v6247_v3 = vld [vmem:[#allocation9 + $0x3a4] ss:$8 sps:$4 sm:$0xff]   ;;  %v6245_v45 = vld [vmem:[#allocation9 + $0x3a0] ss:$8 sps:$4 sm:$0xff]  }
 0x44e   :  { %v6236_v30 = vld [vmem:[#allocation9 + $0x370] ss:$8 sps:$4 sm:$0xff]  }
 0x44f   :  { %4962 = vmatpush1.bf16.msra.mxu0 %v6182_v37  ;;  %v9373_v37 = vpack.c.bf16 %v9371_v42, %v9372_v20  ;;  %v6242_v42 = vld [vmem:[#allocation9 + $0x390] ss:$8 sps:$4 sm:$0xff]   ;;  %v6250_v20 = vld [vmem:[#allocation9 + $0x3b4] ss:$8 sps:$4 sm:$0xff]  }
 0x450   :  { %4963 = vmatprep.subr.bf16.mxu0 %v6187_v34  ;;  %v9374_v34 = vld [vmem:[#allocation51_spill] sm:$0xff] }
 0x452   :  { %4901 = vmatmul.mubr.bf16.gmra.mrb[44].mxu0 %v9361_v21  ;;  %v9377_v21 = vld [vmem:[#allocation16_spill] sm:$0xff] }
 0x453   :  { %4910 = vmatprep.mubr.bf16.mxu0 %v9362_v60  ;;  %4964 = vmatpush1.bf16.msra.mxu0 %v6185_v22  ;;  %v9375_v22 = vld [vmem:[#allocation36_spill] sm:$0xff]  ;;  %v9378_v60 = vld [vmem:[#allocation99_spill] sm:$0xff] }
 0x454   :  { %4965 = vmatprep.subr.bf16.mxu0 %v6190_v33  ;;  %v9376_v4 = vpack.c.bf16 %v9374_v34, %v9375_v22  ;;  %v6221_v33 = vld [vmem:[#allocation9 + $0x320] ss:$8 sps:$4 sm:$0xff]   ;;  %v6256_v22 = vld [vmem:[#allocation9 + $0x3d4] ss:$8 sps:$4 sm:$0xff]  }
 0x457   :  { %4966 = vmatpush1.bf16.msra.mxu0 %v6188_v7  ;;  %v9379_v7 = vpack.c.bf16 %v9377_v21, %v9378_v60  ;;  %v9406_v21 = vld [vmem:[#allocation98_spill] sm:$0xff]  ;;  %v9407_v60 = vld [vmem:[#allocation101_spill] sm:$0xff] }
 0x458   :  { %4967 = vmatprep.subr.bf16.mxu0 %v6193_v31  ;;  %v9380_v31 = vld [vmem:[#allocation59_spill] sm:$0xff] }
 0x45a   :  { %4911 = vmatmul.mubr.bf16.gmra.mrb[48].mxu0 %v9363_v24  ;;  %v6224_v24 = vld [vmem:[#allocation9 + $0x330] ss:$8 sps:$4 sm:$0xff]  }
 0x45b   :  { %4920 = vmatprep.mubr.bf16.mxu0 %v9364_v56  ;;  %4968 = vmatpush1.bf16.msra.mxu0 %v6191_v61  ;;  %v9381_v61 = vld [vmem:[#allocation100_spill] sm:$0xff] }
 0x45c   :  { %4969 = vmatprep.subr.bf16.mxu0 %v6196_v59  ;;  %v9382_v59 = vpack.c.bf16 %v9380_v31, %v9381_v61  ;;  %v6229_v56 = vld [vmem:[#allocation9 + $0x344] ss:$8 sps:$4 sm:$0xff]   ;;  %v9410_v61 = vld [vmem:[#allocation54_spill] sm:$0xff] }
 0x45d   :  { %v9409_v31 = vld [vmem:[#allocation56_spill] sm:$0xff] }
 0x45f   :  { %4970 = vmatpush1.bf16.msra.mxu0 %v6194_v43  ;;  %v6227_v43 = vld [vmem:[#allocation9 + $0x340] ss:$8 sps:$4 sm:$0xff]  }
 0x460   :  { %4971 = vmatprep.subr.bf16.mxu0 %v6199_v38  ;;  %v6232_v38 = vld [vmem:[#allocation9 + $0x354] ss:$8 sps:$4 sm:$0xff]  }
 0x462   :  { %4921 = vmatmul.mubr.bf16.gmra.mrb[52].mxu0 %v9365_v23 }
 0x463   :  { %4930 = vmatprep.mubr.bf16.mxu0 %v9366_v52  ;;  %4972 = vmatpush1.bf16.msra.mxu0 %v6197_v26  ;;  %v9383_v26 = vld [vmem:[#allocation117_spill] sm:$0xff]  ;;  %v9386_v52 = vld [vmem:[#allocation60_spill] sm:$0xff] }
 0x464   :  { %4973 = vmatprep.subr.bf16.mxu0 %v6202_v16  ;;  %v9384_v16 = vld [vmem:[#allocation19_spill] sm:$0xff] }
 0x465   :  { %v9385_v23 = vpack.c.bf16 %v9383_v26, %v9384_v16  ;;  %v9418_v26 = vld [vmem:[#allocation39_spill] sm:$0xff]  ;;  %v9419_v16 = vld [vmem:[#allocation114_spill] sm:$0xff] }
 0x467   :  { %4974 = vmatpush1.bf16.msra.mxu0 %v6200_v15  ;;  %v9387_v15 = vld [vmem:[#allocation113_spill] sm:$0xff] }
 0x468   :  { %4975 = vmatprep.subr.bf16.mxu0 %v6205_v48  ;;  %v9388_v48 = vpack.c.bf16 %v9386_v52, %v9387_v15  ;;  %v9421_v52 = vld [vmem:[#allocation116_spill] sm:$0xff] }
 0x469   :  { %v9422_v15 = vld [vmem:[#allocation64_spill] sm:$0xff] }
 0x46a   :  { %4931 = vmatmul.mubr.bf16.gmra.mrb[56].mxu0 %v9367_v46  ;;  %v6233_v46 = vld [vmem:[#allocation9 + $0x360] ss:$8 sps:$4 sm:$0xff]  }
 0x46b   :  { %4940 = vmatprep.mubr.bf16.mxu0 %v3824_v32  ;;  %4976 = vmatpush1.bf16.msra.mxu0 %v6203_v8  ;;  %v6220_v32 = vld [vmem:[#allocation9 + $0x314] ss:$8 sps:$4 sm:$0xff]   ;;  %v6230_v8 = vld [vmem:[#allocation9 + $0x350] ss:$8 sps:$4 sm:$0xff]  }
 0x46c   :  { %4977 = vmatprep.subr.bf16.mxu0 %v6208_v13  ;;  %v6235_v13 = vld [vmem:[#allocation9 + $0x364] ss:$8 sps:$4 sm:$0xff]  }
 0x46f   :  { %4978 = vmatpush1.bf16.msra.mxu0 %v6206_v53  ;;  %v6238_v53 = vld [vmem:[#allocation9 + $0x374] ss:$8 sps:$4 sm:$0xff]  }
 0x470   :  { %4979 = vmatprep.subr.bf16.mxu0 %v6211_v12  ;;  %v9389_v12 = vld [vmem:[#allocation103_spill] sm:$0xff] }
 0x472   :  { %4941 = vmatmul.mubr.bf16.gmra.mrb[60].mxu0 %v3823_v1  ;;  %v6223_v1 = vld [vmem:[#allocation9 + $0x324] ss:$8 sps:$4 sm:$0xff]  }
 0x473   :  { %4980 = vmatpush1.bf16.msra.mxu0 %v6209_v28  ;;  %4983 = vmatprep.mubr.bf16.mxu0 %v9370_v51  ;;  %v9390_v28 = vld [vmem:[#allocation61_spill] sm:$0xff] }
 0x474   :  { %4981 = vmatprep.subr.bf16.mxu0 %v6214_v25  ;;  %v9391_v25 = vpack.c.bf16 %v9389_v12, %v9390_v28  ;;  %v6241_v51 = vld [vmem:[#allocation9 + $0x384] ss:$8 sps:$4 sm:$0xff]   ;;  %v9428_v12 = vld [vmem:[#allocation119_spill] sm:$0xff] }
 0x477   :  { %4982 = vmatpush1.bf16.msra.mxu0 %v6212_v49  ;;  %v6239_v49 = vld [vmem:[#allocation9 + $0x380] ss:$8 sps:$4 sm:$0xff]  }
 0x478   :  { %5064 = vmatprep.subr.bf16.mxu0 %v6217_v10  ;;  %v6244_v10 = vld [vmem:[#allocation9 + $0x394] ss:$8 sps:$4 sm:$0xff]  }
 0x47a   :  { %4984 = vmatmul.mubr.bf16.vlgmr.msra.gmra.mrb[32].mxu0 %v9373_v37  ;;  %v9395_v37 = vld [vmem:[#allocation92_spill] sm:$0xff] }
 0x47b   :  { %4993 = vmatprep.mubr.bf16.mxu0 %v9376_v4  ;;  %5065 = vmatpush1.bf16.msra.mxu0 %v6215_v18  ;;  %v9393_v18 = vpack.c.bf16 %v8309_v36, %v8302_v50  ;;  %v9396_v34 = vpack.c.bf16 %v8361_v14, %v9395_v37  ;;  %v9397_v36 = vpack.c.bf16 %v8410_v47, %v8392_v2  ;;  %v6248_v50 = vld [vmem:[#allocation9 + $0x3b0] ss:$8 sps:$4 sm:$0xff]   ;;  %v6259_v47 = vld [vmem:[#allocation9 + $0x3e4] ss:$8 sps:$4 sm:$0xff]   ;;  %v6257_v2 = vld [vmem:[#allocation9 + $0x3e0] ss:$8 sps:$4 sm:$0xff]  }
 0x47c   :  { %5066 = vmatprep.subr.bf16.mxu0 %v6220_v32  ;;  %v9394_v32 = vpack.c.bf16 %v8358_v63, %v8340_v55  ;;  %v6253_v55 = vld [vmem:[#allocation9 + $0x3c4] ss:$8 sps:$4 sm:$0xff]   ;;  %v6251_v63 = vld [vmem:[#allocation9 + $0x3c0] ss:$8 sps:$4 sm:$0xff]   ;;  %v9398_v4 = vpack.c.bf16 %v8413_v57, %v8395_v29  ;;  %v6254_v14 = vld [vmem:[#allocation9 + $0x3d0] ss:$8 sps:$4 sm:$0xff]  }
 0x47d   :  { %v9401_v29 = vld [vmem:[#allocation30_spill] sm:$0xff] }
 0x47f   :  { %5067 = vmatpush1.bf16.msra.mxu0 %v6218_v11  ;;  %v6262_v11 = vld [vmem:[#allocation9 + $0x3f4] ss:$8 sps:$4 sm:$0xff]  }
 0x480   :  { %5068 = vmatprep.subr.bf16.mxu0 %v6223_v1  ;;  %v9399_v1 = vpack.c.bf16 %v8469_v58, %v8450_v62  ;;  %v9411_v62 = vpack.c.bf16 %v9409_v31, %v9410_v61  ;;  %v9412_v58 = vld [vmem:[#allocation118_spill] sm:$0xff] }
 0x482   :  { %4994 = vmatmul.mubr.bf16.gmra.mrb[36].mxu0 %v9379_v7  ;;  %v9408_v7 = vpack.c.bf16 %v9406_v21, %v9407_v60 }
 0x483   :  { %5003 = vmatprep.mubr.bf16.mxu0 %v9382_v59  ;;  %5069 = vmatpush1.bf16.msra.mxu0 %v6221_v33  ;;  %v9400_v33 = vld [vmem:[#allocation85_spill] sm:$0xff]  ;;  %v9413_v59 = vld [vmem:[#allocation58_spill] sm:$0xff] }
 0x484   :  { %5070 = vmatprep.subr.bf16.mxu0 %v6226_v9  ;;  %v9402_v57 = vpack.c.bf16 %v9400_v33, %v9401_v29  ;;  %v6260_v9 = vld [vmem:[#allocation9 + $0x3f0] ss:$8 sps:$4 sm:$0xff]  }
 0x487   :  { %5071 = vmatpush1.bf16.msra.mxu0 %v6224_v24  ;;  %v9414_v24 = vpack.c.bf16 %v9412_v58, %v9413_v59 }
 0x488   :  { %5072 = vmatprep.subr.bf16.mxu0 %v6229_v56  ;;  %v9415_v56 = vld [vmem:[#allocation38_spill] sm:$0xff] }
 0x48a   :  { %5004 = vmatmul.mubr.bf16.gmra.mrb[40].mxu0 %v9385_v23  ;;  %v9420_v23 = vpack.c.bf16 %v9418_v26, %v9419_v16 }
 0x48b   :  { %5013 = vmatprep.mubr.bf16.mxu0 %v9388_v48  ;;  %5073 = vmatpush1.bf16.msra.mxu0 %v6227_v43  ;;  %v9416_v43 = vld [vmem:[#allocation102_spill] sm:$0xff]  ;;  %v9423_v48 = vpack.c.bf16 %v9421_v52, %v9422_v15 }
 0x48c   :  { %5074 = vmatprep.subr.bf16.mxu0 %v6232_v38  ;;  %v9417_v38 = vpack.c.bf16 %v9415_v56, %v9416_v43 }
 0x48f   :  { %5075 = vmatpush1.bf16.msra.mxu0 %v6230_v8  ;;  %v9424_v8 = vld [vmem:[#allocation25_spill] sm:$0xff] }
 0x490   :  { %5076 = vmatprep.subr.bf16.mxu0 %v6235_v13  ;;  %v9425_v13 = vld [vmem:[#allocation97_spill] sm:$0xff] }
 0x492   :  { %5014 = vmatmul.mubr.bf16.gmra.mrb[44].mxu0 %v9391_v25  ;;  %v9430_v25 = vld [vmem:[#allocation18_spill] sm:$0xff] }
 0x493   :  { %5023 = vmatprep.mubr.bf16.mxu0 %v9392_v44  ;;  %5077 = vmatpush1.bf16.msra.mxu0 %v6233_v46  ;;  %v9426_v46 = vpack.c.bf16 %v9424_v8, %v9425_v13  ;;  %v9431_v44 = vld [vmem:[#allocation65_spill] sm:$0xff] }
 0x494   :  { %5078 = vmatprep.subr.bf16.mxu0 %v6238_v53  ;;  %v9427_v53 = vld [vmem:[#allocation40_spill] sm:$0xff] }
 0x495   :  { %v9429_v28 = vpack.c.bf16 %v9427_v53, %v9428_v12 }
 0x497   :  { %5079 = vmatpush1.bf16.msra.mxu0 %v6236_v30  ;;  %v9432_v30 = vpack.c.bf16 %v9430_v25, %v9431_v44 }
 0x498   :  { %5080 = vmatprep.subr.bf16.mxu0 %v6241_v51  ;;  %v9433_v51 = vld [vmem:[#allocation66_spill] sm:$0xff] }
 0x49a   :  { %5024 = vmatmul.mubr.bf16.gmra.mrb[48].mxu0 %v9393_v18  ;;  %v9436_v18 = vld [vmem:[#allocation22_spill] sm:$0xff] }
 0x49b   :  { %5033 = vmatprep.mubr.bf16.mxu0 %v9394_v32  ;;  %5081 = vmatpush1.bf16.msra.mxu0 %v6239_v49  ;;  %v9434_v49 = vld [vmem:[#allocation105_spill] sm:$0xff]  ;;  %v9437_v32 = vpack.c.bf16 %v8419_v19, %v9436_v18 }
 0x49c   :  { %5082 = vmatprep.subr.bf16.mxu0 %v6244_v10  ;;  %v9435_v10 = vpack.c.bf16 %v9433_v51, %v9434_v49 }
 0x49f   :  { %5083 = vmatpush1.bf16.msra.mxu0 %v6242_v42  ;;  %v9438_v42 = vpack.c.bf16 %v8433_v40, %v8436_v39 }
 0x4a0   :  { %5084 = vmatprep.subr.bf16.mxu0 %v6247_v3  ;;  %v9439_v3 = vpack.c.bf16 %v8472_v41, %v8462_v27 }
 0x4a2   :  { %5034 = vmatmul.mubr.bf16.gmra.mrb[52].mxu0 %v9396_v34 }
 0x4a3   :  { %5043 = vmatprep.mubr.bf16.mxu0 %v9397_v36  ;;  %5085 = vmatpush1.bf16.msra.mxu0 %v6245_v45 }
 0x4a4   :  { %5086 = vmatprep.subr.bf16.mxu0 %v6250_v20 }
 0x4a7   :  { %5087 = vmatpush1.bf16.msra.mxu0 %v6248_v50 }
 0x4a8   :  { %5088 = vmatprep.subr.bf16.mxu0 %v6253_v55 }
 0x4aa   :  { %5044 = vmatmul.mubr.bf16.gmra.mrb[56].mxu0 %v9398_v4 }
 0x4ab   :  { %5053 = vmatprep.mubr.bf16.mxu0 %v3826_v35  ;;  %5089 = vmatpush1.bf16.msra.mxu0 %v6251_v63  ;;  %v9405_v35 = vpack.c.bf16 %v9403_v54, %v9404_v6 }
 0x4ac   :  { %5090 = vmatprep.subr.bf16.mxu0 %v6256_v22 }
 0x4af   :  { %5091 = vmatpush1.bf16.msra.mxu0 %v6254_v14 }
 0x4b0   :  { %5092 = vmatprep.subr.bf16.mxu0 %v6259_v47 }
 0x4b2   :  { %5054 = vmatmul.mubr.bf16.gmra.mrb[60].mxu0 %v9399_v1 }
 0x4b3   :  { %5093 = vmatpush1.bf16.msra.mxu0 %v6257_v2  ;;  %5096 = vmatprep.mubr.bf16.mxu0 %v9402_v57 }
 0x4b4   :  { %5094 = vmatprep.subr.bf16.mxu0 %v6262_v11 }
 0x4b7   :  { %5095 = vmatpush1.bf16.msra.mxu0 %v6260_v9 }
 0x4ba   :  { %5097 = vmatmul.mubr.bf16.vlgmr.msra.gmra.mrb[32].mxu0 %v9405_v35 }
 0x4bb   :  { %5106 = vmatprep.mubr.bf16.mxu0 %v9408_v7 }
 0x4c2   :  { %5107 = vmatmul.mubr.bf16.gmra.mrb[36].mxu0 %v9411_v62 }
 0x4c3   :  { %5116 = vmatprep.mubr.bf16.mxu0 %v9414_v24 }
 0x4ca   :  { %5117 = vmatmul.mubr.bf16.gmra.mrb[40].mxu0 %v9417_v38 }
 0x4cb   :  { %5126 = vmatprep.mubr.bf16.mxu0 %v9420_v23 }
 0x4d2   :  { %5127 = vmatmul.mubr.bf16.gmra.mrb[44].mxu0 %v9423_v48 }
 0x4d3   :  { %5136 = vmatprep.mubr.bf16.mxu0 %v9426_v46 }
 0x4da   :  { %5137 = vmatmul.mubr.bf16.gmra.mrb[48].mxu0 %v9429_v28 }
 0x4db   :  { %5146 = vmatprep.mubr.bf16.mxu0 %v9432_v30 }
 0x4e2   :  { %5147 = vmatmul.mubr.bf16.gmra.mrb[52].mxu0 %v9435_v10 }
 0x4e3   :  { %5156 = vmatprep.mubr.bf16.mxu0 %v9437_v32 }
 0x4ea   :  { %5157 = vmatmul.mubr.bf16.gmra.mrb[56].mxu0 %v9438_v42 }
 0x4eb   :  { %5166 = vmatprep.mubr.bf16.mxu0 %v9439_v3 }
 0x4f2   :  { %5167 = vmatmul.mubr.bf16.gmra.mrb[60].mxu0 %v3827_v17 }
 0x58d   :  { %v5098_v45 = vpop.f32.mrb[32].mxu0 }
 0x58e   :  { %5177 = vst [vmem:[#allocation11] sm:$0xff] %v5098_v45  ;;  %v5100_v20 = vpop.f32.mrb[33].mxu0 }
 0x58f   :  { %5178 = vst [vmem:[#allocation11 + $0x8] sm:$0xff] %v5100_v20  ;;  %v5102_v37 = vpop.f32.mrb[34].mxu0 }
 0x590   :  { %5179 = vst [vmem:[#allocation11 + $0x10] sm:$0xff] %v5102_v37  ;;  %v5104_v19 = vpop.f32.mrb[35].mxu0 }
 0x591   :  { %5180 = vst [vmem:[#allocation11 + $0x18] sm:$0xff] %v5104_v19 }
 0x595   :  { %v5108_v34 = vpop.f32.mrb[36].mxu0 }
 0x596   :  { %5181 = vst [vmem:[#allocation11 + $0x20] sm:$0xff] %v5108_v34  ;;  %v5110_v40 = vpop.f32.mrb[37].mxu0 }
 0x597   :  { %5182 = vst [vmem:[#allocation11 + $0x28] sm:$0xff] %v5110_v40  ;;  %v5112_v39 = vpop.f32.mrb[38].mxu0 }
 0x598   :  { %5183 = vst [vmem:[#allocation11 + $0x30] sm:$0xff] %v5112_v39  ;;  %v5114_v27 = vpop.f32.mrb[39].mxu0 }
 0x599   :  { %5184 = vst [vmem:[#allocation11 + $0x38] sm:$0xff] %v5114_v27 }
 0x59d   :  { %v5118_v41 = vpop.f32.mrb[40].mxu0 }
 0x59e   :  { %5185 = vst [vmem:[#allocation11 + $0x40] sm:$0xff] %v5118_v41  ;;  %v5120_v0 = vpop.f32.mrb[41].mxu0 }
 0x59f   :  { %5186 = vst [vmem:[#allocation11 + $0x48] sm:$0xff] %v5120_v0  ;;  %v5122_v5 = vpop.f32.mrb[42].mxu0 }
 0x5a0   :  { %5187 = vst [vmem:[#allocation11 + $0x50] sm:$0xff] %v5122_v5  ;;  %v5124_v17 = vpop.f32.mrb[43].mxu0 }
 0x5a1   :  { %5188 = vst [vmem:[#allocation11 + $0x58] sm:$0xff] %v5124_v17 }
 0x5a5   :  { %v5128_v36 = vpop.f32.mrb[44].mxu0 }
 0x5a6   :  { %5189 = vst [vmem:[#allocation11 + $0x60] sm:$0xff] %v5128_v36  ;;  %v5130_v50 = vpop.f32.mrb[45].mxu0 }
 0x5a7   :  { %5190 = vst [vmem:[#allocation11 + $0x68] sm:$0xff] %v5130_v50  ;;  %v5132_v55 = vpop.f32.mrb[46].mxu0 }
 0x5a8   :  { %5191 = vst [vmem:[#allocation11 + $0x70] sm:$0xff] %v5132_v55  ;;  %v5134_v63 = vpop.f32.mrb[47].mxu0 }
 0x5a9   :  { %5192 = vst [vmem:[#allocation11 + $0x78] sm:$0xff] %v5134_v63 }
 0x5ad   :  { %v5138_v22 = vpop.f32.mrb[48].mxu0 }
 0x5ae   :  { %5193 = vst [vmem:[#allocation11 + $0x80] sm:$0xff] %v5138_v22  ;;  %v5140_v4 = vpop.f32.mrb[49].mxu0 }
 0x5af   :  { %5194 = vst [vmem:[#allocation11 + $0x88] sm:$0xff] %v5140_v4  ;;  %v5142_v14 = vpop.f32.mrb[50].mxu0 }
 0x5b0   :  { %5195 = vst [vmem:[#allocation11 + $0x90] sm:$0xff] %v5142_v14  ;;  %v5144_v47 = vpop.f32.mrb[51].mxu0 }
 0x5b1   :  { %5196 = vst [vmem:[#allocation11 + $0x98] sm:$0xff] %v5144_v47 }
 0x5b5   :  { %v5148_v2 = vpop.f32.mrb[52].mxu0 }
 0x5b6   :  { %5197 = vst [vmem:[#allocation11 + $0xa0] sm:$0xff] %v5148_v2  ;;  %v5150_v11 = vpop.f32.mrb[53].mxu0 }
 0x5b7   :  { %5198 = vst [vmem:[#allocation11 + $0xa8] sm:$0xff] %v5150_v11  ;;  %v5152_v1 = vpop.f32.mrb[54].mxu0 }
 0x5b8   :  { %5199 = vst [vmem:[#allocation11 + $0xb0] sm:$0xff] %v5152_v1  ;;  %v5154_v33 = vpop.f32.mrb[55].mxu0 }
 0x5b9   :  { %5200 = vst [vmem:[#allocation11 + $0xb8] sm:$0xff] %v5154_v33 }
 0x5bd   :  { %v5158_v29 = vpop.f32.mrb[56].mxu0 }
 0x5be   :  { %5201 = vst [vmem:[#allocation11 + $0xc0] sm:$0xff] %v5158_v29  ;;  %v5160_v57 = vpop.f32.mrb[57].mxu0 }
 0x5bf   :  { %5202 = vst [vmem:[#allocation11 + $0xc8] sm:$0xff] %v5160_v57  ;;  %v5162_v9 = vpop.f32.mrb[58].mxu0 }
 0x5c0   :  { %5203 = vst [vmem:[#allocation11 + $0xd0] sm:$0xff] %v5162_v9  ;;  %v5164_v54 = vpop.f32.mrb[59].mxu0 }
 0x5c1   :  { %5204 = vst [vmem:[#allocation11 + $0xd8] sm:$0xff] %v5164_v54 }
 0x5c5   :  { %v5168_v6 = vpop.f32.mrb[60].mxu0 }
 0x5c6   :  { %5205 = vst [vmem:[#allocation11 + $0xe0] sm:$0xff] %v5168_v6  ;;  %v5170_v35 = vpop.f32.mrb[61].mxu0 }
 0x5c7   :  { %5206 = vst [vmem:[#allocation11 + $0xe8] sm:$0xff] %v5170_v35  ;;  %v5172_v21 = vpop.f32.mrb[62].mxu0 }
 0x5c8   :  { %5207 = vst [vmem:[#allocation11 + $0xf0] sm:$0xff] %v5172_v21  ;;  %v5174_v60 = vpop.f32.mrb[63].mxu0 }
 0x5c9   :  { %5208 = vst [vmem:[#allocation11 + $0xf8] sm:$0xff] %v5174_v60 }
 0x5ca   :  { %6458 = shalt.err (!%p6455_p8)
}
 0x5cb   :  { %s6459_s15 = scalar_lea.hbm %s8652_s4, 4096 }
 0x5cc   :  { %p6460_p9 = scmp.ne.s32.totalorder %s8652_s4, %s6459_s15  ;;  %p6463_p10 = scmp.lt.u32.totalorder %s6459_s15, %s8652_s4 }
 0x5ce   :  { %p6465_p11 = pnand %p6463_p10, %p6460_p9 }
 0x5d0   :  { %6468 = shalt.err (!%p6465_p11)
}
 0x5d1   :  { %s6486_s20 = smov 256   ;;  %s6487_s21 = smov 16  }
 0x5d2   :  { %5220 = dma.vmem_to_hbm [thread:$0]  %s5215_s25, 4096, %s8652_s4, [#allocation5], %s6486_s20, %s6486_s20, %s6487_s21  }
 0x5d3   :  { %6475 = dma.done.wait [#allocation5], 4096  }
 0x5d4   :  { %6476 = vsyncadd [#allocation5], 4294963200 }
 0x5d5   :  { %5224 = vsyncpa [#allocation4], 1 }
 0x5d6   :  { %5225 = vsyncpa [#allocation7], 1 }
 0x5d7   :  { %5226 = vsyncpa [#allocation10], 1 }
 0x5d8   :  { %5227 = vsyncpa [#allocation5], 1 }

</bundles_post_ra>
